<compile_context>
chip_gen: v6e
topology: v6e:2x2x1
jax: 0.10.0
libtpu: 0.0.40
codegen_flags: <defaults>
</compile_context>

<pallas_src>
import jax
import jax.numpy as jnp
import numpy as np
from jax import lax
from jax.experimental import pallas as pl
from jax.experimental.pallas import tpu as pltpu

NER_DIM = 9
SA_DIM = 3
HEAD_PAD = 128  # lane-dense padded output width for the fc heads
# Set to jnp.bfloat16 on v6e/v7x for MXU throughput (keep f32 accumulation/state).
# Default f32 keeps the strict 1e-3 check against the f32 reference below.
MATMUL_DTYPE = jnp.float32


# ---------------------------------------------------------------------------
# Fused Pallas kernel: L BiLSTM layers + fc heads, everything VMEM-resident
# ---------------------------------------------------------------------------
def _make_nersa_kernel(T: int, B: int, D: int, H: int, L: int):
    G = 4 * H    # gates per direction (i, f, g, o)
    GG = 8 * H   # both directions

    def kernel(*refs):
        x_ref, len_ref = refs[0], refs[1]
        wih_refs = [refs[2 + 3 * l] for l in range(L)]
        whh_refs = [refs[3 + 3 * l] for l in range(L)]
        b_refs = [refs[4 + 3 * l] for l in range(L)]
        k = 2 + 3 * L
        w_ner_ref, b_ner_ref, w_sa_ref, b_sa_ref = refs[k:k + 4]
        ner_ref, sa_ref = refs[k + 4:k + 6]
        gin_s, act_f, act_b, h_f, c_f, h_b, c_b = refs[k + 6:]

        lens = len_ref[...]  # [B, 1] int32, hoisted out of all loops

        def run_layer(x_in, wih_ref, whh_ref, b_ref):
            # --- hoisted input projection: one MXU matmul for all T steps,
            #     both directions (8H = 256 lanes wide) -----------------------
            gin_s[...] = (jnp.dot(x_in.astype(MATMUL_DTYPE),
                                  wih_ref[...].astype(MATMUL_DTYPE),
                                  preferred_element_type=jnp.float32)
                          + b_ref[...])                      # [T*B, 8H]
            whh = whh_ref[...].astype(MATMUL_DTYPE)          # hoist recurrent weights
            h_f[...] = jnp.zeros_like(h_f)
            c_f[...] = jnp.zeros_like(c_f)
            h_b[...] = jnp.zeros_like(h_b)
            c_b[...] = jnp.zeros_like(c_b)

            # --- recurrence: fully unrolled (T static), fwd & bwd per step ---
            for s in range(T):
                tf = s
                tb = T - 1 - s
                off_f = tf * B
                off_b = tb * B
                gin_fw = gin_s[pl.ds(off_f, B), :G]          # [B, 4H]
                gin_bw = gin_s[pl.ds(off_b, B), G:]          # [B, 4H]
                hf = h_f[...]
                hb = h_b[...]
                # single recurrent matmul for both directions (block-diag w_hh)
                g_hh = jnp.dot(jnp.concatenate([hf, hb], axis=-1).astype(MATMUL_DTYPE),
                               whh, preferred_element_type=jnp.float32)   # [B, 8H]
                gates = jnp.concatenate([gin_fw, gin_bw], axis=-1) + g_hh  # [B, 8H]
                sig = jax.nn.sigmoid(gates)                  # one dense EUP pass

                # forward direction (gate order i, f, g, o)
                i_fw = sig[:, 0:H]
                f_fw = sig[:, H:2 * H]
                g_fw = jnp.tanh(gates[:, 2 * H:3 * H])
                o_fw = sig[:, 3 * H:4 * H]
                c_fw = f_fw * c_f[...] + i_fw * g_fw
                h_fw = o_fw * jnp.tanh(c_fw)
                m_f = lens > tf                              # [B, 1]
                h_fu = jnp.where(m_f, h_fw, hf)              # frozen past true length
                c_fu = jnp.where(m_f, c_fw, c_f[...])
                h_f[...] = h_fu
                c_f[...] = c_fu
                act_f[pl.ds(off_f, B), :] = jnp.where(m_f, h_fu, 0.0)

                # backward direction
                i_bw = sig[:, G:G + H]
                f_bw = sig[:, G + H:G + 2 * H]
                g_bw = jnp.tanh(gates[:, G + 2 * H:G + 3 * H])
                o_bw = sig[:, G + 3 * H:G + 4 * H]
                c_bw = f_bw * c_b[...] + i_bw * g_bw
                h_bw = o_bw * jnp.tanh(c_bw)
                m_b = lens > tb
                h_bu = jnp.where(m_b, h_bw, hb)
                c_bu = jnp.where(m_b, c_bw, c_b[...])
                h_b[...] = h_bu
                c_b[...] = c_bu
                act_b[pl.ds(off_b, B), :] = jnp.where(m_b, h_bu, 0.0)

        # layer 0 reads the embedded tokens; deeper layers read the previous
        # layer's activations (VMEM-resident; safe to consume then overwrite
        # because the input projection uses them exactly once, up front).
        run_layer(x_ref[...], wih_refs[0], whh_refs[0], b_refs[0])
        for l in range(1, L):
            x_in = jnp.concatenate([act_f[...], act_b[...]], axis=-1)   # [T*B, 2H]
            run_layer(x_in, wih_refs[l], whh_refs[l], b_refs[l])

        # --- fused fc heads, lane-dense (128-wide) HBM stores ----------------
        outs = jnp.concatenate([act_f[...], act_b[...]], axis=-1)       # [T*B, 2H]
        ner_ref[...] = (jnp.dot(outs.astype(MATMUL_DTYPE),
                                w_ner_ref[...].astype(MATMUL_DTYPE),
                                preferred_element_type=jnp.float32)
                        + b_ner_ref[...])
        # torch.cat((hidden[-1], hidden[-2])) == [backward_final, forward_final]
        hid = jnp.concatenate([h_b[...], h_f[...]], axis=-1)            # [B, 2H]
        sa_ref[...] = (jnp.dot(hid.astype(MATMUL_DTYPE),
                               w_sa_ref[...].astype(MATMUL_DTYPE),
                               preferred_element_type=jnp.float32)
                       + b_sa_ref[...])

    return kernel


def _fused_forward_call(x_flat, len_b1, packed):
    TB, D = x_flat.shape
    Bp = len_b1.shape[0]
    T = TB // Bp
    H = packed["lstm"][0]["whh"].shape[0] // 2
    L = len(packed["lstm"])

    kernel = _make_nersa_kernel(T, Bp, D, H, L)

    flat_in = [x_flat, len_b1]
    for lp in packed["lstm"]:
        flat_in += [lp["wih"], lp["whh"], lp["b"]]
    flat_in += [packed["w_ner"], packed["b_ner"], packed["w_sa"], packed["b_sa"]]

    vmem = pl.BlockSpec(memory_space=pltpu.MemorySpace.VMEM)
    ner, sa = pl.pallas_call(
        kernel,
        out_shape=(jax.ShapeDtypeStruct((TB, HEAD_PAD), jnp.float32),
                   jax.ShapeDtypeStruct((Bp, HEAD_PAD), jnp.float32)),
        in_specs=[vmem] * len(flat_in),
        out_specs=(vmem, vmem),
        scratch_shapes=[
            pltpu.VMEM((TB, 8 * H), jnp.float32),   # hoisted input-gate buffer
            pltpu.VMEM((TB, H), jnp.float32),       # fwd activations (per layer)
            pltpu.VMEM((TB, H), jnp.float32),       # bwd activations (per layer)
            pltpu.VMEM((Bp, H), jnp.float32),       # h_fwd
            pltpu.VMEM((Bp, H), jnp.float32),       # c_fwd
            pltpu.VMEM((Bp, H), jnp.float32),       # h_bwd
            pltpu.VMEM((Bp, H), jnp.float32),       # c_bwd
        ],
    )(*flat_in)
    return ner, sa


# ---------------------------------------------------------------------------
# Model wrapper (jittable end to end; no host sync)
# ---------------------------------------------------------------------------
def nersa_forward(packed, inputs, lengths, t_out=None):
    """inputs: [B, T] int32 token ids; lengths: [B] int32 (sorted descending).

    t_out: static output length (== max(lengths) to match pad_packed_sequence);
           defaults to T. Passed statically so the forward jits without syncing.
    """
    emb = packed["embedding"]
    embedded = jnp.take(emb, inputs, axis=0)          # [B, T, D]
    B, T, D = embedded.shape

    Bp = max(8, -(-B // 8) * 8)                       # fill all 8 sublanes
    x = jnp.transpose(embedded, (1, 0, 2))            # [T, B, D] time-major
    lens = lengths.astype(jnp.int32)
    if Bp > B:
        x = jnp.pad(x, ((0, 0), (0, Bp - B), (0, 0)))
        lens = jnp.pad(lens, (0, Bp - B))             # pad rows: length 0 -> stay zero
    x_flat = x.reshape(T * Bp, D)
    len_b1 = lens.reshape(Bp, 1)

    ner_full, sa_full = _fused_forward_call(x_flat, len_b1, packed)

    T_out = T if t_out is None else int(t_out)
    ner = ner_full.reshape(T, Bp, HEAD_PAD)
    output_ner = jnp.transpose(ner[:T_out, :B, :NER_DIM], (1, 0, 2))  # [B, T_out, 9]
    output_sa = sa_full[:B, :SA_DIM]                                  # [B, 3]
    return output_ner, output_sa


# ---------------------------------------------------------------------------
# Parameter init (natural, per-direction) + packing for the fused kernel
# ---------------------------------------------------------------------------
def init_params(key, vocab, emb_dim, hidden_size, hidden_layers):
    def u(k, shape, s=0.1):
        return jax.random.uniform(k, shape, jnp.float32, -s, s)

    keys = iter(jax.random.split(key, 64))
    emb = u(next(keys), (vocab, emb_dim))
    emb = emb.at[0].set(0.0)  # padding_idx=0

    lstm = []
    for layer in range(hidden_layers):
        din = emb_dim if layer == 0 else 2 * hidden_size
        layer_p = {}
        for d in ("fwd", "bwd"):
            layer_p[d] = {
                # stored pre-transposed: [Din, 4H] / [H, 4H], gate order i,f,g,o
                "w_ih": u(next(keys), (din, 4 * hidden_size)),
                "w_hh": u(next(keys), (hidden_size, 4 * hidden_size)),
                "b": u(next(keys), (1, 4 * hidden_size)),  # b_ih + b_hh fused
            }
        lstm.append(layer_p)

    return {
        "embedding": emb,
        "hidden_size": hidden_size,
        "lstm": lstm,
        "w_ner": u(next(keys), (2 * hidden_size, NER_DIM)),
        "b_ner": u(next(keys), (NER_DIM,)),
        "w_sa": u(next(keys), (2 * hidden_size, SA_DIM)),
        "b_sa": u(next(keys), (SA_DIM,)),
        # TODO(synk): self.fc ([2H,1]) and loss_ponderation exist in __init__ but
        # are unused in the NERSA forward path, so they are not materialized here.
    }


def pack_params(params):
    """Pack natural per-direction params into the fused-kernel layout."""
    H = params["hidden_size"]
    packed = {"embedding": params["embedding"], "lstm": []}
    for lp in params["lstm"]:
        wih = jnp.concatenate([lp["fwd"]["w_ih"], lp["bwd"]["w_ih"]], axis=1)  # [Din, 8H]
        whh = jnp.zeros((2 * H, 8 * H), jnp.float32)                           # block-diag
        whh = whh.at[:H, :4 * H].set(lp["fwd"]["w_hh"])
        whh = whh.at[H:, 4 * H:].set(lp["bwd"]["w_hh"])
        b = jnp.concatenate([lp["fwd"]["b"], lp["bwd"]["b"]], axis=1)          # [1, 8H]
        packed["lstm"].append({"wih": wih, "whh": whh, "b": b})

    def pad_head(w, b):
        kdim, n = w.shape
        wp = jnp.zeros((kdim, HEAD_PAD), jnp.float32).at[:, :n].set(w)
        bp = jnp.zeros((1, HEAD_PAD), jnp.float32).at[0, :n].set(b)
        return wp, bp

    packed["w_ner"], packed["b_ner"] = pad_head(params["w_ner"], params["b_ner"])
    packed["w_sa"], packed["b_sa"] = pad_head(params["w_sa"], params["b_sa"])
    return packed


# ---------------------------------------------------------------------------
# Pure-JAX reference (for correctness check)
# ---------------------------------------------------------------------------
def _ref_lstm_layer_dir(x_tbd, lengths, w_ih, w_hh, b, H, reverse):
    T, B, _ = x_tbd.shape
    h = jnp.zeros((B, H), jnp.float32)
    c = jnp.zeros((B, H), jnp.float32)
    outs = [None] * T
    ts = range(T - 1, -1, -1) if reverse else range(T)
    for t in ts:
        gates = x_tbd[t] @ w_ih + h @ w_hh + b
        i = jax.nn.sigmoid(gates[:, :H])
        f = jax.nn.sigmoid(gates[:, H:2 * H])
        g = jnp.tanh(gates[:, 2 * H:3 * H])
        o = jax.nn.sigmoid(gates[:, 3 * H:])
        c_new = f * c + i * g
        h_new = o * jnp.tanh(c_new)
        mask = (lengths > t).reshape(B, 1)
        h = jnp.where(mask, h_new, h)
        c = jnp.where(mask, c_new, c)
        outs[t] = jnp.where(mask, h, 0.0)
    return jnp.stack(outs, 0), h


def reference_forward(params, inputs, lengths):
    emb_w = params["embedding"]
    H = params["hidden_size"]
    embedded = jnp.take(emb_w, inputs, axis=0)
    B, T, _ = embedded.shape
    x = jnp.transpose(embedded, (1, 0, 2))
    h_fwd_last = h_bwd_last = None
    for layer_p in params["lstm"]:
        of, hf = _ref_lstm_layer_dir(x, lengths, layer_p["fwd"]["w_ih"],
                                     layer_p["fwd"]["w_hh"], layer_p["fwd"]["b"][0],
                                     H, reverse=False)
        ob, hb = _ref_lstm_layer_dir(x, lengths, layer_p["bwd"]["w_ih"],
                                     layer_p["bwd"]["w_hh"], layer_p["bwd"]["b"][0],
                                     H, reverse=True)
        x = jnp.concatenate([of, ob], axis=-1)
        h_fwd_last, h_bwd_last = hf, hb
    T_out = int(np.asarray(lengths).max())
    outputs = jnp.transpose(x[:T_out], (1, 0, 2))
    hiddens_concat = jnp.concatenate([h_bwd_last, h_fwd_last], axis=-1)
    output_ner = outputs.reshape(B * T_out, 2 * H) @ params["w_ner"] + params["b_ner"]
    output_ner = output_ner.reshape(B, T_out, NER_DIM)
    output_sa = hiddens_concat @ params["w_sa"] + params["b_sa"]
    return output_ner, output_sa


# ---------------------------------------------------------------------------
if __name__ == "__main__":
    VOCAB, EMB_DIM, HIDDEN, LAYERS = 20, 32, 32, 2
    B, T = 2, 8

    key = jax.random.PRNGKey(0)
    k_par, k_tok = jax.random.split(key)
    params = init_params(k_par, VOCAB, EMB_DIM, HIDDEN, LAYERS)
    packed = pack_params(params)

    lengths_np = np.array([8, 6], dtype=np.int32)   # sorted (enforce_sorted=True)
    lengths = jnp.asarray(lengths_np)
    inputs = jax.random.randint(k_tok, (B, T), 1, VOCAB, dtype=jnp.int32)
    # zero-pad token ids past the true lengths (padding_idx = 0)
    t_idx = jnp.arange(T)[None, :]
    inputs = jnp.where(t_idx < lengths[:, None], inputs, 0)

    # static output length (== max(lengths), known on host) -> no device sync
    t_out = int(lengths_np.max())
    fwd = jax.jit(nersa_forward, static_argnames=("t_out",))
    out_ner, out_sa = fwd(packed, inputs, lengths, t_out=t_out)
    jax.block_until_ready((out_ner, out_sa))

    ref_ner, ref_sa = reference_forward(params, inputs, lengths)
    np.testing.assert_allclose(np.asarray(out_ner), np.asarray(ref_ner),
                               rtol=1e-3, atol=1e-3)
    np.testing.assert_allclose(np.asarray(out_sa), np.asarray(ref_sa),
                               rtol=1e-3, atol=1e-3)
    assert out_ner.shape == (B, t_out, NER_DIM)
    assert out_sa.shape == (B, SA_DIM)
    print("KERNEL_OK")
</pallas_src>

<mosaic_0001>
module attributes {stable_mosaic.version = 11 : i64} {
  func.func @kernel(%arg0: memref<64x32xf32, #tpu.memory_space<vmem>>, %arg1: memref<8x1xi32, #tpu.memory_space<vmem>>, %arg2: memref<32x256xf32, #tpu.memory_space<vmem>>, %arg3: memref<64x256xf32, #tpu.memory_space<vmem>>, %arg4: memref<1x256xf32, #tpu.memory_space<vmem>>, %arg5: memref<64x256xf32, #tpu.memory_space<vmem>>, %arg6: memref<64x256xf32, #tpu.memory_space<vmem>>, %arg7: memref<1x256xf32, #tpu.memory_space<vmem>>, %arg8: memref<64x128xf32, #tpu.memory_space<vmem>>, %arg9: memref<1x128xf32, #tpu.memory_space<vmem>>, %arg10: memref<64x128xf32, #tpu.memory_space<vmem>>, %arg11: memref<1x128xf32, #tpu.memory_space<vmem>>, %arg12: memref<64x128xf32, #tpu.memory_space<vmem>>, %arg13: memref<8x128xf32, #tpu.memory_space<vmem>>, %arg14: memref<64x256xf32, #tpu.memory_space<vmem>>, %arg15: memref<64x32xf32, #tpu.memory_space<vmem>>, %arg16: memref<64x32xf32, #tpu.memory_space<vmem>>, %arg17: memref<8x32xf32, #tpu.memory_space<vmem>>, %arg18: memref<8x32xf32, #tpu.memory_space<vmem>>, %arg19: memref<8x32xf32, #tpu.memory_space<vmem>>, %arg20: memref<8x32xf32, #tpu.memory_space<vmem>>) attributes {dimension_semantics = [], scalar_prefetch = 0 : i64, scratch_operands = 7 : i64, tpu.core_type = #tpu.core_type<tc>} {
    %c0 = arith.constant 0 : index
    %c0_0 = arith.constant 0 : index
    %0 = vector.load %arg1[%c0, %c0_0] : memref<8x1xi32, #tpu.memory_space<vmem>>, vector<8x1xi32>
    %c0_1 = arith.constant 0 : index
    %c0_2 = arith.constant 0 : index
    %1 = vector.load %arg0[%c0_1, %c0_2] : memref<64x32xf32, #tpu.memory_space<vmem>>, vector<64x32xf32>
    %c0_3 = arith.constant 0 : index
    %c0_4 = arith.constant 0 : index
    %2 = vector.load %arg2[%c0_3, %c0_4] : memref<32x256xf32, #tpu.memory_space<vmem>>, vector<32x256xf32>
    %cst = arith.constant dense<0.000000e+00> : vector<64x256xf32>
    %3 = tpu.matmul %1, %2, %cst {dimension_numbers = #tpu.dot_dimension_numbers<[1], [0], [0], [1], [0, 0, 1, 1], [], []>} : vector<64x32xf32>, vector<32x256xf32>, vector<64x256xf32> -> vector<64x256xf32>
    %c0_5 = arith.constant 0 : index
    %c0_6 = arith.constant 0 : index
    %4 = vector.load %arg4[%c0_5, %c0_6] : memref<1x256xf32, #tpu.memory_space<vmem>>, vector<1x256xf32>
    %5 = vector.broadcast %4 : vector<1x256xf32> to vector<64x256xf32>
    %6 = arith.addf %3, %5 : vector<64x256xf32>
    %c0_7 = arith.constant 0 : index
    %c0_8 = arith.constant 0 : index
    %7 = vector.load %arg14[%c0_7, %c0_8] : memref<64x256xf32, #tpu.memory_space<vmem>>, vector<64x256xf32>
    tpu.vector_store %arg14[%c0_7, %c0_8], %6 {strides = array<i32>} : memref<64x256xf32, #tpu.memory_space<vmem>>, vector<64x256xf32>,
    %c0_9 = arith.constant 0 : index
    %c0_10 = arith.constant 0 : index
    %8 = vector.load %arg3[%c0_9, %c0_10] : memref<64x256xf32, #tpu.memory_space<vmem>>, vector<64x256xf32>
    %cst_11 = arith.constant 0.000000e+00 : f32
    %9 = vector.broadcast %cst_11 : f32 to vector<8x32xf32>
    %c0_12 = arith.constant 0 : index
    %c0_13 = arith.constant 0 : index
    %10 = vector.load %arg17[%c0_12, %c0_13] : memref<8x32xf32, #tpu.memory_space<vmem>>, vector<8x32xf32>
    tpu.vector_store %arg17[%c0_12, %c0_13], %9 {strides = array<i32>} : memref<8x32xf32, #tpu.memory_space<vmem>>, vector<8x32xf32>,
    %cst_14 = arith.constant 0.000000e+00 : f32
    %11 = vector.broadcast %cst_14 : f32 to vector<8x32xf32>
    %c0_15 = arith.constant 0 : index
    %c0_16 = arith.constant 0 : index
    %12 = vector.load %arg18[%c0_15, %c0_16] : memref<8x32xf32, #tpu.memory_space<vmem>>, vector<8x32xf32>
    tpu.vector_store %arg18[%c0_15, %c0_16], %11 {strides = array<i32>} : memref<8x32xf32, #tpu.memory_space<vmem>>, vector<8x32xf32>,
    %cst_17 = arith.constant 0.000000e+00 : f32
    %13 = vector.broadcast %cst_17 : f32 to vector<8x32xf32>
    %c0_18 = arith.constant 0 : index
    %c0_19 = arith.constant 0 : index
    %14 = vector.load %arg19[%c0_18, %c0_19] : memref<8x32xf32, #tpu.memory_space<vmem>>, vector<8x32xf32>
    tpu.vector_store %arg19[%c0_18, %c0_19], %13 {strides = array<i32>} : memref<8x32xf32, #tpu.memory_space<vmem>>, vector<8x32xf32>,
    %cst_20 = arith.constant 0.000000e+00 : f32
    %15 = vector.broadcast %cst_20 : f32 to vector<8x32xf32>
    %c0_21 = arith.constant 0 : index
    %c0_22 = arith.constant 0 : index
    %16 = vector.load %arg20[%c0_21, %c0_22] : memref<8x32xf32, #tpu.memory_space<vmem>>, vector<8x32xf32>
    tpu.vector_store %arg20[%c0_21, %c0_22], %15 {strides = array<i32>} : memref<8x32xf32, #tpu.memory_space<vmem>>, vector<8x32xf32>,
    %c0_23 = arith.constant 0 : index
    %c0_24 = arith.constant 0 : index
    %17 = vector.load %arg14[%c0_23, %c0_24] : memref<64x256xf32, #tpu.memory_space<vmem>>, vector<8x128xf32>
    %c56 = arith.constant 56 : index
    %c128 = arith.constant 128 : index
    %18 = vector.load %arg14[%c56, %c128] : memref<64x256xf32, #tpu.memory_space<vmem>>, vector<8x128xf32>
    %c0_25 = arith.constant 0 : index
    %c0_26 = arith.constant 0 : index
    %19 = vector.load %arg17[%c0_25, %c0_26] : memref<8x32xf32, #tpu.memory_space<vmem>>, vector<8x32xf32>
    %c0_27 = arith.constant 0 : index
    %c0_28 = arith.constant 0 : index
    %20 = vector.load %arg19[%c0_27, %c0_28] : memref<8x32xf32, #tpu.memory_space<vmem>>, vector<8x32xf32>
    %21 = tpu.concatenate %19, %20 in 1 : vector<8x32xf32>, vector<8x32xf32> -> vector<8x64xf32>
    %cst_29 = arith.constant dense<0.000000e+00> : vector<8x256xf32>
    %22 = tpu.matmul %21, %8, %cst_29 {dimension_numbers = #tpu.dot_dimension_numbers<[1], [0], [0], [1], [0, 0, 1, 1], [], []>} : vector<8x64xf32>, vector<64x256xf32>, vector<8x256xf32> -> vector<8x256xf32>
    %23 = tpu.concatenate %17, %18 in 1 : vector<8x128xf32>, vector<8x128xf32> -> vector<8x256xf32>
    %24 = arith.addf %23, %22 : vector<8x256xf32>
    %25 = arith.negf %24 : vector<8x256xf32>
    %26 = math.exp %25 : vector<8x256xf32>
    %cst_30 = arith.constant 1.000000e+00 : f32
    %27 = vector.broadcast %cst_30 : f32 to vector<8x256xf32>
    %28 = arith.addf %27, %26 : vector<8x256xf32>
    %29 = arith.divf %27, %28 : vector<8x256xf32>
    %30 = vector.extract_strided_slice %29 {offsets = [0, 0], sizes = [8, 32], strides = [1, 1]} : vector<8x256xf32> to vector<8x32xf32>
    %31 = vector.extract_strided_slice %29 {offsets = [0, 32], sizes = [8, 32], strides = [1, 1]} : vector<8x256xf32> to vector<8x32xf32>
    %32 = vector.extract_strided_slice %24 {offsets = [0, 64], sizes = [8, 32], strides = [1, 1]} : vector<8x256xf32> to vector<8x32xf32>
    %33 = math.tanh %32 : vector<8x32xf32>
    %34 = vector.extract_strided_slice %29 {offsets = [0, 96], sizes = [8, 32], strides = [1, 1]} : vector<8x256xf32> to vector<8x32xf32>
    %c0_31 = arith.constant 0 : index
    %c0_32 = arith.constant 0 : index
    %35 = vector.load %arg18[%c0_31, %c0_32] : memref<8x32xf32, #tpu.memory_space<vmem>>, vector<8x32xf32>
    %36 = arith.mulf %31, %35 : vector<8x32xf32>
    %37 = arith.mulf %30, %33 : vector<8x32xf32>
    %38 = arith.addf %36, %37 : vector<8x32xf32>
    %39 = math.tanh %38 : vector<8x32xf32>
    %40 = arith.mulf %34, %39 : vector<8x32xf32>
    %c0_i32 = arith.constant 0 : i32
    %41 = vector.broadcast %c0_i32 : i32 to vector<8x1xi32>
    %42 = arith.cmpi sgt, %0, %41 : vector<8x1xi32>
    %43 = vector.shape_cast %42 : vector<8x1xi1> to vector<8x1xi1>
    %44 = vector.broadcast %43 : vector<8x1xi1> to vector<8x32xi1>
    %45 = arith.select %44, %40, %19 : vector<8x32xi1>, vector<8x32xf32>
    %c0_33 = arith.constant 0 : index
    %c0_34 = arith.constant 0 : index
    %46 = vector.load %arg18[%c0_33, %c0_34] : memref<8x32xf32, #tpu.memory_space<vmem>>, vector<8x32xf32>
    %47 = vector.shape_cast %42 : vector<8x1xi1> to vector<8x1xi1>
    %48 = vector.broadcast %47 : vector<8x1xi1> to vector<8x32xi1>
    %49 = arith.select %48, %38, %46 : vector<8x32xi1>, vector<8x32xf32>
    %c0_35 = arith.constant 0 : index
    %c0_36 = arith.constant 0 : index
    %50 = vector.load %arg17[%c0_35, %c0_36] : memref<8x32xf32, #tpu.memory_space<vmem>>, vector<8x32xf32>
    tpu.vector_store %arg17[%c0_35, %c0_36], %45 {strides = array<i32>} : memref<8x32xf32, #tpu.memory_space<vmem>>, vector<8x32xf32>,
    %c0_37 = arith.constant 0 : index
    %c0_38 = arith.constant 0 : index
    %51 = vector.load %arg18[%c0_37, %c0_38] : memref<8x32xf32, #tpu.memory_space<vmem>>, vector<8x32xf32>
    tpu.vector_store %arg18[%c0_37, %c0_38], %49 {strides = array<i32>} : memref<8x32xf32, #tpu.memory_space<vmem>>, vector<8x32xf32>,
    %cst_39 = arith.constant 0.000000e+00 : f32
    %52 = vector.shape_cast %42 : vector<8x1xi1> to vector<8x1xi1>
    %53 = vector.broadcast %52 : vector<8x1xi1> to vector<8x32xi1>
    %54 = vector.broadcast %cst_39 : f32 to vector<8x32xf32>
    %55 = arith.select %53, %45, %54 : vector<8x32xi1>, vector<8x32xf32>
    %c0_40 = arith.constant 0 : index
    %c0_41 = arith.constant 0 : index
    %56 = vector.load %arg15[%c0_40, %c0_41] : memref<64x32xf32, #tpu.memory_space<vmem>>, vector<8x32xf32>
    tpu.vector_store %arg15[%c0_40, %c0_41], %55 {strides = array<i32>} : memref<64x32xf32, #tpu.memory_space<vmem>>, vector<8x32xf32>,
    %57 = vector.extract_strided_slice %29 {offsets = [0, 128], sizes = [8, 32], strides = [1, 1]} : vector<8x256xf32> to vector<8x32xf32>
    %58 = vector.extract_strided_slice %29 {offsets = [0, 160], sizes = [8, 32], strides = [1, 1]} : vector<8x256xf32> to vector<8x32xf32>
    %59 = vector.extract_strided_slice %24 {offsets = [0, 192], sizes = [8, 32], strides = [1, 1]} : vector<8x256xf32> to vector<8x32xf32>
    %60 = math.tanh %59 : vector<8x32xf32>
    %61 = vector.extract_strided_slice %29 {offsets = [0, 224], sizes = [8, 32], strides = [1, 1]} : vector<8x256xf32> to vector<8x32xf32>
    %c0_42 = arith.constant 0 : index
    %c0_43 = arith.constant 0 : index
    %62 = vector.load %arg20[%c0_42, %c0_43] : memref<8x32xf32, #tpu.memory_space<vmem>>, vector<8x32xf32>
    %63 = arith.mulf %58, %62 : vector<8x32xf32>
    %64 = arith.mulf %57, %60 : vector<8x32xf32>
    %65 = arith.addf %63, %64 : vector<8x32xf32>
    %66 = math.tanh %65 : vector<8x32xf32>
    %67 = arith.mulf %61, %66 : vector<8x32xf32>
    %c7_i32 = arith.constant 7 : i32
    %68 = vector.broadcast %c7_i32 : i32 to vector<8x1xi32>
    %69 = arith.cmpi sgt, %0, %68 : vector<8x1xi32>
    %70 = vector.shape_cast %69 : vector<8x1xi1> to vector<8x1xi1>
    %71 = vector.broadcast %70 : vector<8x1xi1> to vector<8x32xi1>
    %72 = arith.select %71, %67, %20 : vector<8x32xi1>, vector<8x32xf32>
    %c0_44 = arith.constant 0 : index
    %c0_45 = arith.constant 0 : index
    %73 = vector.load %arg20[%c0_44, %c0_45] : memref<8x32xf32, #tpu.memory_space<vmem>>, vector<8x32xf32>
    %74 = vector.shape_cast %69 : vector<8x1xi1> to vector<8x1xi1>
    %75 = vector.broadcast %74 : vector<8x1xi1> to vector<8x32xi1>
    %76 = arith.select %75, %65, %73 : vector<8x32xi1>, vector<8x32xf32>
    %c0_46 = arith.constant 0 : index
    %c0_47 = arith.constant 0 : index
    %77 = vector.load %arg19[%c0_46, %c0_47] : memref<8x32xf32, #tpu.memory_space<vmem>>, vector<8x32xf32>
    tpu.vector_store %arg19[%c0_46, %c0_47], %72 {strides = array<i32>} : memref<8x32xf32, #tpu.memory_space<vmem>>, vector<8x32xf32>,
    %c0_48 = arith.constant 0 : index
    %c0_49 = arith.constant 0 : index
    %78 = vector.load %arg20[%c0_48, %c0_49] : memref<8x32xf32, #tpu.memory_space<vmem>>, vector<8x32xf32>
    tpu.vector_store %arg20[%c0_48, %c0_49], %76 {strides = array<i32>} : memref<8x32xf32, #tpu.memory_space<vmem>>, vector<8x32xf32>,
    %cst_50 = arith.constant 0.000000e+00 : f32
    %79 = vector.shape_cast %69 : vector<8x1xi1> to vector<8x1xi1>
    %80 = vector.broadcast %79 : vector<8x1xi1> to vector<8x32xi1>
    %81 = vector.broadcast %cst_50 : f32 to vector<8x32xf32>
    %82 = arith.select %80, %72, %81 : vector<8x32xi1>, vector<8x32xf32>
    %c56_51 = arith.constant 56 : index
    %c0_52 = arith.constant 0 : index
    %83 = vector.load %arg16[%c56_51, %c0_52] : memref<64x32xf32, #tpu.memory_space<vmem>>, vector<8x32xf32>
    tpu.vector_store %arg16[%c56_51, %c0_52], %82 {strides = array<i32>} : memref<64x32xf32, #tpu.memory_space<vmem>>, vector<8x32xf32>,
    %c8 = arith.constant 8 : index
    %c0_53 = arith.constant 0 : index
    %84 = vector.load %arg14[%c8, %c0_53] : memref<64x256xf32, #tpu.memory_space<vmem>>, vector<8x128xf32>
    %c48 = arith.constant 48 : index
    %c128_54 = arith.constant 128 : index
    %85 = vector.load %arg14[%c48, %c128_54] : memref<64x256xf32, #tpu.memory_space<vmem>>, vector<8x128xf32>
    %c0_55 = arith.constant 0 : index
    %c0_56 = arith.constant 0 : index
    %86 = vector.load %arg17[%c0_55, %c0_56] : memref<8x32xf32, #tpu.memory_space<vmem>>, vector<8x32xf32>
    %c0_57 = arith.constant 0 : index
    %c0_58 = arith.constant 0 : index
    %87 = vector.load %arg19[%c0_57, %c0_58] : memref<8x32xf32, #tpu.memory_space<vmem>>, vector<8x32xf32>
    %88 = tpu.concatenate %86, %87 in 1 : vector<8x32xf32>, vector<8x32xf32> -> vector<8x64xf32>
    %cst_59 = arith.constant dense<0.000000e+00> : vector<8x256xf32>
    %89 = tpu.matmul %88, %8, %cst_59 {dimension_numbers = #tpu.dot_dimension_numbers<[1], [0], [0], [1], [0, 0, 1, 1], [], []>} : vector<8x64xf32>, vector<64x256xf32>, vector<8x256xf32> -> vector<8x256xf32>
    %90 = tpu.concatenate %84, %85 in 1 : vector<8x128xf32>, vector<8x128xf32> -> vector<8x256xf32>
    %91 = arith.addf %90, %89 : vector<8x256xf32>
    %92 = arith.negf %91 : vector<8x256xf32>
    %93 = math.exp %92 : vector<8x256xf32>
    %cst_60 = arith.constant 1.000000e+00 : f32
    %94 = vector.broadcast %cst_60 : f32 to vector<8x256xf32>
    %95 = arith.addf %94, %93 : vector<8x256xf32>
    %96 = arith.divf %94, %95 : vector<8x256xf32>
    %97 = vector.extract_strided_slice %96 {offsets = [0, 0], sizes = [8, 32], strides = [1, 1]} : vector<8x256xf32> to vector<8x32xf32>
    %98 = vector.extract_strided_slice %96 {offsets = [0, 32], sizes = [8, 32], strides = [1, 1]} : vector<8x256xf32> to vector<8x32xf32>
    %99 = vector.extract_strided_slice %91 {offsets = [0, 64], sizes = [8, 32], strides = [1, 1]} : vector<8x256xf32> to vector<8x32xf32>
    %100 = math.tanh %99 : vector<8x32xf32>
    %101 = vector.extract_strided_slice %96 {offsets = [0, 96], sizes = [8, 32], strides = [1, 1]} : vector<8x256xf32> to vector<8x32xf32>
    %c0_61 = arith.constant 0 : index
    %c0_62 = arith.constant 0 : index
    %102 = vector.load %arg18[%c0_61, %c0_62] : memref<8x32xf32, #tpu.memory_space<vmem>>, vector<8x32xf32>
    %103 = arith.mulf %98, %102 : vector<8x32xf32>
    %104 = arith.mulf %97, %100 : vector<8x32xf32>
    %105 = arith.addf %103, %104 : vector<8x32xf32>
    %106 = math.tanh %105 : vector<8x32xf32>
    %107 = arith.mulf %101, %106 : vector<8x32xf32>
    %c1_i32 = arith.constant 1 : i32
    %108 = vector.broadcast %c1_i32 : i32 to vector<8x1xi32>
    %109 = arith.cmpi sgt, %0, %108 : vector<8x1xi32>
    %110 = vector.shape_cast %109 : vector<8x1xi1> to vector<8x1xi1>
    %111 = vector.broadcast %110 : vector<8x1xi1> to vector<8x32xi1>
    %112 = arith.select %111, %107, %86 : vector<8x32xi1>, vector<8x32xf32>
    %c0_63 = arith.constant 0 : index
    %c0_64 = arith.constant 0 : index
    %113 = vector.load %arg18[%c0_63, %c0_64] : memref<8x32xf32, #tpu.memory_space<vmem>>, vector<8x32xf32>
    %114 = vector.shape_cast %109 : vector<8x1xi1> to vector<8x1xi1>
    %115 = vector.broadcast %114 : vector<8x1xi1> to vector<8x32xi1>
    %116 = arith.select %115, %105, %113 : vector<8x32xi1>, vector<8x32xf32>
    %c0_65 = arith.constant 0 : index
    %c0_66 = arith.constant 0 : index
    %117 = vector.load %arg17[%c0_65, %c0_66] : memref<8x32xf32, #tpu.memory_space<vmem>>, vector<8x32xf32>
    tpu.vector_store %arg17[%c0_65, %c0_66], %112 {strides = array<i32>} : memref<8x32xf32, #tpu.memory_space<vmem>>, vector<8x32xf32>,
    %c0_67 = arith.constant 0 : index
    %c0_68 = arith.constant 0 : index
    %118 = vector.load %arg18[%c0_67, %c0_68] : memref<8x32xf32, #tpu.memory_space<vmem>>, vector<8x32xf32>
    tpu.vector_store %arg18[%c0_67, %c0_68], %116 {strides = array<i32>} : memref<8x32xf32, #tpu.memory_space<vmem>>, vector<8x32xf32>,
    %cst_69 = arith.constant 0.000000e+00 : f32
    %119 = vector.shape_cast %109 : vector<8x1xi1> to vector<8x1xi1>
    %120 = vector.broadcast %119 : vector<8x1xi1> to vector<8x32xi1>
    %121 = vector.broadcast %cst_69 : f32 to vector<8x32xf32>
    %122 = arith.select %120, %112, %121 : vector<8x32xi1>, vector<8x32xf32>
    %c8_70 = arith.constant 8 : index
    %c0_71 = arith.constant 0 : index
    %123 = vector.load %arg15[%c8_70, %c0_71] : memref<64x32xf32, #tpu.memory_space<vmem>>, vector<8x32xf32>
    tpu.vector_store %arg15[%c8_70, %c0_71], %122 {strides = array<i32>} : memref<64x32xf32, #tpu.memory_space<vmem>>, vector<8x32xf32>,
    %124 = vector.extract_strided_slice %96 {offsets = [0, 128], sizes = [8, 32], strides = [1, 1]} : vector<8x256xf32> to vector<8x32xf32>
    %125 = vector.extract_strided_slice %96 {offsets = [0, 160], sizes = [8, 32], strides = [1, 1]} : vector<8x256xf32> to vector<8x32xf32>
    %126 = vector.extract_strided_slice %91 {offsets = [0, 192], sizes = [8, 32], strides = [1, 1]} : vector<8x256xf32> to vector<8x32xf32>
    %127 = math.tanh %126 : vector<8x32xf32>
    %128 = vector.extract_strided_slice %96 {offsets = [0, 224], sizes = [8, 32], strides = [1, 1]} : vector<8x256xf32> to vector<8x32xf32>
    %c0_72 = arith.constant 0 : index
    %c0_73 = arith.constant 0 : index
    %129 = vector.load %arg20[%c0_72, %c0_73] : memref<8x32xf32, #tpu.memory_space<vmem>>, vector<8x32xf32>
    %130 = arith.mulf %125, %129 : vector<8x32xf32>
    %131 = arith.mulf %124, %127 : vector<8x32xf32>
    %132 = arith.addf %130, %131 : vector<8x32xf32>
    %133 = math.tanh %132 : vector<8x32xf32>
    %134 = arith.mulf %128, %133 : vector<8x32xf32>
    %c6_i32 = arith.constant 6 : i32
    %135 = vector.broadcast %c6_i32 : i32 to vector<8x1xi32>
    %136 = arith.cmpi sgt, %0, %135 : vector<8x1xi32>
    %137 = vector.shape_cast %136 : vector<8x1xi1> to vector<8x1xi1>
    %138 = vector.broadcast %137 : vector<8x1xi1> to vector<8x32xi1>
    %139 = arith.select %138, %134, %87 : vector<8x32xi1>, vector<8x32xf32>
    %c0_74 = arith.constant 0 : index
    %c0_75 = arith.constant 0 : index
    %140 = vector.load %arg20[%c0_74, %c0_75] : memref<8x32xf32, #tpu.memory_space<vmem>>, vector<8x32xf32>
    %141 = vector.shape_cast %136 : vector<8x1xi1> to vector<8x1xi1>
    %142 = vector.broadcast %141 : vector<8x1xi1> to vector<8x32xi1>
    %143 = arith.select %142, %132, %140 : vector<8x32xi1>, vector<8x32xf32>
    %c0_76 = arith.constant 0 : index
    %c0_77 = arith.constant 0 : index
    %144 = vector.load %arg19[%c0_76, %c0_77] : memref<8x32xf32, #tpu.memory_space<vmem>>, vector<8x32xf32>
    tpu.vector_store %arg19[%c0_76, %c0_77], %139 {strides = array<i32>} : memref<8x32xf32, #tpu.memory_space<vmem>>, vector<8x32xf32>,
    %c0_78 = arith.constant 0 : index
    %c0_79 = arith.constant 0 : index
    %145 = vector.load %arg20[%c0_78, %c0_79] : memref<8x32xf32, #tpu.memory_space<vmem>>, vector<8x32xf32>
    tpu.vector_store %arg20[%c0_78, %c0_79], %143 {strides = array<i32>} : memref<8x32xf32, #tpu.memory_space<vmem>>, vector<8x32xf32>,
    %cst_80 = arith.constant 0.000000e+00 : f32
    %146 = vector.shape_cast %136 : vector<8x1xi1> to vector<8x1xi1>
    %147 = vector.broadcast %146 : vector<8x1xi1> to vector<8x32xi1>
    %148 = vector.broadcast %cst_80 : f32 to vector<8x32xf32>
    %149 = arith.select %147, %139, %148 : vector<8x32xi1>, vector<8x32xf32>
    %c48_81 = arith.constant 48 : index
    %c0_82 = arith.constant 0 : index
    %150 = vector.load %arg16[%c48_81, %c0_82] : memref<64x32xf32, #tpu.memory_space<vmem>>, vector<8x32xf32>
    tpu.vector_store %arg16[%c48_81, %c0_82], %149 {strides = array<i32>} : memref<64x32xf32, #tpu.memory_space<vmem>>, vector<8x32xf32>,
    %c16 = arith.constant 16 : index
    %c0_83 = arith.constant 0 : index
    %151 = vector.load %arg14[%c16, %c0_83] : memref<64x256xf32, #tpu.memory_space<vmem>>, vector<8x128xf32>
    %c40 = arith.constant 40 : index
    %c128_84 = arith.constant 128 : index
    %152 = vector.load %arg14[%c40, %c128_84] : memref<64x256xf32, #tpu.memory_space<vmem>>, vector<8x128xf32>
    %c0_85 = arith.constant 0 : index
    %c0_86 = arith.constant 0 : index
    %153 = vector.load %arg17[%c0_85, %c0_86] : memref<8x32xf32, #tpu.memory_space<vmem>>, vector<8x32xf32>
    %c0_87 = arith.constant 0 : index
    %c0_88 = arith.constant 0 : index
    %154 = vector.load %arg19[%c0_87, %c0_88] : memref<8x32xf32, #tpu.memory_space<vmem>>, vector<8x32xf32>
    %155 = tpu.concatenate %153, %154 in 1 : vector<8x32xf32>, vector<8x32xf32> -> vector<8x64xf32>
    %cst_89 = arith.constant dense<0.000000e+00> : vector<8x256xf32>
    %156 = tpu.matmul %155, %8, %cst_89 {dimension_numbers = #tpu.dot_dimension_numbers<[1], [0], [0], [1], [0, 0, 1, 1], [], []>} : vector<8x64xf32>, vector<64x256xf32>, vector<8x256xf32> -> vector<8x256xf32>
    %157 = tpu.concatenate %151, %152 in 1 : vector<8x128xf32>, vector<8x128xf32> -> vector<8x256xf32>
    %158 = arith.addf %157, %156 : vector<8x256xf32>
    %159 = arith.negf %158 : vector<8x256xf32>
    %160 = math.exp %159 : vector<8x256xf32>
    %cst_90 = arith.constant 1.000000e+00 : f32
    %161 = vector.broadcast %cst_90 : f32 to vector<8x256xf32>
    %162 = arith.addf %161, %160 : vector<8x256xf32>
    %163 = arith.divf %161, %162 : vector<8x256xf32>
    %164 = vector.extract_strided_slice %163 {offsets = [0, 0], sizes = [8, 32], strides = [1, 1]} : vector<8x256xf32> to vector<8x32xf32>
    %165 = vector.extract_strided_slice %163 {offsets = [0, 32], sizes = [8, 32], strides = [1, 1]} : vector<8x256xf32> to vector<8x32xf32>
    %166 = vector.extract_strided_slice %158 {offsets = [0, 64], sizes = [8, 32], strides = [1, 1]} : vector<8x256xf32> to vector<8x32xf32>
    %167 = math.tanh %166 : vector<8x32xf32>
    %168 = vector.extract_strided_slice %163 {offsets = [0, 96], sizes = [8, 32], strides = [1, 1]} : vector<8x256xf32> to vector<8x32xf32>
    %c0_91 = arith.constant 0 : index
    %c0_92 = arith.constant 0 : index
    %169 = vector.load %arg18[%c0_91, %c0_92] : memref<8x32xf32, #tpu.memory_space<vmem>>, vector<8x32xf32>
    %170 = arith.mulf %165, %169 : vector<8x32xf32>
    %171 = arith.mulf %164, %167 : vector<8x32xf32>
    %172 = arith.addf %170, %171 : vector<8x32xf32>
    %173 = math.tanh %172 : vector<8x32xf32>
    %174 = arith.mulf %168, %173 : vector<8x32xf32>
    %c2_i32 = arith.constant 2 : i32
    %175 = vector.broadcast %c2_i32 : i32 to vector<8x1xi32>
    %176 = arith.cmpi sgt, %0, %175 : vector<8x1xi32>
    %177 = vector.shape_cast %176 : vector<8x1xi1> to vector<8x1xi1>
    %178 = vector.broadcast %177 : vector<8x1xi1> to vector<8x32xi1>
    %179 = arith.select %178, %174, %153 : vector<8x32xi1>, vector<8x32xf32>
    %c0_93 = arith.constant 0 : index
    %c0_94 = arith.constant 0 : index
    %180 = vector.load %arg18[%c0_93, %c0_94] : memref<8x32xf32, #tpu.memory_space<vmem>>, vector<8x32xf32>
    %181 = vector.shape_cast %176 : vector<8x1xi1> to vector<8x1xi1>
    %182 = vector.broadcast %181 : vector<8x1xi1> to vector<8x32xi1>
    %183 = arith.select %182, %172, %180 : vector<8x32xi1>, vector<8x32xf32>
    %c0_95 = arith.constant 0 : index
    %c0_96 = arith.constant 0 : index
    %184 = vector.load %arg17[%c0_95, %c0_96] : memref<8x32xf32, #tpu.memory_space<vmem>>, vector<8x32xf32>
    tpu.vector_store %arg17[%c0_95, %c0_96], %179 {strides = array<i32>} : memref<8x32xf32, #tpu.memory_space<vmem>>, vector<8x32xf32>,
    %c0_97 = arith.constant 0 : index
    %c0_98 = arith.constant 0 : index
    %185 = vector.load %arg18[%c0_97, %c0_98] : memref<8x32xf32, #tpu.memory_space<vmem>>, vector<8x32xf32>
    tpu.vector_store %arg18[%c0_97, %c0_98], %183 {strides = array<i32>} : memref<8x32xf32, #tpu.memory_space<vmem>>, vector<8x32xf32>,
    %cst_99 = arith.constant 0.000000e+00 : f32
    %186 = vector.shape_cast %176 : vector<8x1xi1> to vector<8x1xi1>
    %187 = vector.broadcast %186 : vector<8x1xi1> to vector<8x32xi1>
    %188 = vector.broadcast %cst_99 : f32 to vector<8x32xf32>
    %189 = arith.select %187, %179, %188 : vector<8x32xi1>, vector<8x32xf32>
    %c16_100 = arith.constant 16 : index
    %c0_101 = arith.constant 0 : index
    %190 = vector.load %arg15[%c16_100, %c0_101] : memref<64x32xf32, #tpu.memory_space<vmem>>, vector<8x32xf32>
    tpu.vector_store %arg15[%c16_100, %c0_101], %189 {strides = array<i32>} : memref<64x32xf32, #tpu.memory_space<vmem>>, vector<8x32xf32>,
    %191 = vector.extract_strided_slice %163 {offsets = [0, 128], sizes = [8, 32], strides = [1, 1]} : vector<8x256xf32> to vector<8x32xf32>
    %192 = vector.extract_strided_slice %163 {offsets = [0, 160], sizes = [8, 32], strides = [1, 1]} : vector<8x256xf32> to vector<8x32xf32>
    %193 = vector.extract_strided_slice %158 {offsets = [0, 192], sizes = [8, 32], strides = [1, 1]} : vector<8x256xf32> to vector<8x32xf32>
    %194 = math.tanh %193 : vector<8x32xf32>
    %195 = vector.extract_strided_slice %163 {offsets = [0, 224], sizes = [8, 32], strides = [1, 1]} : vector<8x256xf32> to vector<8x32xf32>
    %c0_102 = arith.constant 0 : index
    %c0_103 = arith.constant 0 : index
    %196 = vector.load %arg20[%c0_102, %c0_103] : memref<8x32xf32, #tpu.memory_space<vmem>>, vector<8x32xf32>
    %197 = arith.mulf %192, %196 : vector<8x32xf32>
    %198 = arith.mulf %191, %194 : vector<8x32xf32>
    %199 = arith.addf %197, %198 : vector<8x32xf32>
    %200 = math.tanh %199 : vector<8x32xf32>
    %201 = arith.mulf %195, %200 : vector<8x32xf32>
    %c5_i32 = arith.constant 5 : i32
    %202 = vector.broadcast %c5_i32 : i32 to vector<8x1xi32>
    %203 = arith.cmpi sgt, %0, %202 : vector<8x1xi32>
    %204 = vector.shape_cast %203 : vector<8x1xi1> to vector<8x1xi1>
    %205 = vector.broadcast %204 : vector<8x1xi1> to vector<8x32xi1>
    %206 = arith.select %205, %201, %154 : vector<8x32xi1>, vector<8x32xf32>
    %c0_104 = arith.constant 0 : index
    %c0_105 = arith.constant 0 : index
    %207 = vector.load %arg20[%c0_104, %c0_105] : memref<8x32xf32, #tpu.memory_space<vmem>>, vector<8x32xf32>
    %208 = vector.shape_cast %203 : vector<8x1xi1> to vector<8x1xi1>
    %209 = vector.broadcast %208 : vector<8x1xi1> to vector<8x32xi1>
    %210 = arith.select %209, %199, %207 : vector<8x32xi1>, vector<8x32xf32>
    %c0_106 = arith.constant 0 : index
    %c0_107 = arith.constant 0 : index
    %211 = vector.load %arg19[%c0_106, %c0_107] : memref<8x32xf32, #tpu.memory_space<vmem>>, vector<8x32xf32>
    tpu.vector_store %arg19[%c0_106, %c0_107], %206 {strides = array<i32>} : memref<8x32xf32, #tpu.memory_space<vmem>>, vector<8x32xf32>,
    %c0_108 = arith.constant 0 : index
    %c0_109 = arith.constant 0 : index
    %212 = vector.load %arg20[%c0_108, %c0_109] : memref<8x32xf32, #tpu.memory_space<vmem>>, vector<8x32xf32>
    tpu.vector_store %arg20[%c0_108, %c0_109], %210 {strides = array<i32>} : memref<8x32xf32, #tpu.memory_space<vmem>>, vector<8x32xf32>,
    %cst_110 = arith.constant 0.000000e+00 : f32
    %213 = vector.shape_cast %203 : vector<8x1xi1> to vector<8x1xi1>
    %214 = vector.broadcast %213 : vector<8x1xi1> to vector<8x32xi1>
    %215 = vector.broadcast %cst_110 : f32 to vector<8x32xf32>
    %216 = arith.select %214, %206, %215 : vector<8x32xi1>, vector<8x32xf32>
    %c40_111 = arith.constant 40 : index
    %c0_112 = arith.constant 0 : index
    %217 = vector.load %arg16[%c40_111, %c0_112] : memref<64x32xf32, #tpu.memory_space<vmem>>, vector<8x32xf32>
    tpu.vector_store %arg16[%c40_111, %c0_112], %216 {strides = array<i32>} : memref<64x32xf32, #tpu.memory_space<vmem>>, vector<8x32xf32>,
    %c24 = arith.constant 24 : index
    %c0_113 = arith.constant 0 : index
    %218 = vector.load %arg14[%c24, %c0_113] : memref<64x256xf32, #tpu.memory_space<vmem>>, vector<8x128xf32>
    %c32 = arith.constant 32 : index
    %c128_114 = arith.constant 128 : index
    %219 = vector.load %arg14[%c32, %c128_114] : memref<64x256xf32, #tpu.memory_space<vmem>>, vector<8x128xf32>
    %c0_115 = arith.constant 0 : index
    %c0_116 = arith.constant 0 : index
    %220 = vector.load %arg17[%c0_115, %c0_116] : memref<8x32xf32, #tpu.memory_space<vmem>>, vector<8x32xf32>
    %c0_117 = arith.constant 0 : index
    %c0_118 = arith.constant 0 : index
    %221 = vector.load %arg19[%c0_117, %c0_118] : memref<8x32xf32, #tpu.memory_space<vmem>>, vector<8x32xf32>
    %222 = tpu.concatenate %220, %221 in 1 : vector<8x32xf32>, vector<8x32xf32> -> vector<8x64xf32>
    %cst_119 = arith.constant dense<0.000000e+00> : vector<8x256xf32>
    %223 = tpu.matmul %222, %8, %cst_119 {dimension_numbers = #tpu.dot_dimension_numbers<[1], [0], [0], [1], [0, 0, 1, 1], [], []>} : vector<8x64xf32>, vector<64x256xf32>, vector<8x256xf32> -> vector<8x256xf32>
    %224 = tpu.concatenate %218, %219 in 1 : vector<8x128xf32>, vector<8x128xf32> -> vector<8x256xf32>
    %225 = arith.addf %224, %223 : vector<8x256xf32>
    %226 = arith.negf %225 : vector<8x256xf32>
    %227 = math.exp %226 : vector<8x256xf32>
    %cst_120 = arith.constant 1.000000e+00 : f32
    %228 = vector.broadcast %cst_120 : f32 to vector<8x256xf32>
    %229 = arith.addf %228, %227 : vector<8x256xf32>
    %230 = arith.divf %228, %229 : vector<8x256xf32>
    %231 = vector.extract_strided_slice %230 {offsets = [0, 0], sizes = [8, 32], strides = [1, 1]} : vector<8x256xf32> to vector<8x32xf32>
    %232 = vector.extract_strided_slice %230 {offsets = [0, 32], sizes = [8, 32], strides = [1, 1]} : vector<8x256xf32> to vector<8x32xf32>
    %233 = vector.extract_strided_slice %225 {offsets = [0, 64], sizes = [8, 32], strides = [1, 1]} : vector<8x256xf32> to vector<8x32xf32>
    %234 = math.tanh %233 : vector<8x32xf32>
    %235 = vector.extract_strided_slice %230 {offsets = [0, 96], sizes = [8, 32], strides = [1, 1]} : vector<8x256xf32> to vector<8x32xf32>
    %c0_121 = arith.constant 0 : index
    %c0_122 = arith.constant 0 : index
    %236 = vector.load %arg18[%c0_121, %c0_122] : memref<8x32xf32, #tpu.memory_space<vmem>>, vector<8x32xf32>
    %237 = arith.mulf %232, %236 : vector<8x32xf32>
    %238 = arith.mulf %231, %234 : vector<8x32xf32>
    %239 = arith.addf %237, %238 : vector<8x32xf32>
    %240 = math.tanh %239 : vector<8x32xf32>
    %241 = arith.mulf %235, %240 : vector<8x32xf32>
    %c3_i32 = arith.constant 3 : i32
    %242 = vector.broadcast %c3_i32 : i32 to vector<8x1xi32>
    %243 = arith.cmpi sgt, %0, %242 : vector<8x1xi32>
    %244 = vector.shape_cast %243 : vector<8x1xi1> to vector<8x1xi1>
    %245 = vector.broadcast %244 : vector<8x1xi1> to vector<8x32xi1>
    %246 = arith.select %245, %241, %220 : vector<8x32xi1>, vector<8x32xf32>
    %c0_123 = arith.constant 0 : index
    %c0_124 = arith.constant 0 : index
    %247 = vector.load %arg18[%c0_123, %c0_124] : memref<8x32xf32, #tpu.memory_space<vmem>>, vector<8x32xf32>
    %248 = vector.shape_cast %243 : vector<8x1xi1> to vector<8x1xi1>
    %249 = vector.broadcast %248 : vector<8x1xi1> to vector<8x32xi1>
    %250 = arith.select %249, %239, %247 : vector<8x32xi1>, vector<8x32xf32>
    %c0_125 = arith.constant 0 : index
    %c0_126 = arith.constant 0 : index
    %251 = vector.load %arg17[%c0_125, %c0_126] : memref<8x32xf32, #tpu.memory_space<vmem>>, vector<8x32xf32>
    tpu.vector_store %arg17[%c0_125, %c0_126], %246 {strides = array<i32>} : memref<8x32xf32, #tpu.memory_space<vmem>>, vector<8x32xf32>,
    %c0_127 = arith.constant 0 : index
    %c0_128 = arith.constant 0 : index
    %252 = vector.load %arg18[%c0_127, %c0_128] : memref<8x32xf32, #tpu.memory_space<vmem>>, vector<8x32xf32>
    tpu.vector_store %arg18[%c0_127, %c0_128], %250 {strides = array<i32>} : memref<8x32xf32, #tpu.memory_space<vmem>>, vector<8x32xf32>,
    %cst_129 = arith.constant 0.000000e+00 : f32
    %253 = vector.shape_cast %243 : vector<8x1xi1> to vector<8x1xi1>
    %254 = vector.broadcast %253 : vector<8x1xi1> to vector<8x32xi1>
    %255 = vector.broadcast %cst_129 : f32 to vector<8x32xf32>
    %256 = arith.select %254, %246, %255 : vector<8x32xi1>, vector<8x32xf32>
    %c24_130 = arith.constant 24 : index
    %c0_131 = arith.constant 0 : index
    %257 = vector.load %arg15[%c24_130, %c0_131] : memref<64x32xf32, #tpu.memory_space<vmem>>, vector<8x32xf32>
    tpu.vector_store %arg15[%c24_130, %c0_131], %256 {strides = array<i32>} : memref<64x32xf32, #tpu.memory_space<vmem>>, vector<8x32xf32>,
    %258 = vector.extract_strided_slice %230 {offsets = [0, 128], sizes = [8, 32], strides = [1, 1]} : vector<8x256xf32> to vector<8x32xf32>
    %259 = vector.extract_strided_slice %230 {offsets = [0, 160], sizes = [8, 32], strides = [1, 1]} : vector<8x256xf32> to vector<8x32xf32>
    %260 = vector.extract_strided_slice %225 {offsets = [0, 192], sizes = [8, 32], strides = [1, 1]} : vector<8x256xf32> to vector<8x32xf32>
    %261 = math.tanh %260 : vector<8x32xf32>
    %262 = vector.extract_strided_slice %230 {offsets = [0, 224], sizes = [8, 32], strides = [1, 1]} : vector<8x256xf32> to vector<8x32xf32>
    %c0_132 = arith.constant 0 : index
    %c0_133 = arith.constant 0 : index
    %263 = vector.load %arg20[%c0_132, %c0_133] : memref<8x32xf32, #tpu.memory_space<vmem>>, vector<8x32xf32>
    %264 = arith.mulf %259, %263 : vector<8x32xf32>
    %265 = arith.mulf %258, %261 : vector<8x32xf32>
    %266 = arith.addf %264, %265 : vector<8x32xf32>
    %267 = math.tanh %266 : vector<8x32xf32>
    %268 = arith.mulf %262, %267 : vector<8x32xf32>
    %c4_i32 = arith.constant 4 : i32
    %269 = vector.broadcast %c4_i32 : i32 to vector<8x1xi32>
    %270 = arith.cmpi sgt, %0, %269 : vector<8x1xi32>
    %271 = vector.shape_cast %270 : vector<8x1xi1> to vector<8x1xi1>
    %272 = vector.broadcast %271 : vector<8x1xi1> to vector<8x32xi1>
    %273 = arith.select %272, %268, %221 : vector<8x32xi1>, vector<8x32xf32>
    %c0_134 = arith.constant 0 : index
    %c0_135 = arith.constant 0 : index
    %274 = vector.load %arg20[%c0_134, %c0_135] : memref<8x32xf32, #tpu.memory_space<vmem>>, vector<8x32xf32>
    %275 = vector.shape_cast %270 : vector<8x1xi1> to vector<8x1xi1>
    %276 = vector.broadcast %275 : vector<8x1xi1> to vector<8x32xi1>
    %277 = arith.select %276, %266, %274 : vector<8x32xi1>, vector<8x32xf32>
    %c0_136 = arith.constant 0 : index
    %c0_137 = arith.constant 0 : index
    %278 = vector.load %arg19[%c0_136, %c0_137] : memref<8x32xf32, #tpu.memory_space<vmem>>, vector<8x32xf32>
    tpu.vector_store %arg19[%c0_136, %c0_137], %273 {strides = array<i32>} : memref<8x32xf32, #tpu.memory_space<vmem>>, vector<8x32xf32>,
    %c0_138 = arith.constant 0 : index
    %c0_139 = arith.constant 0 : index
    %279 = vector.load %arg20[%c0_138, %c0_139] : memref<8x32xf32, #tpu.memory_space<vmem>>, vector<8x32xf32>
    tpu.vector_store %arg20[%c0_138, %c0_139], %277 {strides = array<i32>} : memref<8x32xf32, #tpu.memory_space<vmem>>, vector<8x32xf32>,
    %cst_140 = arith.constant 0.000000e+00 : f32
    %280 = vector.shape_cast %270 : vector<8x1xi1> to vector<8x1xi1>
    %281 = vector.broadcast %280 : vector<8x1xi1> to vector<8x32xi1>
    %282 = vector.broadcast %cst_140 : f32 to vector<8x32xf32>
    %283 = arith.select %281, %273, %282 : vector<8x32xi1>, vector<8x32xf32>
    %c32_141 = arith.constant 32 : index
    %c0_142 = arith.constant 0 : index
    %284 = vector.load %arg16[%c32_141, %c0_142] : memref<64x32xf32, #tpu.memory_space<vmem>>, vector<8x32xf32>
    tpu.vector_store %arg16[%c32_141, %c0_142], %283 {strides = array<i32>} : memref<64x32xf32, #tpu.memory_space<vmem>>, vector<8x32xf32>,
    %c32_143 = arith.constant 32 : index
    %c0_144 = arith.constant 0 : index
    %285 = vector.load %arg14[%c32_143, %c0_144] : memref<64x256xf32, #tpu.memory_space<vmem>>, vector<8x128xf32>
    %c24_145 = arith.constant 24 : index
    %c128_146 = arith.constant 128 : index
    %286 = vector.load %arg14[%c24_145, %c128_146] : memref<64x256xf32, #tpu.memory_space<vmem>>, vector<8x128xf32>
    %c0_147 = arith.constant 0 : index
    %c0_148 = arith.constant 0 : index
    %287 = vector.load %arg17[%c0_147, %c0_148] : memref<8x32xf32, #tpu.memory_space<vmem>>, vector<8x32xf32>
    %c0_149 = arith.constant 0 : index
    %c0_150 = arith.constant 0 : index
    %288 = vector.load %arg19[%c0_149, %c0_150] : memref<8x32xf32, #tpu.memory_space<vmem>>, vector<8x32xf32>
    %289 = tpu.concatenate %287, %288 in 1 : vector<8x32xf32>, vector<8x32xf32> -> vector<8x64xf32>
    %cst_151 = arith.constant dense<0.000000e+00> : vector<8x256xf32>
    %290 = tpu.matmul %289, %8, %cst_151 {dimension_numbers = #tpu.dot_dimension_numbers<[1], [0], [0], [1], [0, 0, 1, 1], [], []>} : vector<8x64xf32>, vector<64x256xf32>, vector<8x256xf32> -> vector<8x256xf32>
    %291 = tpu.concatenate %285, %286 in 1 : vector<8x128xf32>, vector<8x128xf32> -> vector<8x256xf32>
    %292 = arith.addf %291, %290 : vector<8x256xf32>
    %293 = arith.negf %292 : vector<8x256xf32>
    %294 = math.exp %293 : vector<8x256xf32>
    %cst_152 = arith.constant 1.000000e+00 : f32
    %295 = vector.broadcast %cst_152 : f32 to vector<8x256xf32>
    %296 = arith.addf %295, %294 : vector<8x256xf32>
    %297 = arith.divf %295, %296 : vector<8x256xf32>
    %298 = vector.extract_strided_slice %297 {offsets = [0, 0], sizes = [8, 32], strides = [1, 1]} : vector<8x256xf32> to vector<8x32xf32>
    %299 = vector.extract_strided_slice %297 {offsets = [0, 32], sizes = [8, 32], strides = [1, 1]} : vector<8x256xf32> to vector<8x32xf32>
    %300 = vector.extract_strided_slice %292 {offsets = [0, 64], sizes = [8, 32], strides = [1, 1]} : vector<8x256xf32> to vector<8x32xf32>
    %301 = math.tanh %300 : vector<8x32xf32>
    %302 = vector.extract_strided_slice %297 {offsets = [0, 96], sizes = [8, 32], strides = [1, 1]} : vector<8x256xf32> to vector<8x32xf32>
    %c0_153 = arith.constant 0 : index
    %c0_154 = arith.constant 0 : index
    %303 = vector.load %arg18[%c0_153, %c0_154] : memref<8x32xf32, #tpu.memory_space<vmem>>, vector<8x32xf32>
    %304 = arith.mulf %299, %303 : vector<8x32xf32>
    %305 = arith.mulf %298, %301 : vector<8x32xf32>
    %306 = arith.addf %304, %305 : vector<8x32xf32>
    %307 = math.tanh %306 : vector<8x32xf32>
    %308 = arith.mulf %302, %307 : vector<8x32xf32>
    %c4_i32_155 = arith.constant 4 : i32
    %309 = vector.broadcast %c4_i32_155 : i32 to vector<8x1xi32>
    %310 = arith.cmpi sgt, %0, %309 : vector<8x1xi32>
    %311 = vector.shape_cast %310 : vector<8x1xi1> to vector<8x1xi1>
    %312 = vector.broadcast %311 : vector<8x1xi1> to vector<8x32xi1>
    %313 = arith.select %312, %308, %287 : vector<8x32xi1>, vector<8x32xf32>
    %c0_156 = arith.constant 0 : index
    %c0_157 = arith.constant 0 : index
    %314 = vector.load %arg18[%c0_156, %c0_157] : memref<8x32xf32, #tpu.memory_space<vmem>>, vector<8x32xf32>
    %315 = vector.shape_cast %310 : vector<8x1xi1> to vector<8x1xi1>
    %316 = vector.broadcast %315 : vector<8x1xi1> to vector<8x32xi1>
    %317 = arith.select %316, %306, %314 : vector<8x32xi1>, vector<8x32xf32>
    %c0_158 = arith.constant 0 : index
    %c0_159 = arith.constant 0 : index
    %318 = vector.load %arg17[%c0_158, %c0_159] : memref<8x32xf32, #tpu.memory_space<vmem>>, vector<8x32xf32>
    tpu.vector_store %arg17[%c0_158, %c0_159], %313 {strides = array<i32>} : memref<8x32xf32, #tpu.memory_space<vmem>>, vector<8x32xf32>,
    %c0_160 = arith.constant 0 : index
    %c0_161 = arith.constant 0 : index
    %319 = vector.load %arg18[%c0_160, %c0_161] : memref<8x32xf32, #tpu.memory_space<vmem>>, vector<8x32xf32>
    tpu.vector_store %arg18[%c0_160, %c0_161], %317 {strides = array<i32>} : memref<8x32xf32, #tpu.memory_space<vmem>>, vector<8x32xf32>,
    %cst_162 = arith.constant 0.000000e+00 : f32
    %320 = vector.shape_cast %310 : vector<8x1xi1> to vector<8x1xi1>
    %321 = vector.broadcast %320 : vector<8x1xi1> to vector<8x32xi1>
    %322 = vector.broadcast %cst_162 : f32 to vector<8x32xf32>
    %323 = arith.select %321, %313, %322 : vector<8x32xi1>, vector<8x32xf32>
    %c32_163 = arith.constant 32 : index
    %c0_164 = arith.constant 0 : index
    %324 = vector.load %arg15[%c32_163, %c0_164] : memref<64x32xf32, #tpu.memory_space<vmem>>, vector<8x32xf32>
    tpu.vector_store %arg15[%c32_163, %c0_164], %323 {strides = array<i32>} : memref<64x32xf32, #tpu.memory_space<vmem>>, vector<8x32xf32>,
    %325 = vector.extract_strided_slice %297 {offsets = [0, 128], sizes = [8, 32], strides = [1, 1]} : vector<8x256xf32> to vector<8x32xf32>
    %326 = vector.extract_strided_slice %297 {offsets = [0, 160], sizes = [8, 32], strides = [1, 1]} : vector<8x256xf32> to vector<8x32xf32>
    %327 = vector.extract_strided_slice %292 {offsets = [0, 192], sizes = [8, 32], strides = [1, 1]} : vector<8x256xf32> to vector<8x32xf32>
    %328 = math.tanh %327 : vector<8x32xf32>
    %329 = vector.extract_strided_slice %297 {offsets = [0, 224], sizes = [8, 32], strides = [1, 1]} : vector<8x256xf32> to vector<8x32xf32>
    %c0_165 = arith.constant 0 : index
    %c0_166 = arith.constant 0 : index
    %330 = vector.load %arg20[%c0_165, %c0_166] : memref<8x32xf32, #tpu.memory_space<vmem>>, vector<8x32xf32>
    %331 = arith.mulf %326, %330 : vector<8x32xf32>
    %332 = arith.mulf %325, %328 : vector<8x32xf32>
    %333 = arith.addf %331, %332 : vector<8x32xf32>
    %334 = math.tanh %333 : vector<8x32xf32>
    %335 = arith.mulf %329, %334 : vector<8x32xf32>
    %c3_i32_167 = arith.constant 3 : i32
    %336 = vector.broadcast %c3_i32_167 : i32 to vector<8x1xi32>
    %337 = arith.cmpi sgt, %0, %336 : vector<8x1xi32>
    %338 = vector.shape_cast %337 : vector<8x1xi1> to vector<8x1xi1>
    %339 = vector.broadcast %338 : vector<8x1xi1> to vector<8x32xi1>
    %340 = arith.select %339, %335, %288 : vector<8x32xi1>, vector<8x32xf32>
    %c0_168 = arith.constant 0 : index
    %c0_169 = arith.constant 0 : index
    %341 = vector.load %arg20[%c0_168, %c0_169] : memref<8x32xf32, #tpu.memory_space<vmem>>, vector<8x32xf32>
    %342 = vector.shape_cast %337 : vector<8x1xi1> to vector<8x1xi1>
    %343 = vector.broadcast %342 : vector<8x1xi1> to vector<8x32xi1>
    %344 = arith.select %343, %333, %341 : vector<8x32xi1>, vector<8x32xf32>
    %c0_170 = arith.constant 0 : index
    %c0_171 = arith.constant 0 : index
    %345 = vector.load %arg19[%c0_170, %c0_171] : memref<8x32xf32, #tpu.memory_space<vmem>>, vector<8x32xf32>
    tpu.vector_store %arg19[%c0_170, %c0_171], %340 {strides = array<i32>} : memref<8x32xf32, #tpu.memory_space<vmem>>, vector<8x32xf32>,
    %c0_172 = arith.constant 0 : index
    %c0_173 = arith.constant 0 : index
    %346 = vector.load %arg20[%c0_172, %c0_173] : memref<8x32xf32, #tpu.memory_space<vmem>>, vector<8x32xf32>
    tpu.vector_store %arg20[%c0_172, %c0_173], %344 {strides = array<i32>} : memref<8x32xf32, #tpu.memory_space<vmem>>, vector<8x32xf32>,
    %cst_174 = arith.constant 0.000000e+00 : f32
    %347 = vector.shape_cast %337 : vector<8x1xi1> to vector<8x1xi1>
    %348 = vector.broadcast %347 : vector<8x1xi1> to vector<8x32xi1>
    %349 = vector.broadcast %cst_174 : f32 to vector<8x32xf32>
    %350 = arith.select %348, %340, %349 : vector<8x32xi1>, vector<8x32xf32>
    %c24_175 = arith.constant 24 : index
    %c0_176 = arith.constant 0 : index
    %351 = vector.load %arg16[%c24_175, %c0_176] : memref<64x32xf32, #tpu.memory_space<vmem>>, vector<8x32xf32>
    tpu.vector_store %arg16[%c24_175, %c0_176], %350 {strides = array<i32>} : memref<64x32xf32, #tpu.memory_space<vmem>>, vector<8x32xf32>,
    %c40_177 = arith.constant 40 : index
    %c0_178 = arith.constant 0 : index
    %352 = vector.load %arg14[%c40_177, %c0_178] : memref<64x256xf32, #tpu.memory_space<vmem>>, vector<8x128xf32>
    %c16_179 = arith.constant 16 : index
    %c128_180 = arith.constant 128 : index
    %353 = vector.load %arg14[%c16_179, %c128_180] : memref<64x256xf32, #tpu.memory_space<vmem>>, vector<8x128xf32>
    %c0_181 = arith.constant 0 : index
    %c0_182 = arith.constant 0 : index
    %354 = vector.load %arg17[%c0_181, %c0_182] : memref<8x32xf32, #tpu.memory_space<vmem>>, vector<8x32xf32>
    %c0_183 = arith.constant 0 : index
    %c0_184 = arith.constant 0 : index
    %355 = vector.load %arg19[%c0_183, %c0_184] : memref<8x32xf32, #tpu.memory_space<vmem>>, vector<8x32xf32>
    %356 = tpu.concatenate %354, %355 in 1 : vector<8x32xf32>, vector<8x32xf32> -> vector<8x64xf32>
    %cst_185 = arith.constant dense<0.000000e+00> : vector<8x256xf32>
    %357 = tpu.matmul %356, %8, %cst_185 {dimension_numbers = #tpu.dot_dimension_numbers<[1], [0], [0], [1], [0, 0, 1, 1], [], []>} : vector<8x64xf32>, vector<64x256xf32>, vector<8x256xf32> -> vector<8x256xf32>
    %358 = tpu.concatenate %352, %353 in 1 : vector<8x128xf32>, vector<8x128xf32> -> vector<8x256xf32>
    %359 = arith.addf %358, %357 : vector<8x256xf32>
    %360 = arith.negf %359 : vector<8x256xf32>
    %361 = math.exp %360 : vector<8x256xf32>
    %cst_186 = arith.constant 1.000000e+00 : f32
    %362 = vector.broadcast %cst_186 : f32 to vector<8x256xf32>
    %363 = arith.addf %362, %361 : vector<8x256xf32>
    %364 = arith.divf %362, %363 : vector<8x256xf32>
    %365 = vector.extract_strided_slice %364 {offsets = [0, 0], sizes = [8, 32], strides = [1, 1]} : vector<8x256xf32> to vector<8x32xf32>
    %366 = vector.extract_strided_slice %364 {offsets = [0, 32], sizes = [8, 32], strides = [1, 1]} : vector<8x256xf32> to vector<8x32xf32>
    %367 = vector.extract_strided_slice %359 {offsets = [0, 64], sizes = [8, 32], strides = [1, 1]} : vector<8x256xf32> to vector<8x32xf32>
    %368 = math.tanh %367 : vector<8x32xf32>
    %369 = vector.extract_strided_slice %364 {offsets = [0, 96], sizes = [8, 32], strides = [1, 1]} : vector<8x256xf32> to vector<8x32xf32>
    %c0_187 = arith.constant 0 : index
    %c0_188 = arith.constant 0 : index
    %370 = vector.load %arg18[%c0_187, %c0_188] : memref<8x32xf32, #tpu.memory_space<vmem>>, vector<8x32xf32>
    %371 = arith.mulf %366, %370 : vector<8x32xf32>
    %372 = arith.mulf %365, %368 : vector<8x32xf32>
    %373 = arith.addf %371, %372 : vector<8x32xf32>
    %374 = math.tanh %373 : vector<8x32xf32>
    %375 = arith.mulf %369, %374 : vector<8x32xf32>
    %c5_i32_189 = arith.constant 5 : i32
    %376 = vector.broadcast %c5_i32_189 : i32 to vector<8x1xi32>
    %377 = arith.cmpi sgt, %0, %376 : vector<8x1xi32>
    %378 = vector.shape_cast %377 : vector<8x1xi1> to vector<8x1xi1>
    %379 = vector.broadcast %378 : vector<8x1xi1> to vector<8x32xi1>
    %380 = arith.select %379, %375, %354 : vector<8x32xi1>, vector<8x32xf32>
    %c0_190 = arith.constant 0 : index
    %c0_191 = arith.constant 0 : index
    %381 = vector.load %arg18[%c0_190, %c0_191] : memref<8x32xf32, #tpu.memory_space<vmem>>, vector<8x32xf32>
    %382 = vector.shape_cast %377 : vector<8x1xi1> to vector<8x1xi1>
    %383 = vector.broadcast %382 : vector<8x1xi1> to vector<8x32xi1>
    %384 = arith.select %383, %373, %381 : vector<8x32xi1>, vector<8x32xf32>
    %c0_192 = arith.constant 0 : index
    %c0_193 = arith.constant 0 : index
    %385 = vector.load %arg17[%c0_192, %c0_193] : memref<8x32xf32, #tpu.memory_space<vmem>>, vector<8x32xf32>
    tpu.vector_store %arg17[%c0_192, %c0_193], %380 {strides = array<i32>} : memref<8x32xf32, #tpu.memory_space<vmem>>, vector<8x32xf32>,
    %c0_194 = arith.constant 0 : index
    %c0_195 = arith.constant 0 : index
    %386 = vector.load %arg18[%c0_194, %c0_195] : memref<8x32xf32, #tpu.memory_space<vmem>>, vector<8x32xf32>
    tpu.vector_store %arg18[%c0_194, %c0_195], %384 {strides = array<i32>} : memref<8x32xf32, #tpu.memory_space<vmem>>, vector<8x32xf32>,
    %cst_196 = arith.constant 0.000000e+00 : f32
    %387 = vector.shape_cast %377 : vector<8x1xi1> to vector<8x1xi1>
    %388 = vector.broadcast %387 : vector<8x1xi1> to vector<8x32xi1>
    %389 = vector.broadcast %cst_196 : f32 to vector<8x32xf32>
    %390 = arith.select %388, %380, %389 : vector<8x32xi1>, vector<8x32xf32>
    %c40_197 = arith.constant 40 : index
    %c0_198 = arith.constant 0 : index
    %391 = vector.load %arg15[%c40_197, %c0_198] : memref<64x32xf32, #tpu.memory_space<vmem>>, vector<8x32xf32>
    tpu.vector_store %arg15[%c40_197, %c0_198], %390 {strides = array<i32>} : memref<64x32xf32, #tpu.memory_space<vmem>>, vector<8x32xf32>,
    %392 = vector.extract_strided_slice %364 {offsets = [0, 128], sizes = [8, 32], strides = [1, 1]} : vector<8x256xf32> to vector<8x32xf32>
    %393 = vector.extract_strided_slice %364 {offsets = [0, 160], sizes = [8, 32], strides = [1, 1]} : vector<8x256xf32> to vector<8x32xf32>
    %394 = vector.extract_strided_slice %359 {offsets = [0, 192], sizes = [8, 32], strides = [1, 1]} : vector<8x256xf32> to vector<8x32xf32>
    %395 = math.tanh %394 : vector<8x32xf32>
    %396 = vector.extract_strided_slice %364 {offsets = [0, 224], sizes = [8, 32], strides = [1, 1]} : vector<8x256xf32> to vector<8x32xf32>
    %c0_199 = arith.constant 0 : index
    %c0_200 = arith.constant 0 : index
    %397 = vector.load %arg20[%c0_199, %c0_200] : memref<8x32xf32, #tpu.memory_space<vmem>>, vector<8x32xf32>
    %398 = arith.mulf %393, %397 : vector<8x32xf32>
    %399 = arith.mulf %392, %395 : vector<8x32xf32>
    %400 = arith.addf %398, %399 : vector<8x32xf32>
    %401 = math.tanh %400 : vector<8x32xf32>
    %402 = arith.mulf %396, %401 : vector<8x32xf32>
    %c2_i32_201 = arith.constant 2 : i32
    %403 = vector.broadcast %c2_i32_201 : i32 to vector<8x1xi32>
    %404 = arith.cmpi sgt, %0, %403 : vector<8x1xi32>
    %405 = vector.shape_cast %404 : vector<8x1xi1> to vector<8x1xi1>
    %406 = vector.broadcast %405 : vector<8x1xi1> to vector<8x32xi1>
    %407 = arith.select %406, %402, %355 : vector<8x32xi1>, vector<8x32xf32>
    %c0_202 = arith.constant 0 : index
    %c0_203 = arith.constant 0 : index
    %408 = vector.load %arg20[%c0_202, %c0_203] : memref<8x32xf32, #tpu.memory_space<vmem>>, vector<8x32xf32>
    %409 = vector.shape_cast %404 : vector<8x1xi1> to vector<8x1xi1>
    %410 = vector.broadcast %409 : vector<8x1xi1> to vector<8x32xi1>
    %411 = arith.select %410, %400, %408 : vector<8x32xi1>, vector<8x32xf32>
    %c0_204 = arith.constant 0 : index
    %c0_205 = arith.constant 0 : index
    %412 = vector.load %arg19[%c0_204, %c0_205] : memref<8x32xf32, #tpu.memory_space<vmem>>, vector<8x32xf32>
    tpu.vector_store %arg19[%c0_204, %c0_205], %407 {strides = array<i32>} : memref<8x32xf32, #tpu.memory_space<vmem>>, vector<8x32xf32>,
    %c0_206 = arith.constant 0 : index
    %c0_207 = arith.constant 0 : index
    %413 = vector.load %arg20[%c0_206, %c0_207] : memref<8x32xf32, #tpu.memory_space<vmem>>, vector<8x32xf32>
    tpu.vector_store %arg20[%c0_206, %c0_207], %411 {strides = array<i32>} : memref<8x32xf32, #tpu.memory_space<vmem>>, vector<8x32xf32>,
    %cst_208 = arith.constant 0.000000e+00 : f32
    %414 = vector.shape_cast %404 : vector<8x1xi1> to vector<8x1xi1>
    %415 = vector.broadcast %414 : vector<8x1xi1> to vector<8x32xi1>
    %416 = vector.broadcast %cst_208 : f32 to vector<8x32xf32>
    %417 = arith.select %415, %407, %416 : vector<8x32xi1>, vector<8x32xf32>
    %c16_209 = arith.constant 16 : index
    %c0_210 = arith.constant 0 : index
    %418 = vector.load %arg16[%c16_209, %c0_210] : memref<64x32xf32, #tpu.memory_space<vmem>>, vector<8x32xf32>
    tpu.vector_store %arg16[%c16_209, %c0_210], %417 {strides = array<i32>} : memref<64x32xf32, #tpu.memory_space<vmem>>, vector<8x32xf32>,
    %c48_211 = arith.constant 48 : index
    %c0_212 = arith.constant 0 : index
    %419 = vector.load %arg14[%c48_211, %c0_212] : memref<64x256xf32, #tpu.memory_space<vmem>>, vector<8x128xf32>
    %c8_213 = arith.constant 8 : index
    %c128_214 = arith.constant 128 : index
    %420 = vector.load %arg14[%c8_213, %c128_214] : memref<64x256xf32, #tpu.memory_space<vmem>>, vector<8x128xf32>
    %c0_215 = arith.constant 0 : index
    %c0_216 = arith.constant 0 : index
    %421 = vector.load %arg17[%c0_215, %c0_216] : memref<8x32xf32, #tpu.memory_space<vmem>>, vector<8x32xf32>
    %c0_217 = arith.constant 0 : index
    %c0_218 = arith.constant 0 : index
    %422 = vector.load %arg19[%c0_217, %c0_218] : memref<8x32xf32, #tpu.memory_space<vmem>>, vector<8x32xf32>
    %423 = tpu.concatenate %421, %422 in 1 : vector<8x32xf32>, vector<8x32xf32> -> vector<8x64xf32>
    %cst_219 = arith.constant dense<0.000000e+00> : vector<8x256xf32>
    %424 = tpu.matmul %423, %8, %cst_219 {dimension_numbers = #tpu.dot_dimension_numbers<[1], [0], [0], [1], [0, 0, 1, 1], [], []>} : vector<8x64xf32>, vector<64x256xf32>, vector<8x256xf32> -> vector<8x256xf32>
    %425 = tpu.concatenate %419, %420 in 1 : vector<8x128xf32>, vector<8x128xf32> -> vector<8x256xf32>
    %426 = arith.addf %425, %424 : vector<8x256xf32>
    %427 = arith.negf %426 : vector<8x256xf32>
    %428 = math.exp %427 : vector<8x256xf32>
    %cst_220 = arith.constant 1.000000e+00 : f32
    %429 = vector.broadcast %cst_220 : f32 to vector<8x256xf32>
    %430 = arith.addf %429, %428 : vector<8x256xf32>
    %431 = arith.divf %429, %430 : vector<8x256xf32>
    %432 = vector.extract_strided_slice %431 {offsets = [0, 0], sizes = [8, 32], strides = [1, 1]} : vector<8x256xf32> to vector<8x32xf32>
    %433 = vector.extract_strided_slice %431 {offsets = [0, 32], sizes = [8, 32], strides = [1, 1]} : vector<8x256xf32> to vector<8x32xf32>
    %434 = vector.extract_strided_slice %426 {offsets = [0, 64], sizes = [8, 32], strides = [1, 1]} : vector<8x256xf32> to vector<8x32xf32>
    %435 = math.tanh %434 : vector<8x32xf32>
    %436 = vector.extract_strided_slice %431 {offsets = [0, 96], sizes = [8, 32], strides = [1, 1]} : vector<8x256xf32> to vector<8x32xf32>
    %c0_221 = arith.constant 0 : index
    %c0_222 = arith.constant 0 : index
    %437 = vector.load %arg18[%c0_221, %c0_222] : memref<8x32xf32, #tpu.memory_space<vmem>>, vector<8x32xf32>
    %438 = arith.mulf %433, %437 : vector<8x32xf32>
    %439 = arith.mulf %432, %435 : vector<8x32xf32>
    %440 = arith.addf %438, %439 : vector<8x32xf32>
    %441 = math.tanh %440 : vector<8x32xf32>
    %442 = arith.mulf %436, %441 : vector<8x32xf32>
    %c6_i32_223 = arith.constant 6 : i32
    %443 = vector.broadcast %c6_i32_223 : i32 to vector<8x1xi32>
    %444 = arith.cmpi sgt, %0, %443 : vector<8x1xi32>
    %445 = vector.shape_cast %444 : vector<8x1xi1> to vector<8x1xi1>
    %446 = vector.broadcast %445 : vector<8x1xi1> to vector<8x32xi1>
    %447 = arith.select %446, %442, %421 : vector<8x32xi1>, vector<8x32xf32>
    %c0_224 = arith.constant 0 : index
    %c0_225 = arith.constant 0 : index
    %448 = vector.load %arg18[%c0_224, %c0_225] : memref<8x32xf32, #tpu.memory_space<vmem>>, vector<8x32xf32>
    %449 = vector.shape_cast %444 : vector<8x1xi1> to vector<8x1xi1>
    %450 = vector.broadcast %449 : vector<8x1xi1> to vector<8x32xi1>
    %451 = arith.select %450, %440, %448 : vector<8x32xi1>, vector<8x32xf32>
    %c0_226 = arith.constant 0 : index
    %c0_227 = arith.constant 0 : index
    %452 = vector.load %arg17[%c0_226, %c0_227] : memref<8x32xf32, #tpu.memory_space<vmem>>, vector<8x32xf32>
    tpu.vector_store %arg17[%c0_226, %c0_227], %447 {strides = array<i32>} : memref<8x32xf32, #tpu.memory_space<vmem>>, vector<8x32xf32>,
    %c0_228 = arith.constant 0 : index
    %c0_229 = arith.constant 0 : index
    %453 = vector.load %arg18[%c0_228, %c0_229] : memref<8x32xf32, #tpu.memory_space<vmem>>, vector<8x32xf32>
    tpu.vector_store %arg18[%c0_228, %c0_229], %451 {strides = array<i32>} : memref<8x32xf32, #tpu.memory_space<vmem>>, vector<8x32xf32>,
    %cst_230 = arith.constant 0.000000e+00 : f32
    %454 = vector.shape_cast %444 : vector<8x1xi1> to vector<8x1xi1>
    %455 = vector.broadcast %454 : vector<8x1xi1> to vector<8x32xi1>
    %456 = vector.broadcast %cst_230 : f32 to vector<8x32xf32>
    %457 = arith.select %455, %447, %456 : vector<8x32xi1>, vector<8x32xf32>
    %c48_231 = arith.constant 48 : index
    %c0_232 = arith.constant 0 : index
    %458 = vector.load %arg15[%c48_231, %c0_232] : memref<64x32xf32, #tpu.memory_space<vmem>>, vector<8x32xf32>
    tpu.vector_store %arg15[%c48_231, %c0_232], %457 {strides = array<i32>} : memref<64x32xf32, #tpu.memory_space<vmem>>, vector<8x32xf32>,
    %459 = vector.extract_strided_slice %431 {offsets = [0, 128], sizes = [8, 32], strides = [1, 1]} : vector<8x256xf32> to vector<8x32xf32>
    %460 = vector.extract_strided_slice %431 {offsets = [0, 160], sizes = [8, 32], strides = [1, 1]} : vector<8x256xf32> to vector<8x32xf32>
    %461 = vector.extract_strided_slice %426 {offsets = [0, 192], sizes = [8, 32], strides = [1, 1]} : vector<8x256xf32> to vector<8x32xf32>
    %462 = math.tanh %461 : vector<8x32xf32>
    %463 = vector.extract_strided_slice %431 {offsets = [0, 224], sizes = [8, 32], strides = [1, 1]} : vector<8x256xf32> to vector<8x32xf32>
    %c0_233 = arith.constant 0 : index
    %c0_234 = arith.constant 0 : index
    %464 = vector.load %arg20[%c0_233, %c0_234] : memref<8x32xf32, #tpu.memory_space<vmem>>, vector<8x32xf32>
    %465 = arith.mulf %460, %464 : vector<8x32xf32>
    %466 = arith.mulf %459, %462 : vector<8x32xf32>
    %467 = arith.addf %465, %466 : vector<8x32xf32>
    %468 = math.tanh %467 : vector<8x32xf32>
    %469 = arith.mulf %463, %468 : vector<8x32xf32>
    %c1_i32_235 = arith.constant 1 : i32
    %470 = vector.broadcast %c1_i32_235 : i32 to vector<8x1xi32>
    %471 = arith.cmpi sgt, %0, %470 : vector<8x1xi32>
    %472 = vector.shape_cast %471 : vector<8x1xi1> to vector<8x1xi1>
    %473 = vector.broadcast %472 : vector<8x1xi1> to vector<8x32xi1>
    %474 = arith.select %473, %469, %422 : vector<8x32xi1>, vector<8x32xf32>
    %c0_236 = arith.constant 0 : index
    %c0_237 = arith.constant 0 : index
    %475 = vector.load %arg20[%c0_236, %c0_237] : memref<8x32xf32, #tpu.memory_space<vmem>>, vector<8x32xf32>
    %476 = vector.shape_cast %471 : vector<8x1xi1> to vector<8x1xi1>
    %477 = vector.broadcast %476 : vector<8x1xi1> to vector<8x32xi1>
    %478 = arith.select %477, %467, %475 : vector<8x32xi1>, vector<8x32xf32>
    %c0_238 = arith.constant 0 : index
    %c0_239 = arith.constant 0 : index
    %479 = vector.load %arg19[%c0_238, %c0_239] : memref<8x32xf32, #tpu.memory_space<vmem>>, vector<8x32xf32>
    tpu.vector_store %arg19[%c0_238, %c0_239], %474 {strides = array<i32>} : memref<8x32xf32, #tpu.memory_space<vmem>>, vector<8x32xf32>,
    %c0_240 = arith.constant 0 : index
    %c0_241 = arith.constant 0 : index
    %480 = vector.load %arg20[%c0_240, %c0_241] : memref<8x32xf32, #tpu.memory_space<vmem>>, vector<8x32xf32>
    tpu.vector_store %arg20[%c0_240, %c0_241], %478 {strides = array<i32>} : memref<8x32xf32, #tpu.memory_space<vmem>>, vector<8x32xf32>,
    %cst_242 = arith.constant 0.000000e+00 : f32
    %481 = vector.shape_cast %471 : vector<8x1xi1> to vector<8x1xi1>
    %482 = vector.broadcast %481 : vector<8x1xi1> to vector<8x32xi1>
    %483 = vector.broadcast %cst_242 : f32 to vector<8x32xf32>
    %484 = arith.select %482, %474, %483 : vector<8x32xi1>, vector<8x32xf32>
    %c8_243 = arith.constant 8 : index
    %c0_244 = arith.constant 0 : index
    %485 = vector.load %arg16[%c8_243, %c0_244] : memref<64x32xf32, #tpu.memory_space<vmem>>, vector<8x32xf32>
    tpu.vector_store %arg16[%c8_243, %c0_244], %484 {strides = array<i32>} : memref<64x32xf32, #tpu.memory_space<vmem>>, vector<8x32xf32>,
    %c56_245 = arith.constant 56 : index
    %c0_246 = arith.constant 0 : index
    %486 = vector.load %arg14[%c56_245, %c0_246] : memref<64x256xf32, #tpu.memory_space<vmem>>, vector<8x128xf32>
    %c0_247 = arith.constant 0 : index
    %c128_248 = arith.constant 128 : index
    %487 = vector.load %arg14[%c0_247, %c128_248] : memref<64x256xf32, #tpu.memory_space<vmem>>, vector<8x128xf32>
    %c0_249 = arith.constant 0 : index
    %c0_250 = arith.constant 0 : index
    %488 = vector.load %arg17[%c0_249, %c0_250] : memref<8x32xf32, #tpu.memory_space<vmem>>, vector<8x32xf32>
    %c0_251 = arith.constant 0 : index
    %c0_252 = arith.constant 0 : index
    %489 = vector.load %arg19[%c0_251, %c0_252] : memref<8x32xf32, #tpu.memory_space<vmem>>, vector<8x32xf32>
    %490 = tpu.concatenate %488, %489 in 1 : vector<8x32xf32>, vector<8x32xf32> -> vector<8x64xf32>
    %cst_253 = arith.constant dense<0.000000e+00> : vector<8x256xf32>
    %491 = tpu.matmul %490, %8, %cst_253 {dimension_numbers = #tpu.dot_dimension_numbers<[1], [0], [0], [1], [0, 0, 1, 1], [], []>} : vector<8x64xf32>, vector<64x256xf32>, vector<8x256xf32> -> vector<8x256xf32>
    %492 = tpu.concatenate %486, %487 in 1 : vector<8x128xf32>, vector<8x128xf32> -> vector<8x256xf32>
    %493 = arith.addf %492, %491 : vector<8x256xf32>
    %494 = arith.negf %493 : vector<8x256xf32>
    %495 = math.exp %494 : vector<8x256xf32>
    %cst_254 = arith.constant 1.000000e+00 : f32
    %496 = vector.broadcast %cst_254 : f32 to vector<8x256xf32>
    %497 = arith.addf %496, %495 : vector<8x256xf32>
    %498 = arith.divf %496, %497 : vector<8x256xf32>
    %499 = vector.extract_strided_slice %498 {offsets = [0, 0], sizes = [8, 32], strides = [1, 1]} : vector<8x256xf32> to vector<8x32xf32>
    %500 = vector.extract_strided_slice %498 {offsets = [0, 32], sizes = [8, 32], strides = [1, 1]} : vector<8x256xf32> to vector<8x32xf32>
    %501 = vector.extract_strided_slice %493 {offsets = [0, 64], sizes = [8, 32], strides = [1, 1]} : vector<8x256xf32> to vector<8x32xf32>
    %502 = math.tanh %501 : vector<8x32xf32>
    %503 = vector.extract_strided_slice %498 {offsets = [0, 96], sizes = [8, 32], strides = [1, 1]} : vector<8x256xf32> to vector<8x32xf32>
    %c0_255 = arith.constant 0 : index
    %c0_256 = arith.constant 0 : index
    %504 = vector.load %arg18[%c0_255, %c0_256] : memref<8x32xf32, #tpu.memory_space<vmem>>, vector<8x32xf32>
    %505 = arith.mulf %500, %504 : vector<8x32xf32>
    %506 = arith.mulf %499, %502 : vector<8x32xf32>
    %507 = arith.addf %505, %506 : vector<8x32xf32>
    %508 = math.tanh %507 : vector<8x32xf32>
    %509 = arith.mulf %503, %508 : vector<8x32xf32>
    %c7_i32_257 = arith.constant 7 : i32
    %510 = vector.broadcast %c7_i32_257 : i32 to vector<8x1xi32>
    %511 = arith.cmpi sgt, %0, %510 : vector<8x1xi32>
    %512 = vector.shape_cast %511 : vector<8x1xi1> to vector<8x1xi1>
    %513 = vector.broadcast %512 : vector<8x1xi1> to vector<8x32xi1>
    %514 = arith.select %513, %509, %488 : vector<8x32xi1>, vector<8x32xf32>
    %c0_258 = arith.constant 0 : index
    %c0_259 = arith.constant 0 : index
    %515 = vector.load %arg18[%c0_258, %c0_259] : memref<8x32xf32, #tpu.memory_space<vmem>>, vector<8x32xf32>
    %516 = vector.shape_cast %511 : vector<8x1xi1> to vector<8x1xi1>
    %517 = vector.broadcast %516 : vector<8x1xi1> to vector<8x32xi1>
    %518 = arith.select %517, %507, %515 : vector<8x32xi1>, vector<8x32xf32>
    %c0_260 = arith.constant 0 : index
    %c0_261 = arith.constant 0 : index
    %519 = vector.load %arg17[%c0_260, %c0_261] : memref<8x32xf32, #tpu.memory_space<vmem>>, vector<8x32xf32>
    tpu.vector_store %arg17[%c0_260, %c0_261], %514 {strides = array<i32>} : memref<8x32xf32, #tpu.memory_space<vmem>>, vector<8x32xf32>,
    %c0_262 = arith.constant 0 : index
    %c0_263 = arith.constant 0 : index
    %520 = vector.load %arg18[%c0_262, %c0_263] : memref<8x32xf32, #tpu.memory_space<vmem>>, vector<8x32xf32>
    tpu.vector_store %arg18[%c0_262, %c0_263], %518 {strides = array<i32>} : memref<8x32xf32, #tpu.memory_space<vmem>>, vector<8x32xf32>,
    %cst_264 = arith.constant 0.000000e+00 : f32
    %521 = vector.shape_cast %511 : vector<8x1xi1> to vector<8x1xi1>
    %522 = vector.broadcast %521 : vector<8x1xi1> to vector<8x32xi1>
    %523 = vector.broadcast %cst_264 : f32 to vector<8x32xf32>
    %524 = arith.select %522, %514, %523 : vector<8x32xi1>, vector<8x32xf32>
    %c56_265 = arith.constant 56 : index
    %c0_266 = arith.constant 0 : index
    %525 = vector.load %arg15[%c56_265, %c0_266] : memref<64x32xf32, #tpu.memory_space<vmem>>, vector<8x32xf32>
    tpu.vector_store %arg15[%c56_265, %c0_266], %524 {strides = array<i32>} : memref<64x32xf32, #tpu.memory_space<vmem>>, vector<8x32xf32>,
    %526 = vector.extract_strided_slice %498 {offsets = [0, 128], sizes = [8, 32], strides = [1, 1]} : vector<8x256xf32> to vector<8x32xf32>
    %527 = vector.extract_strided_slice %498 {offsets = [0, 160], sizes = [8, 32], strides = [1, 1]} : vector<8x256xf32> to vector<8x32xf32>
    %528 = vector.extract_strided_slice %493 {offsets = [0, 192], sizes = [8, 32], strides = [1, 1]} : vector<8x256xf32> to vector<8x32xf32>
    %529 = math.tanh %528 : vector<8x32xf32>
    %530 = vector.extract_strided_slice %498 {offsets = [0, 224], sizes = [8, 32], strides = [1, 1]} : vector<8x256xf32> to vector<8x32xf32>
    %c0_267 = arith.constant 0 : index
    %c0_268 = arith.constant 0 : index
    %531 = vector.load %arg20[%c0_267, %c0_268] : memref<8x32xf32, #tpu.memory_space<vmem>>, vector<8x32xf32>
    %532 = arith.mulf %527, %531 : vector<8x32xf32>
    %533 = arith.mulf %526, %529 : vector<8x32xf32>
    %534 = arith.addf %532, %533 : vector<8x32xf32>
    %535 = math.tanh %534 : vector<8x32xf32>
    %536 = arith.mulf %530, %535 : vector<8x32xf32>
    %c0_i32_269 = arith.constant 0 : i32
    %537 = vector.broadcast %c0_i32_269 : i32 to vector<8x1xi32>
    %538 = arith.cmpi sgt, %0, %537 : vector<8x1xi32>
    %539 = vector.shape_cast %538 : vector<8x1xi1> to vector<8x1xi1>
    %540 = vector.broadcast %539 : vector<8x1xi1> to vector<8x32xi1>
    %541 = arith.select %540, %536, %489 : vector<8x32xi1>, vector<8x32xf32>
    %c0_270 = arith.constant 0 : index
    %c0_271 = arith.constant 0 : index
    %542 = vector.load %arg20[%c0_270, %c0_271] : memref<8x32xf32, #tpu.memory_space<vmem>>, vector<8x32xf32>
    %543 = vector.shape_cast %538 : vector<8x1xi1> to vector<8x1xi1>
    %544 = vector.broadcast %543 : vector<8x1xi1> to vector<8x32xi1>
    %545 = arith.select %544, %534, %542 : vector<8x32xi1>, vector<8x32xf32>
    %c0_272 = arith.constant 0 : index
    %c0_273 = arith.constant 0 : index
    %546 = vector.load %arg19[%c0_272, %c0_273] : memref<8x32xf32, #tpu.memory_space<vmem>>, vector<8x32xf32>
    tpu.vector_store %arg19[%c0_272, %c0_273], %541 {strides = array<i32>} : memref<8x32xf32, #tpu.memory_space<vmem>>, vector<8x32xf32>,
    %c0_274 = arith.constant 0 : index
    %c0_275 = arith.constant 0 : index
    %547 = vector.load %arg20[%c0_274, %c0_275] : memref<8x32xf32, #tpu.memory_space<vmem>>, vector<8x32xf32>
    tpu.vector_store %arg20[%c0_274, %c0_275], %545 {strides = array<i32>} : memref<8x32xf32, #tpu.memory_space<vmem>>, vector<8x32xf32>,
    %cst_276 = arith.constant 0.000000e+00 : f32
    %548 = vector.shape_cast %538 : vector<8x1xi1> to vector<8x1xi1>
    %549 = vector.broadcast %548 : vector<8x1xi1> to vector<8x32xi1>
    %550 = vector.broadcast %cst_276 : f32 to vector<8x32xf32>
    %551 = arith.select %549, %541, %550 : vector<8x32xi1>, vector<8x32xf32>
    %c0_277 = arith.constant 0 : index
    %c0_278 = arith.constant 0 : index
    %552 = vector.load %arg16[%c0_277, %c0_278] : memref<64x32xf32, #tpu.memory_space<vmem>>, vector<8x32xf32>
    tpu.vector_store %arg16[%c0_277, %c0_278], %551 {strides = array<i32>} : memref<64x32xf32, #tpu.memory_space<vmem>>, vector<8x32xf32>,
    %c0_279 = arith.constant 0 : index
    %c0_280 = arith.constant 0 : index
    %553 = vector.load %arg15[%c0_279, %c0_280] : memref<64x32xf32, #tpu.memory_space<vmem>>, vector<64x32xf32>
    %c0_281 = arith.constant 0 : index
    %c0_282 = arith.constant 0 : index
    %554 = vector.load %arg16[%c0_281, %c0_282] : memref<64x32xf32, #tpu.memory_space<vmem>>, vector<64x32xf32>
    %555 = tpu.concatenate %553, %554 in 1 : vector<64x32xf32>, vector<64x32xf32> -> vector<64x64xf32>
    %c0_283 = arith.constant 0 : index
    %c0_284 = arith.constant 0 : index
    %556 = vector.load %arg5[%c0_283, %c0_284] : memref<64x256xf32, #tpu.memory_space<vmem>>, vector<64x256xf32>
    %cst_285 = arith.constant dense<0.000000e+00> : vector<64x256xf32>
    %557 = tpu.matmul %555, %556, %cst_285 {dimension_numbers = #tpu.dot_dimension_numbers<[1], [0], [0], [1], [0, 0, 1, 1], [], []>} : vector<64x64xf32>, vector<64x256xf32>, vector<64x256xf32> -> vector<64x256xf32>
    %c0_286 = arith.constant 0 : index
    %c0_287 = arith.constant 0 : index
    %558 = vector.load %arg7[%c0_286, %c0_287] : memref<1x256xf32, #tpu.memory_space<vmem>>, vector<1x256xf32>
    %559 = vector.broadcast %558 : vector<1x256xf32> to vector<64x256xf32>
    %560 = arith.addf %557, %559 : vector<64x256xf32>
    %c0_288 = arith.constant 0 : index
    %c0_289 = arith.constant 0 : index
    %561 = vector.load %arg14[%c0_288, %c0_289] : memref<64x256xf32, #tpu.memory_space<vmem>>, vector<64x256xf32>
    tpu.vector_store %arg14[%c0_288, %c0_289], %560 {strides = array<i32>} : memref<64x256xf32, #tpu.memory_space<vmem>>, vector<64x256xf32>,
    %c0_290 = arith.constant 0 : index
    %c0_291 = arith.constant 0 : index
    %562 = vector.load %arg6[%c0_290, %c0_291] : memref<64x256xf32, #tpu.memory_space<vmem>>, vector<64x256xf32>
    %cst_292 = arith.constant 0.000000e+00 : f32
    %563 = vector.broadcast %cst_292 : f32 to vector<8x32xf32>
    %c0_293 = arith.constant 0 : index
    %c0_294 = arith.constant 0 : index
    %564 = vector.load %arg17[%c0_293, %c0_294] : memref<8x32xf32, #tpu.memory_space<vmem>>, vector<8x32xf32>
    tpu.vector_store %arg17[%c0_293, %c0_294], %563 {strides = array<i32>} : memref<8x32xf32, #tpu.memory_space<vmem>>, vector<8x32xf32>,
    %cst_295 = arith.constant 0.000000e+00 : f32
    %565 = vector.broadcast %cst_295 : f32 to vector<8x32xf32>
    %c0_296 = arith.constant 0 : index
    %c0_297 = arith.constant 0 : index
    %566 = vector.load %arg18[%c0_296, %c0_297] : memref<8x32xf32, #tpu.memory_space<vmem>>, vector<8x32xf32>
    tpu.vector_store %arg18[%c0_296, %c0_297], %565 {strides = array<i32>} : memref<8x32xf32, #tpu.memory_space<vmem>>, vector<8x32xf32>,
    %cst_298 = arith.constant 0.000000e+00 : f32
    %567 = vector.broadcast %cst_298 : f32 to vector<8x32xf32>
    %c0_299 = arith.constant 0 : index
    %c0_300 = arith.constant 0 : index
    %568 = vector.load %arg19[%c0_299, %c0_300] : memref<8x32xf32, #tpu.memory_space<vmem>>, vector<8x32xf32>
    tpu.vector_store %arg19[%c0_299, %c0_300], %567 {strides = array<i32>} : memref<8x32xf32, #tpu.memory_space<vmem>>, vector<8x32xf32>,
    %cst_301 = arith.constant 0.000000e+00 : f32
    %569 = vector.broadcast %cst_301 : f32 to vector<8x32xf32>
    %c0_302 = arith.constant 0 : index
    %c0_303 = arith.constant 0 : index
    %570 = vector.load %arg20[%c0_302, %c0_303] : memref<8x32xf32, #tpu.memory_space<vmem>>, vector<8x32xf32>
    tpu.vector_store %arg20[%c0_302, %c0_303], %569 {strides = array<i32>} : memref<8x32xf32, #tpu.memory_space<vmem>>, vector<8x32xf32>,
    %c0_304 = arith.constant 0 : index
    %c0_305 = arith.constant 0 : index
    %571 = vector.load %arg14[%c0_304, %c0_305] : memref<64x256xf32, #tpu.memory_space<vmem>>, vector<8x128xf32>
    %c56_306 = arith.constant 56 : index
    %c128_307 = arith.constant 128 : index
    %572 = vector.load %arg14[%c56_306, %c128_307] : memref<64x256xf32, #tpu.memory_space<vmem>>, vector<8x128xf32>
    %c0_308 = arith.constant 0 : index
    %c0_309 = arith.constant 0 : index
    %573 = vector.load %arg17[%c0_308, %c0_309] : memref<8x32xf32, #tpu.memory_space<vmem>>, vector<8x32xf32>
    %c0_310 = arith.constant 0 : index
    %c0_311 = arith.constant 0 : index
    %574 = vector.load %arg19[%c0_310, %c0_311] : memref<8x32xf32, #tpu.memory_space<vmem>>, vector<8x32xf32>
    %575 = tpu.concatenate %573, %574 in 1 : vector<8x32xf32>, vector<8x32xf32> -> vector<8x64xf32>
    %cst_312 = arith.constant dense<0.000000e+00> : vector<8x256xf32>
    %576 = tpu.matmul %575, %562, %cst_312 {dimension_numbers = #tpu.dot_dimension_numbers<[1], [0], [0], [1], [0, 0, 1, 1], [], []>} : vector<8x64xf32>, vector<64x256xf32>, vector<8x256xf32> -> vector<8x256xf32>
    %577 = tpu.concatenate %571, %572 in 1 : vector<8x128xf32>, vector<8x128xf32> -> vector<8x256xf32>
    %578 = arith.addf %577, %576 : vector<8x256xf32>
    %579 = arith.negf %578 : vector<8x256xf32>
    %580 = math.exp %579 : vector<8x256xf32>
    %cst_313 = arith.constant 1.000000e+00 : f32
    %581 = vector.broadcast %cst_313 : f32 to vector<8x256xf32>
    %582 = arith.addf %581, %580 : vector<8x256xf32>
    %583 = arith.divf %581, %582 : vector<8x256xf32>
    %584 = vector.extract_strided_slice %583 {offsets = [0, 0], sizes = [8, 32], strides = [1, 1]} : vector<8x256xf32> to vector<8x32xf32>
    %585 = vector.extract_strided_slice %583 {offsets = [0, 32], sizes = [8, 32], strides = [1, 1]} : vector<8x256xf32> to vector<8x32xf32>
    %586 = vector.extract_strided_slice %578 {offsets = [0, 64], sizes = [8, 32], strides = [1, 1]} : vector<8x256xf32> to vector<8x32xf32>
    %587 = math.tanh %586 : vector<8x32xf32>
    %588 = vector.extract_strided_slice %583 {offsets = [0, 96], sizes = [8, 32], strides = [1, 1]} : vector<8x256xf32> to vector<8x32xf32>
    %c0_314 = arith.constant 0 : index
    %c0_315 = arith.constant 0 : index
    %589 = vector.load %arg18[%c0_314, %c0_315] : memref<8x32xf32, #tpu.memory_space<vmem>>, vector<8x32xf32>
    %590 = arith.mulf %585, %589 : vector<8x32xf32>
    %591 = arith.mulf %584, %587 : vector<8x32xf32>
    %592 = arith.addf %590, %591 : vector<8x32xf32>
    %593 = math.tanh %592 : vector<8x32xf32>
    %594 = arith.mulf %588, %593 : vector<8x32xf32>
    %c0_i32_316 = arith.constant 0 : i32
    %595 = vector.broadcast %c0_i32_316 : i32 to vector<8x1xi32>
    %596 = arith.cmpi sgt, %0, %595 : vector<8x1xi32>
    %597 = vector.shape_cast %596 : vector<8x1xi1> to vector<8x1xi1>
    %598 = vector.broadcast %597 : vector<8x1xi1> to vector<8x32xi1>
    %599 = arith.select %598, %594, %573 : vector<8x32xi1>, vector<8x32xf32>
    %c0_317 = arith.constant 0 : index
    %c0_318 = arith.constant 0 : index
    %600 = vector.load %arg18[%c0_317, %c0_318] : memref<8x32xf32, #tpu.memory_space<vmem>>, vector<8x32xf32>
    %601 = vector.shape_cast %596 : vector<8x1xi1> to vector<8x1xi1>
    %602 = vector.broadcast %601 : vector<8x1xi1> to vector<8x32xi1>
    %603 = arith.select %602, %592, %600 : vector<8x32xi1>, vector<8x32xf32>
    %c0_319 = arith.constant 0 : index
    %c0_320 = arith.constant 0 : index
    %604 = vector.load %arg17[%c0_319, %c0_320] : memref<8x32xf32, #tpu.memory_space<vmem>>, vector<8x32xf32>
    tpu.vector_store %arg17[%c0_319, %c0_320], %599 {strides = array<i32>} : memref<8x32xf32, #tpu.memory_space<vmem>>, vector<8x32xf32>,
    %c0_321 = arith.constant 0 : index
    %c0_322 = arith.constant 0 : index
    %605 = vector.load %arg18[%c0_321, %c0_322] : memref<8x32xf32, #tpu.memory_space<vmem>>, vector<8x32xf32>
    tpu.vector_store %arg18[%c0_321, %c0_322], %603 {strides = array<i32>} : memref<8x32xf32, #tpu.memory_space<vmem>>, vector<8x32xf32>,
    %cst_323 = arith.constant 0.000000e+00 : f32
    %606 = vector.shape_cast %596 : vector<8x1xi1> to vector<8x1xi1>
    %607 = vector.broadcast %606 : vector<8x1xi1> to vector<8x32xi1>
    %608 = vector.broadcast %cst_323 : f32 to vector<8x32xf32>
    %609 = arith.select %607, %599, %608 : vector<8x32xi1>, vector<8x32xf32>
    %c0_324 = arith.constant 0 : index
    %c0_325 = arith.constant 0 : index
    %610 = vector.load %arg15[%c0_324, %c0_325] : memref<64x32xf32, #tpu.memory_space<vmem>>, vector<8x32xf32>
    tpu.vector_store %arg15[%c0_324, %c0_325], %609 {strides = array<i32>} : memref<64x32xf32, #tpu.memory_space<vmem>>, vector<8x32xf32>,
    %611 = vector.extract_strided_slice %583 {offsets = [0, 128], sizes = [8, 32], strides = [1, 1]} : vector<8x256xf32> to vector<8x32xf32>
    %612 = vector.extract_strided_slice %583 {offsets = [0, 160], sizes = [8, 32], strides = [1, 1]} : vector<8x256xf32> to vector<8x32xf32>
    %613 = vector.extract_strided_slice %578 {offsets = [0, 192], sizes = [8, 32], strides = [1, 1]} : vector<8x256xf32> to vector<8x32xf32>
    %614 = math.tanh %613 : vector<8x32xf32>
    %615 = vector.extract_strided_slice %583 {offsets = [0, 224], sizes = [8, 32], strides = [1, 1]} : vector<8x256xf32> to vector<8x32xf32>
    %c0_326 = arith.constant 0 : index
    %c0_327 = arith.constant 0 : index
    %616 = vector.load %arg20[%c0_326, %c0_327] : memref<8x32xf32, #tpu.memory_space<vmem>>, vector<8x32xf32>
    %617 = arith.mulf %612, %616 : vector<8x32xf32>
    %618 = arith.mulf %611, %614 : vector<8x32xf32>
    %619 = arith.addf %617, %618 : vector<8x32xf32>
    %620 = math.tanh %619 : vector<8x32xf32>
    %621 = arith.mulf %615, %620 : vector<8x32xf32>
    %c7_i32_328 = arith.constant 7 : i32
    %622 = vector.broadcast %c7_i32_328 : i32 to vector<8x1xi32>
    %623 = arith.cmpi sgt, %0, %622 : vector<8x1xi32>
    %624 = vector.shape_cast %623 : vector<8x1xi1> to vector<8x1xi1>
    %625 = vector.broadcast %624 : vector<8x1xi1> to vector<8x32xi1>
    %626 = arith.select %625, %621, %574 : vector<8x32xi1>, vector<8x32xf32>
    %c0_329 = arith.constant 0 : index
    %c0_330 = arith.constant 0 : index
    %627 = vector.load %arg20[%c0_329, %c0_330] : memref<8x32xf32, #tpu.memory_space<vmem>>, vector<8x32xf32>
    %628 = vector.shape_cast %623 : vector<8x1xi1> to vector<8x1xi1>
    %629 = vector.broadcast %628 : vector<8x1xi1> to vector<8x32xi1>
    %630 = arith.select %629, %619, %627 : vector<8x32xi1>, vector<8x32xf32>
    %c0_331 = arith.constant 0 : index
    %c0_332 = arith.constant 0 : index
    %631 = vector.load %arg19[%c0_331, %c0_332] : memref<8x32xf32, #tpu.memory_space<vmem>>, vector<8x32xf32>
    tpu.vector_store %arg19[%c0_331, %c0_332], %626 {strides = array<i32>} : memref<8x32xf32, #tpu.memory_space<vmem>>, vector<8x32xf32>,
    %c0_333 = arith.constant 0 : index
    %c0_334 = arith.constant 0 : index
    %632 = vector.load %arg20[%c0_333, %c0_334] : memref<8x32xf32, #tpu.memory_space<vmem>>, vector<8x32xf32>
    tpu.vector_store %arg20[%c0_333, %c0_334], %630 {strides = array<i32>} : memref<8x32xf32, #tpu.memory_space<vmem>>, vector<8x32xf32>,
    %cst_335 = arith.constant 0.000000e+00 : f32
    %633 = vector.shape_cast %623 : vector<8x1xi1> to vector<8x1xi1>
    %634 = vector.broadcast %633 : vector<8x1xi1> to vector<8x32xi1>
    %635 = vector.broadcast %cst_335 : f32 to vector<8x32xf32>
    %636 = arith.select %634, %626, %635 : vector<8x32xi1>, vector<8x32xf32>
    %c56_336 = arith.constant 56 : index
    %c0_337 = arith.constant 0 : index
    %637 = vector.load %arg16[%c56_336, %c0_337] : memref<64x32xf32, #tpu.memory_space<vmem>>, vector<8x32xf32>
    tpu.vector_store %arg16[%c56_336, %c0_337], %636 {strides = array<i32>} : memref<64x32xf32, #tpu.memory_space<vmem>>, vector<8x32xf32>,
    %c8_338 = arith.constant 8 : index
    %c0_339 = arith.constant 0 : index
    %638 = vector.load %arg14[%c8_338, %c0_339] : memref<64x256xf32, #tpu.memory_space<vmem>>, vector<8x128xf32>
    %c48_340 = arith.constant 48 : index
    %c128_341 = arith.constant 128 : index
    %639 = vector.load %arg14[%c48_340, %c128_341] : memref<64x256xf32, #tpu.memory_space<vmem>>, vector<8x128xf32>
    %c0_342 = arith.constant 0 : index
    %c0_343 = arith.constant 0 : index
    %640 = vector.load %arg17[%c0_342, %c0_343] : memref<8x32xf32, #tpu.memory_space<vmem>>, vector<8x32xf32>
    %c0_344 = arith.constant 0 : index
    %c0_345 = arith.constant 0 : index
    %641 = vector.load %arg19[%c0_344, %c0_345] : memref<8x32xf32, #tpu.memory_space<vmem>>, vector<8x32xf32>
    %642 = tpu.concatenate %640, %641 in 1 : vector<8x32xf32>, vector<8x32xf32> -> vector<8x64xf32>
    %cst_346 = arith.constant dense<0.000000e+00> : vector<8x256xf32>
    %643 = tpu.matmul %642, %562, %cst_346 {dimension_numbers = #tpu.dot_dimension_numbers<[1], [0], [0], [1], [0, 0, 1, 1], [], []>} : vector<8x64xf32>, vector<64x256xf32>, vector<8x256xf32> -> vector<8x256xf32>
    %644 = tpu.concatenate %638, %639 in 1 : vector<8x128xf32>, vector<8x128xf32> -> vector<8x256xf32>
    %645 = arith.addf %644, %643 : vector<8x256xf32>
    %646 = arith.negf %645 : vector<8x256xf32>
    %647 = math.exp %646 : vector<8x256xf32>
    %cst_347 = arith.constant 1.000000e+00 : f32
    %648 = vector.broadcast %cst_347 : f32 to vector<8x256xf32>
    %649 = arith.addf %648, %647 : vector<8x256xf32>
    %650 = arith.divf %648, %649 : vector<8x256xf32>
    %651 = vector.extract_strided_slice %650 {offsets = [0, 0], sizes = [8, 32], strides = [1, 1]} : vector<8x256xf32> to vector<8x32xf32>
    %652 = vector.extract_strided_slice %650 {offsets = [0, 32], sizes = [8, 32], strides = [1, 1]} : vector<8x256xf32> to vector<8x32xf32>
    %653 = vector.extract_strided_slice %645 {offsets = [0, 64], sizes = [8, 32], strides = [1, 1]} : vector<8x256xf32> to vector<8x32xf32>
    %654 = math.tanh %653 : vector<8x32xf32>
    %655 = vector.extract_strided_slice %650 {offsets = [0, 96], sizes = [8, 32], strides = [1, 1]} : vector<8x256xf32> to vector<8x32xf32>
    %c0_348 = arith.constant 0 : index
    %c0_349 = arith.constant 0 : index
    %656 = vector.load %arg18[%c0_348, %c0_349] : memref<8x32xf32, #tpu.memory_space<vmem>>, vector<8x32xf32>
    %657 = arith.mulf %652, %656 : vector<8x32xf32>
    %658 = arith.mulf %651, %654 : vector<8x32xf32>
    %659 = arith.addf %657, %658 : vector<8x32xf32>
    %660 = math.tanh %659 : vector<8x32xf32>
    %661 = arith.mulf %655, %660 : vector<8x32xf32>
    %c1_i32_350 = arith.constant 1 : i32
    %662 = vector.broadcast %c1_i32_350 : i32 to vector<8x1xi32>
    %663 = arith.cmpi sgt, %0, %662 : vector<8x1xi32>
    %664 = vector.shape_cast %663 : vector<8x1xi1> to vector<8x1xi1>
    %665 = vector.broadcast %664 : vector<8x1xi1> to vector<8x32xi1>
    %666 = arith.select %665, %661, %640 : vector<8x32xi1>, vector<8x32xf32>
    %c0_351 = arith.constant 0 : index
    %c0_352 = arith.constant 0 : index
    %667 = vector.load %arg18[%c0_351, %c0_352] : memref<8x32xf32, #tpu.memory_space<vmem>>, vector<8x32xf32>
    %668 = vector.shape_cast %663 : vector<8x1xi1> to vector<8x1xi1>
    %669 = vector.broadcast %668 : vector<8x1xi1> to vector<8x32xi1>
    %670 = arith.select %669, %659, %667 : vector<8x32xi1>, vector<8x32xf32>
    %c0_353 = arith.constant 0 : index
    %c0_354 = arith.constant 0 : index
    %671 = vector.load %arg17[%c0_353, %c0_354] : memref<8x32xf32, #tpu.memory_space<vmem>>, vector<8x32xf32>
    tpu.vector_store %arg17[%c0_353, %c0_354], %666 {strides = array<i32>} : memref<8x32xf32, #tpu.memory_space<vmem>>, vector<8x32xf32>,
    %c0_355 = arith.constant 0 : index
    %c0_356 = arith.constant 0 : index
    %672 = vector.load %arg18[%c0_355, %c0_356] : memref<8x32xf32, #tpu.memory_space<vmem>>, vector<8x32xf32>
    tpu.vector_store %arg18[%c0_355, %c0_356], %670 {strides = array<i32>} : memref<8x32xf32, #tpu.memory_space<vmem>>, vector<8x32xf32>,
    %cst_357 = arith.constant 0.000000e+00 : f32
    %673 = vector.shape_cast %663 : vector<8x1xi1> to vector<8x1xi1>
    %674 = vector.broadcast %673 : vector<8x1xi1> to vector<8x32xi1>
    %675 = vector.broadcast %cst_357 : f32 to vector<8x32xf32>
    %676 = arith.select %674, %666, %675 : vector<8x32xi1>, vector<8x32xf32>
    %c8_358 = arith.constant 8 : index
    %c0_359 = arith.constant 0 : index
    %677 = vector.load %arg15[%c8_358, %c0_359] : memref<64x32xf32, #tpu.memory_space<vmem>>, vector<8x32xf32>
    tpu.vector_store %arg15[%c8_358, %c0_359], %676 {strides = array<i32>} : memref<64x32xf32, #tpu.memory_space<vmem>>, vector<8x32xf32>,
    %678 = vector.extract_strided_slice %650 {offsets = [0, 128], sizes = [8, 32], strides = [1, 1]} : vector<8x256xf32> to vector<8x32xf32>
    %679 = vector.extract_strided_slice %650 {offsets = [0, 160], sizes = [8, 32], strides = [1, 1]} : vector<8x256xf32> to vector<8x32xf32>
    %680 = vector.extract_strided_slice %645 {offsets = [0, 192], sizes = [8, 32], strides = [1, 1]} : vector<8x256xf32> to vector<8x32xf32>
    %681 = math.tanh %680 : vector<8x32xf32>
    %682 = vector.extract_strided_slice %650 {offsets = [0, 224], sizes = [8, 32], strides = [1, 1]} : vector<8x256xf32> to vector<8x32xf32>
    %c0_360 = arith.constant 0 : index
    %c0_361 = arith.constant 0 : index
    %683 = vector.load %arg20[%c0_360, %c0_361] : memref<8x32xf32, #tpu.memory_space<vmem>>, vector<8x32xf32>
    %684 = arith.mulf %679, %683 : vector<8x32xf32>
    %685 = arith.mulf %678, %681 : vector<8x32xf32>
    %686 = arith.addf %684, %685 : vector<8x32xf32>
    %687 = math.tanh %686 : vector<8x32xf32>
    %688 = arith.mulf %682, %687 : vector<8x32xf32>
    %c6_i32_362 = arith.constant 6 : i32
    %689 = vector.broadcast %c6_i32_362 : i32 to vector<8x1xi32>
    %690 = arith.cmpi sgt, %0, %689 : vector<8x1xi32>
    %691 = vector.shape_cast %690 : vector<8x1xi1> to vector<8x1xi1>
    %692 = vector.broadcast %691 : vector<8x1xi1> to vector<8x32xi1>
    %693 = arith.select %692, %688, %641 : vector<8x32xi1>, vector<8x32xf32>
    %c0_363 = arith.constant 0 : index
    %c0_364 = arith.constant 0 : index
    %694 = vector.load %arg20[%c0_363, %c0_364] : memref<8x32xf32, #tpu.memory_space<vmem>>, vector<8x32xf32>
    %695 = vector.shape_cast %690 : vector<8x1xi1> to vector<8x1xi1>
    %696 = vector.broadcast %695 : vector<8x1xi1> to vector<8x32xi1>
    %697 = arith.select %696, %686, %694 : vector<8x32xi1>, vector<8x32xf32>
    %c0_365 = arith.constant 0 : index
    %c0_366 = arith.constant 0 : index
    %698 = vector.load %arg19[%c0_365, %c0_366] : memref<8x32xf32, #tpu.memory_space<vmem>>, vector<8x32xf32>
    tpu.vector_store %arg19[%c0_365, %c0_366], %693 {strides = array<i32>} : memref<8x32xf32, #tpu.memory_space<vmem>>, vector<8x32xf32>,
    %c0_367 = arith.constant 0 : index
    %c0_368 = arith.constant 0 : index
    %699 = vector.load %arg20[%c0_367, %c0_368] : memref<8x32xf32, #tpu.memory_space<vmem>>, vector<8x32xf32>
    tpu.vector_store %arg20[%c0_367, %c0_368], %697 {strides = array<i32>} : memref<8x32xf32, #tpu.memory_space<vmem>>, vector<8x32xf32>,
    %cst_369 = arith.constant 0.000000e+00 : f32
    %700 = vector.shape_cast %690 : vector<8x1xi1> to vector<8x1xi1>
    %701 = vector.broadcast %700 : vector<8x1xi1> to vector<8x32xi1>
    %702 = vector.broadcast %cst_369 : f32 to vector<8x32xf32>
    %703 = arith.select %701, %693, %702 : vector<8x32xi1>, vector<8x32xf32>
    %c48_370 = arith.constant 48 : index
    %c0_371 = arith.constant 0 : index
    %704 = vector.load %arg16[%c48_370, %c0_371] : memref<64x32xf32, #tpu.memory_space<vmem>>, vector<8x32xf32>
    tpu.vector_store %arg16[%c48_370, %c0_371], %703 {strides = array<i32>} : memref<64x32xf32, #tpu.memory_space<vmem>>, vector<8x32xf32>,
    %c16_372 = arith.constant 16 : index
    %c0_373 = arith.constant 0 : index
    %705 = vector.load %arg14[%c16_372, %c0_373] : memref<64x256xf32, #tpu.memory_space<vmem>>, vector<8x128xf32>
    %c40_374 = arith.constant 40 : index
    %c128_375 = arith.constant 128 : index
    %706 = vector.load %arg14[%c40_374, %c128_375] : memref<64x256xf32, #tpu.memory_space<vmem>>, vector<8x128xf32>
    %c0_376 = arith.constant 0 : index
    %c0_377 = arith.constant 0 : index
    %707 = vector.load %arg17[%c0_376, %c0_377] : memref<8x32xf32, #tpu.memory_space<vmem>>, vector<8x32xf32>
    %c0_378 = arith.constant 0 : index
    %c0_379 = arith.constant 0 : index
    %708 = vector.load %arg19[%c0_378, %c0_379] : memref<8x32xf32, #tpu.memory_space<vmem>>, vector<8x32xf32>
    %709 = tpu.concatenate %707, %708 in 1 : vector<8x32xf32>, vector<8x32xf32> -> vector<8x64xf32>
    %cst_380 = arith.constant dense<0.000000e+00> : vector<8x256xf32>
    %710 = tpu.matmul %709, %562, %cst_380 {dimension_numbers = #tpu.dot_dimension_numbers<[1], [0], [0], [1], [0, 0, 1, 1], [], []>} : vector<8x64xf32>, vector<64x256xf32>, vector<8x256xf32> -> vector<8x256xf32>
    %711 = tpu.concatenate %705, %706 in 1 : vector<8x128xf32>, vector<8x128xf32> -> vector<8x256xf32>
    %712 = arith.addf %711, %710 : vector<8x256xf32>
    %713 = arith.negf %712 : vector<8x256xf32>
    %714 = math.exp %713 : vector<8x256xf32>
    %cst_381 = arith.constant 1.000000e+00 : f32
    %715 = vector.broadcast %cst_381 : f32 to vector<8x256xf32>
    %716 = arith.addf %715, %714 : vector<8x256xf32>
    %717 = arith.divf %715, %716 : vector<8x256xf32>
    %718 = vector.extract_strided_slice %717 {offsets = [0, 0], sizes = [8, 32], strides = [1, 1]} : vector<8x256xf32> to vector<8x32xf32>
    %719 = vector.extract_strided_slice %717 {offsets = [0, 32], sizes = [8, 32], strides = [1, 1]} : vector<8x256xf32> to vector<8x32xf32>
    %720 = vector.extract_strided_slice %712 {offsets = [0, 64], sizes = [8, 32], strides = [1, 1]} : vector<8x256xf32> to vector<8x32xf32>
    %721 = math.tanh %720 : vector<8x32xf32>
    %722 = vector.extract_strided_slice %717 {offsets = [0, 96], sizes = [8, 32], strides = [1, 1]} : vector<8x256xf32> to vector<8x32xf32>
    %c0_382 = arith.constant 0 : index
    %c0_383 = arith.constant 0 : index
    %723 = vector.load %arg18[%c0_382, %c0_383] : memref<8x32xf32, #tpu.memory_space<vmem>>, vector<8x32xf32>
    %724 = arith.mulf %719, %723 : vector<8x32xf32>
    %725 = arith.mulf %718, %721 : vector<8x32xf32>
    %726 = arith.addf %724, %725 : vector<8x32xf32>
    %727 = math.tanh %726 : vector<8x32xf32>
    %728 = arith.mulf %722, %727 : vector<8x32xf32>
    %c2_i32_384 = arith.constant 2 : i32
    %729 = vector.broadcast %c2_i32_384 : i32 to vector<8x1xi32>
    %730 = arith.cmpi sgt, %0, %729 : vector<8x1xi32>
    %731 = vector.shape_cast %730 : vector<8x1xi1> to vector<8x1xi1>
    %732 = vector.broadcast %731 : vector<8x1xi1> to vector<8x32xi1>
    %733 = arith.select %732, %728, %707 : vector<8x32xi1>, vector<8x32xf32>
    %c0_385 = arith.constant 0 : index
    %c0_386 = arith.constant 0 : index
    %734 = vector.load %arg18[%c0_385, %c0_386] : memref<8x32xf32, #tpu.memory_space<vmem>>, vector<8x32xf32>
    %735 = vector.shape_cast %730 : vector<8x1xi1> to vector<8x1xi1>
    %736 = vector.broadcast %735 : vector<8x1xi1> to vector<8x32xi1>
    %737 = arith.select %736, %726, %734 : vector<8x32xi1>, vector<8x32xf32>
    %c0_387 = arith.constant 0 : index
    %c0_388 = arith.constant 0 : index
    %738 = vector.load %arg17[%c0_387, %c0_388] : memref<8x32xf32, #tpu.memory_space<vmem>>, vector<8x32xf32>
    tpu.vector_store %arg17[%c0_387, %c0_388], %733 {strides = array<i32>} : memref<8x32xf32, #tpu.memory_space<vmem>>, vector<8x32xf32>,
    %c0_389 = arith.constant 0 : index
    %c0_390 = arith.constant 0 : index
    %739 = vector.load %arg18[%c0_389, %c0_390] : memref<8x32xf32, #tpu.memory_space<vmem>>, vector<8x32xf32>
    tpu.vector_store %arg18[%c0_389, %c0_390], %737 {strides = array<i32>} : memref<8x32xf32, #tpu.memory_space<vmem>>, vector<8x32xf32>,
    %cst_391 = arith.constant 0.000000e+00 : f32
    %740 = vector.shape_cast %730 : vector<8x1xi1> to vector<8x1xi1>
    %741 = vector.broadcast %740 : vector<8x1xi1> to vector<8x32xi1>
    %742 = vector.broadcast %cst_391 : f32 to vector<8x32xf32>
    %743 = arith.select %741, %733, %742 : vector<8x32xi1>, vector<8x32xf32>
    %c16_392 = arith.constant 16 : index
    %c0_393 = arith.constant 0 : index
    %744 = vector.load %arg15[%c16_392, %c0_393] : memref<64x32xf32, #tpu.memory_space<vmem>>, vector<8x32xf32>
    tpu.vector_store %arg15[%c16_392, %c0_393], %743 {strides = array<i32>} : memref<64x32xf32, #tpu.memory_space<vmem>>, vector<8x32xf32>,
    %745 = vector.extract_strided_slice %717 {offsets = [0, 128], sizes = [8, 32], strides = [1, 1]} : vector<8x256xf32> to vector<8x32xf32>
    %746 = vector.extract_strided_slice %717 {offsets = [0, 160], sizes = [8, 32], strides = [1, 1]} : vector<8x256xf32> to vector<8x32xf32>
    %747 = vector.extract_strided_slice %712 {offsets = [0, 192], sizes = [8, 32], strides = [1, 1]} : vector<8x256xf32> to vector<8x32xf32>
    %748 = math.tanh %747 : vector<8x32xf32>
    %749 = vector.extract_strided_slice %717 {offsets = [0, 224], sizes = [8, 32], strides = [1, 1]} : vector<8x256xf32> to vector<8x32xf32>
    %c0_394 = arith.constant 0 : index
    %c0_395 = arith.constant 0 : index
    %750 = vector.load %arg20[%c0_394, %c0_395] : memref<8x32xf32, #tpu.memory_space<vmem>>, vector<8x32xf32>
    %751 = arith.mulf %746, %750 : vector<8x32xf32>
    %752 = arith.mulf %745, %748 : vector<8x32xf32>
    %753 = arith.addf %751, %752 : vector<8x32xf32>
    %754 = math.tanh %753 : vector<8x32xf32>
    %755 = arith.mulf %749, %754 : vector<8x32xf32>
    %c5_i32_396 = arith.constant 5 : i32
    %756 = vector.broadcast %c5_i32_396 : i32 to vector<8x1xi32>
    %757 = arith.cmpi sgt, %0, %756 : vector<8x1xi32>
    %758 = vector.shape_cast %757 : vector<8x1xi1> to vector<8x1xi1>
    %759 = vector.broadcast %758 : vector<8x1xi1> to vector<8x32xi1>
    %760 = arith.select %759, %755, %708 : vector<8x32xi1>, vector<8x32xf32>
    %c0_397 = arith.constant 0 : index
    %c0_398 = arith.constant 0 : index
    %761 = vector.load %arg20[%c0_397, %c0_398] : memref<8x32xf32, #tpu.memory_space<vmem>>, vector<8x32xf32>
    %762 = vector.shape_cast %757 : vector<8x1xi1> to vector<8x1xi1>
    %763 = vector.broadcast %762 : vector<8x1xi1> to vector<8x32xi1>
    %764 = arith.select %763, %753, %761 : vector<8x32xi1>, vector<8x32xf32>
    %c0_399 = arith.constant 0 : index
    %c0_400 = arith.constant 0 : index
    %765 = vector.load %arg19[%c0_399, %c0_400] : memref<8x32xf32, #tpu.memory_space<vmem>>, vector<8x32xf32>
    tpu.vector_store %arg19[%c0_399, %c0_400], %760 {strides = array<i32>} : memref<8x32xf32, #tpu.memory_space<vmem>>, vector<8x32xf32>,
    %c0_401 = arith.constant 0 : index
    %c0_402 = arith.constant 0 : index
    %766 = vector.load %arg20[%c0_401, %c0_402] : memref<8x32xf32, #tpu.memory_space<vmem>>, vector<8x32xf32>
    tpu.vector_store %arg20[%c0_401, %c0_402], %764 {strides = array<i32>} : memref<8x32xf32, #tpu.memory_space<vmem>>, vector<8x32xf32>,
    %cst_403 = arith.constant 0.000000e+00 : f32
    %767 = vector.shape_cast %757 : vector<8x1xi1> to vector<8x1xi1>
    %768 = vector.broadcast %767 : vector<8x1xi1> to vector<8x32xi1>
    %769 = vector.broadcast %cst_403 : f32 to vector<8x32xf32>
    %770 = arith.select %768, %760, %769 : vector<8x32xi1>, vector<8x32xf32>
    %c40_404 = arith.constant 40 : index
    %c0_405 = arith.constant 0 : index
    %771 = vector.load %arg16[%c40_404, %c0_405] : memref<64x32xf32, #tpu.memory_space<vmem>>, vector<8x32xf32>
    tpu.vector_store %arg16[%c40_404, %c0_405], %770 {strides = array<i32>} : memref<64x32xf32, #tpu.memory_space<vmem>>, vector<8x32xf32>,
    %c24_406 = arith.constant 24 : index
    %c0_407 = arith.constant 0 : index
    %772 = vector.load %arg14[%c24_406, %c0_407] : memref<64x256xf32, #tpu.memory_space<vmem>>, vector<8x128xf32>
    %c32_408 = arith.constant 32 : index
    %c128_409 = arith.constant 128 : index
    %773 = vector.load %arg14[%c32_408, %c128_409] : memref<64x256xf32, #tpu.memory_space<vmem>>, vector<8x128xf32>
    %c0_410 = arith.constant 0 : index
    %c0_411 = arith.constant 0 : index
    %774 = vector.load %arg17[%c0_410, %c0_411] : memref<8x32xf32, #tpu.memory_space<vmem>>, vector<8x32xf32>
    %c0_412 = arith.constant 0 : index
    %c0_413 = arith.constant 0 : index
    %775 = vector.load %arg19[%c0_412, %c0_413] : memref<8x32xf32, #tpu.memory_space<vmem>>, vector<8x32xf32>
    %776 = tpu.concatenate %774, %775 in 1 : vector<8x32xf32>, vector<8x32xf32> -> vector<8x64xf32>
    %cst_414 = arith.constant dense<0.000000e+00> : vector<8x256xf32>
    %777 = tpu.matmul %776, %562, %cst_414 {dimension_numbers = #tpu.dot_dimension_numbers<[1], [0], [0], [1], [0, 0, 1, 1], [], []>} : vector<8x64xf32>, vector<64x256xf32>, vector<8x256xf32> -> vector<8x256xf32>
    %778 = tpu.concatenate %772, %773 in 1 : vector<8x128xf32>, vector<8x128xf32> -> vector<8x256xf32>
    %779 = arith.addf %778, %777 : vector<8x256xf32>
    %780 = arith.negf %779 : vector<8x256xf32>
    %781 = math.exp %780 : vector<8x256xf32>
    %cst_415 = arith.constant 1.000000e+00 : f32
    %782 = vector.broadcast %cst_415 : f32 to vector<8x256xf32>
    %783 = arith.addf %782, %781 : vector<8x256xf32>
    %784 = arith.divf %782, %783 : vector<8x256xf32>
    %785 = vector.extract_strided_slice %784 {offsets = [0, 0], sizes = [8, 32], strides = [1, 1]} : vector<8x256xf32> to vector<8x32xf32>
    %786 = vector.extract_strided_slice %784 {offsets = [0, 32], sizes = [8, 32], strides = [1, 1]} : vector<8x256xf32> to vector<8x32xf32>
    %787 = vector.extract_strided_slice %779 {offsets = [0, 64], sizes = [8, 32], strides = [1, 1]} : vector<8x256xf32> to vector<8x32xf32>
    %788 = math.tanh %787 : vector<8x32xf32>
    %789 = vector.extract_strided_slice %784 {offsets = [0, 96], sizes = [8, 32], strides = [1, 1]} : vector<8x256xf32> to vector<8x32xf32>
    %c0_416 = arith.constant 0 : index
    %c0_417 = arith.constant 0 : index
    %790 = vector.load %arg18[%c0_416, %c0_417] : memref<8x32xf32, #tpu.memory_space<vmem>>, vector<8x32xf32>
    %791 = arith.mulf %786, %790 : vector<8x32xf32>
    %792 = arith.mulf %785, %788 : vector<8x32xf32>
    %793 = arith.addf %791, %792 : vector<8x32xf32>
    %794 = math.tanh %793 : vector<8x32xf32>
    %795 = arith.mulf %789, %794 : vector<8x32xf32>
    %c3_i32_418 = arith.constant 3 : i32
    %796 = vector.broadcast %c3_i32_418 : i32 to vector<8x1xi32>
    %797 = arith.cmpi sgt, %0, %796 : vector<8x1xi32>
    %798 = vector.shape_cast %797 : vector<8x1xi1> to vector<8x1xi1>
    %799 = vector.broadcast %798 : vector<8x1xi1> to vector<8x32xi1>
    %800 = arith.select %799, %795, %774 : vector<8x32xi1>, vector<8x32xf32>
    %c0_419 = arith.constant 0 : index
    %c0_420 = arith.constant 0 : index
    %801 = vector.load %arg18[%c0_419, %c0_420] : memref<8x32xf32, #tpu.memory_space<vmem>>, vector<8x32xf32>
    %802 = vector.shape_cast %797 : vector<8x1xi1> to vector<8x1xi1>
    %803 = vector.broadcast %802 : vector<8x1xi1> to vector<8x32xi1>
    %804 = arith.select %803, %793, %801 : vector<8x32xi1>, vector<8x32xf32>
    %c0_421 = arith.constant 0 : index
    %c0_422 = arith.constant 0 : index
    %805 = vector.load %arg17[%c0_421, %c0_422] : memref<8x32xf32, #tpu.memory_space<vmem>>, vector<8x32xf32>
    tpu.vector_store %arg17[%c0_421, %c0_422], %800 {strides = array<i32>} : memref<8x32xf32, #tpu.memory_space<vmem>>, vector<8x32xf32>,
    %c0_423 = arith.constant 0 : index
    %c0_424 = arith.constant 0 : index
    %806 = vector.load %arg18[%c0_423, %c0_424] : memref<8x32xf32, #tpu.memory_space<vmem>>, vector<8x32xf32>
    tpu.vector_store %arg18[%c0_423, %c0_424], %804 {strides = array<i32>} : memref<8x32xf32, #tpu.memory_space<vmem>>, vector<8x32xf32>,
    %cst_425 = arith.constant 0.000000e+00 : f32
    %807 = vector.shape_cast %797 : vector<8x1xi1> to vector<8x1xi1>
    %808 = vector.broadcast %807 : vector<8x1xi1> to vector<8x32xi1>
    %809 = vector.broadcast %cst_425 : f32 to vector<8x32xf32>
    %810 = arith.select %808, %800, %809 : vector<8x32xi1>, vector<8x32xf32>
    %c24_426 = arith.constant 24 : index
    %c0_427 = arith.constant 0 : index
    %811 = vector.load %arg15[%c24_426, %c0_427] : memref<64x32xf32, #tpu.memory_space<vmem>>, vector<8x32xf32>
    tpu.vector_store %arg15[%c24_426, %c0_427], %810 {strides = array<i32>} : memref<64x32xf32, #tpu.memory_space<vmem>>, vector<8x32xf32>,
    %812 = vector.extract_strided_slice %784 {offsets = [0, 128], sizes = [8, 32], strides = [1, 1]} : vector<8x256xf32> to vector<8x32xf32>
    %813 = vector.extract_strided_slice %784 {offsets = [0, 160], sizes = [8, 32], strides = [1, 1]} : vector<8x256xf32> to vector<8x32xf32>
    %814 = vector.extract_strided_slice %779 {offsets = [0, 192], sizes = [8, 32], strides = [1, 1]} : vector<8x256xf32> to vector<8x32xf32>
    %815 = math.tanh %814 : vector<8x32xf32>
    %816 = vector.extract_strided_slice %784 {offsets = [0, 224], sizes = [8, 32], strides = [1, 1]} : vector<8x256xf32> to vector<8x32xf32>
    %c0_428 = arith.constant 0 : index
    %c0_429 = arith.constant 0 : index
    %817 = vector.load %arg20[%c0_428, %c0_429] : memref<8x32xf32, #tpu.memory_space<vmem>>, vector<8x32xf32>
    %818 = arith.mulf %813, %817 : vector<8x32xf32>
    %819 = arith.mulf %812, %815 : vector<8x32xf32>
    %820 = arith.addf %818, %819 : vector<8x32xf32>
    %821 = math.tanh %820 : vector<8x32xf32>
    %822 = arith.mulf %816, %821 : vector<8x32xf32>
    %c4_i32_430 = arith.constant 4 : i32
    %823 = vector.broadcast %c4_i32_430 : i32 to vector<8x1xi32>
    %824 = arith.cmpi sgt, %0, %823 : vector<8x1xi32>
    %825 = vector.shape_cast %824 : vector<8x1xi1> to vector<8x1xi1>
    %826 = vector.broadcast %825 : vector<8x1xi1> to vector<8x32xi1>
    %827 = arith.select %826, %822, %775 : vector<8x32xi1>, vector<8x32xf32>
    %c0_431 = arith.constant 0 : index
    %c0_432 = arith.constant 0 : index
    %828 = vector.load %arg20[%c0_431, %c0_432] : memref<8x32xf32, #tpu.memory_space<vmem>>, vector<8x32xf32>
    %829 = vector.shape_cast %824 : vector<8x1xi1> to vector<8x1xi1>
    %830 = vector.broadcast %829 : vector<8x1xi1> to vector<8x32xi1>
    %831 = arith.select %830, %820, %828 : vector<8x32xi1>, vector<8x32xf32>
    %c0_433 = arith.constant 0 : index
    %c0_434 = arith.constant 0 : index
    %832 = vector.load %arg19[%c0_433, %c0_434] : memref<8x32xf32, #tpu.memory_space<vmem>>, vector<8x32xf32>
    tpu.vector_store %arg19[%c0_433, %c0_434], %827 {strides = array<i32>} : memref<8x32xf32, #tpu.memory_space<vmem>>, vector<8x32xf32>,
    %c0_435 = arith.constant 0 : index
    %c0_436 = arith.constant 0 : index
    %833 = vector.load %arg20[%c0_435, %c0_436] : memref<8x32xf32, #tpu.memory_space<vmem>>, vector<8x32xf32>
    tpu.vector_store %arg20[%c0_435, %c0_436], %831 {strides = array<i32>} : memref<8x32xf32, #tpu.memory_space<vmem>>, vector<8x32xf32>,
    %cst_437 = arith.constant 0.000000e+00 : f32
    %834 = vector.shape_cast %824 : vector<8x1xi1> to vector<8x1xi1>
    %835 = vector.broadcast %834 : vector<8x1xi1> to vector<8x32xi1>
    %836 = vector.broadcast %cst_437 : f32 to vector<8x32xf32>
    %837 = arith.select %835, %827, %836 : vector<8x32xi1>, vector<8x32xf32>
    %c32_438 = arith.constant 32 : index
    %c0_439 = arith.constant 0 : index
    %838 = vector.load %arg16[%c32_438, %c0_439] : memref<64x32xf32, #tpu.memory_space<vmem>>, vector<8x32xf32>
    tpu.vector_store %arg16[%c32_438, %c0_439], %837 {strides = array<i32>} : memref<64x32xf32, #tpu.memory_space<vmem>>, vector<8x32xf32>,
    %c32_440 = arith.constant 32 : index
    %c0_441 = arith.constant 0 : index
    %839 = vector.load %arg14[%c32_440, %c0_441] : memref<64x256xf32, #tpu.memory_space<vmem>>, vector<8x128xf32>
    %c24_442 = arith.constant 24 : index
    %c128_443 = arith.constant 128 : index
    %840 = vector.load %arg14[%c24_442, %c128_443] : memref<64x256xf32, #tpu.memory_space<vmem>>, vector<8x128xf32>
    %c0_444 = arith.constant 0 : index
    %c0_445 = arith.constant 0 : index
    %841 = vector.load %arg17[%c0_444, %c0_445] : memref<8x32xf32, #tpu.memory_space<vmem>>, vector<8x32xf32>
    %c0_446 = arith.constant 0 : index
    %c0_447 = arith.constant 0 : index
    %842 = vector.load %arg19[%c0_446, %c0_447] : memref<8x32xf32, #tpu.memory_space<vmem>>, vector<8x32xf32>
    %843 = tpu.concatenate %841, %842 in 1 : vector<8x32xf32>, vector<8x32xf32> -> vector<8x64xf32>
    %cst_448 = arith.constant dense<0.000000e+00> : vector<8x256xf32>
    %844 = tpu.matmul %843, %562, %cst_448 {dimension_numbers = #tpu.dot_dimension_numbers<[1], [0], [0], [1], [0, 0, 1, 1], [], []>} : vector<8x64xf32>, vector<64x256xf32>, vector<8x256xf32> -> vector<8x256xf32>
    %845 = tpu.concatenate %839, %840 in 1 : vector<8x128xf32>, vector<8x128xf32> -> vector<8x256xf32>
    %846 = arith.addf %845, %844 : vector<8x256xf32>
    %847 = arith.negf %846 : vector<8x256xf32>
    %848 = math.exp %847 : vector<8x256xf32>
    %cst_449 = arith.constant 1.000000e+00 : f32
    %849 = vector.broadcast %cst_449 : f32 to vector<8x256xf32>
    %850 = arith.addf %849, %848 : vector<8x256xf32>
    %851 = arith.divf %849, %850 : vector<8x256xf32>
    %852 = vector.extract_strided_slice %851 {offsets = [0, 0], sizes = [8, 32], strides = [1, 1]} : vector<8x256xf32> to vector<8x32xf32>
    %853 = vector.extract_strided_slice %851 {offsets = [0, 32], sizes = [8, 32], strides = [1, 1]} : vector<8x256xf32> to vector<8x32xf32>
    %854 = vector.extract_strided_slice %846 {offsets = [0, 64], sizes = [8, 32], strides = [1, 1]} : vector<8x256xf32> to vector<8x32xf32>
    %855 = math.tanh %854 : vector<8x32xf32>
    %856 = vector.extract_strided_slice %851 {offsets = [0, 96], sizes = [8, 32], strides = [1, 1]} : vector<8x256xf32> to vector<8x32xf32>
    %c0_450 = arith.constant 0 : index
    %c0_451 = arith.constant 0 : index
    %857 = vector.load %arg18[%c0_450, %c0_451] : memref<8x32xf32, #tpu.memory_space<vmem>>, vector<8x32xf32>
    %858 = arith.mulf %853, %857 : vector<8x32xf32>
    %859 = arith.mulf %852, %855 : vector<8x32xf32>
    %860 = arith.addf %858, %859 : vector<8x32xf32>
    %861 = math.tanh %860 : vector<8x32xf32>
    %862 = arith.mulf %856, %861 : vector<8x32xf32>
    %c4_i32_452 = arith.constant 4 : i32
    %863 = vector.broadcast %c4_i32_452 : i32 to vector<8x1xi32>
    %864 = arith.cmpi sgt, %0, %863 : vector<8x1xi32>
    %865 = vector.shape_cast %864 : vector<8x1xi1> to vector<8x1xi1>
    %866 = vector.broadcast %865 : vector<8x1xi1> to vector<8x32xi1>
    %867 = arith.select %866, %862, %841 : vector<8x32xi1>, vector<8x32xf32>
    %c0_453 = arith.constant 0 : index
    %c0_454 = arith.constant 0 : index
    %868 = vector.load %arg18[%c0_453, %c0_454] : memref<8x32xf32, #tpu.memory_space<vmem>>, vector<8x32xf32>
    %869 = vector.shape_cast %864 : vector<8x1xi1> to vector<8x1xi1>
    %870 = vector.broadcast %869 : vector<8x1xi1> to vector<8x32xi1>
    %871 = arith.select %870, %860, %868 : vector<8x32xi1>, vector<8x32xf32>
    %c0_455 = arith.constant 0 : index
    %c0_456 = arith.constant 0 : index
    %872 = vector.load %arg17[%c0_455, %c0_456] : memref<8x32xf32, #tpu.memory_space<vmem>>, vector<8x32xf32>
    tpu.vector_store %arg17[%c0_455, %c0_456], %867 {strides = array<i32>} : memref<8x32xf32, #tpu.memory_space<vmem>>, vector<8x32xf32>,
    %c0_457 = arith.constant 0 : index
    %c0_458 = arith.constant 0 : index
    %873 = vector.load %arg18[%c0_457, %c0_458] : memref<8x32xf32, #tpu.memory_space<vmem>>, vector<8x32xf32>
    tpu.vector_store %arg18[%c0_457, %c0_458], %871 {strides = array<i32>} : memref<8x32xf32, #tpu.memory_space<vmem>>, vector<8x32xf32>,
    %cst_459 = arith.constant 0.000000e+00 : f32
    %874 = vector.shape_cast %864 : vector<8x1xi1> to vector<8x1xi1>
    %875 = vector.broadcast %874 : vector<8x1xi1> to vector<8x32xi1>
    %876 = vector.broadcast %cst_459 : f32 to vector<8x32xf32>
    %877 = arith.select %875, %867, %876 : vector<8x32xi1>, vector<8x32xf32>
    %c32_460 = arith.constant 32 : index
    %c0_461 = arith.constant 0 : index
    %878 = vector.load %arg15[%c32_460, %c0_461] : memref<64x32xf32, #tpu.memory_space<vmem>>, vector<8x32xf32>
    tpu.vector_store %arg15[%c32_460, %c0_461], %877 {strides = array<i32>} : memref<64x32xf32, #tpu.memory_space<vmem>>, vector<8x32xf32>,
    %879 = vector.extract_strided_slice %851 {offsets = [0, 128], sizes = [8, 32], strides = [1, 1]} : vector<8x256xf32> to vector<8x32xf32>
    %880 = vector.extract_strided_slice %851 {offsets = [0, 160], sizes = [8, 32], strides = [1, 1]} : vector<8x256xf32> to vector<8x32xf32>
    %881 = vector.extract_strided_slice %846 {offsets = [0, 192], sizes = [8, 32], strides = [1, 1]} : vector<8x256xf32> to vector<8x32xf32>
    %882 = math.tanh %881 : vector<8x32xf32>
    %883 = vector.extract_strided_slice %851 {offsets = [0, 224], sizes = [8, 32], strides = [1, 1]} : vector<8x256xf32> to vector<8x32xf32>
    %c0_462 = arith.constant 0 : index
    %c0_463 = arith.constant 0 : index
    %884 = vector.load %arg20[%c0_462, %c0_463] : memref<8x32xf32, #tpu.memory_space<vmem>>, vector<8x32xf32>
    %885 = arith.mulf %880, %884 : vector<8x32xf32>
    %886 = arith.mulf %879, %882 : vector<8x32xf32>
    %887 = arith.addf %885, %886 : vector<8x32xf32>
    %888 = math.tanh %887 : vector<8x32xf32>
    %889 = arith.mulf %883, %888 : vector<8x32xf32>
    %c3_i32_464 = arith.constant 3 : i32
    %890 = vector.broadcast %c3_i32_464 : i32 to vector<8x1xi32>
    %891 = arith.cmpi sgt, %0, %890 : vector<8x1xi32>
    %892 = vector.shape_cast %891 : vector<8x1xi1> to vector<8x1xi1>
    %893 = vector.broadcast %892 : vector<8x1xi1> to vector<8x32xi1>
    %894 = arith.select %893, %889, %842 : vector<8x32xi1>, vector<8x32xf32>
    %c0_465 = arith.constant 0 : index
    %c0_466 = arith.constant 0 : index
    %895 = vector.load %arg20[%c0_465, %c0_466] : memref<8x32xf32, #tpu.memory_space<vmem>>, vector<8x32xf32>
    %896 = vector.shape_cast %891 : vector<8x1xi1> to vector<8x1xi1>
    %897 = vector.broadcast %896 : vector<8x1xi1> to vector<8x32xi1>
    %898 = arith.select %897, %887, %895 : vector<8x32xi1>, vector<8x32xf32>
    %c0_467 = arith.constant 0 : index
    %c0_468 = arith.constant 0 : index
    %899 = vector.load %arg19[%c0_467, %c0_468] : memref<8x32xf32, #tpu.memory_space<vmem>>, vector<8x32xf32>
    tpu.vector_store %arg19[%c0_467, %c0_468], %894 {strides = array<i32>} : memref<8x32xf32, #tpu.memory_space<vmem>>, vector<8x32xf32>,
    %c0_469 = arith.constant 0 : index
    %c0_470 = arith.constant 0 : index
    %900 = vector.load %arg20[%c0_469, %c0_470] : memref<8x32xf32, #tpu.memory_space<vmem>>, vector<8x32xf32>
    tpu.vector_store %arg20[%c0_469, %c0_470], %898 {strides = array<i32>} : memref<8x32xf32, #tpu.memory_space<vmem>>, vector<8x32xf32>,
    %cst_471 = arith.constant 0.000000e+00 : f32
    %901 = vector.shape_cast %891 : vector<8x1xi1> to vector<8x1xi1>
    %902 = vector.broadcast %901 : vector<8x1xi1> to vector<8x32xi1>
    %903 = vector.broadcast %cst_471 : f32 to vector<8x32xf32>
    %904 = arith.select %902, %894, %903 : vector<8x32xi1>, vector<8x32xf32>
    %c24_472 = arith.constant 24 : index
    %c0_473 = arith.constant 0 : index
    %905 = vector.load %arg16[%c24_472, %c0_473] : memref<64x32xf32, #tpu.memory_space<vmem>>, vector<8x32xf32>
    tpu.vector_store %arg16[%c24_472, %c0_473], %904 {strides = array<i32>} : memref<64x32xf32, #tpu.memory_space<vmem>>, vector<8x32xf32>,
    %c40_474 = arith.constant 40 : index
    %c0_475 = arith.constant 0 : index
    %906 = vector.load %arg14[%c40_474, %c0_475] : memref<64x256xf32, #tpu.memory_space<vmem>>, vector<8x128xf32>
    %c16_476 = arith.constant 16 : index
    %c128_477 = arith.constant 128 : index
    %907 = vector.load %arg14[%c16_476, %c128_477] : memref<64x256xf32, #tpu.memory_space<vmem>>, vector<8x128xf32>
    %c0_478 = arith.constant 0 : index
    %c0_479 = arith.constant 0 : index
    %908 = vector.load %arg17[%c0_478, %c0_479] : memref<8x32xf32, #tpu.memory_space<vmem>>, vector<8x32xf32>
    %c0_480 = arith.constant 0 : index
    %c0_481 = arith.constant 0 : index
    %909 = vector.load %arg19[%c0_480, %c0_481] : memref<8x32xf32, #tpu.memory_space<vmem>>, vector<8x32xf32>
    %910 = tpu.concatenate %908, %909 in 1 : vector<8x32xf32>, vector<8x32xf32> -> vector<8x64xf32>
    %cst_482 = arith.constant dense<0.000000e+00> : vector<8x256xf32>
    %911 = tpu.matmul %910, %562, %cst_482 {dimension_numbers = #tpu.dot_dimension_numbers<[1], [0], [0], [1], [0, 0, 1, 1], [], []>} : vector<8x64xf32>, vector<64x256xf32>, vector<8x256xf32> -> vector<8x256xf32>
    %912 = tpu.concatenate %906, %907 in 1 : vector<8x128xf32>, vector<8x128xf32> -> vector<8x256xf32>
    %913 = arith.addf %912, %911 : vector<8x256xf32>
    %914 = arith.negf %913 : vector<8x256xf32>
    %915 = math.exp %914 : vector<8x256xf32>
    %cst_483 = arith.constant 1.000000e+00 : f32
    %916 = vector.broadcast %cst_483 : f32 to vector<8x256xf32>
    %917 = arith.addf %916, %915 : vector<8x256xf32>
    %918 = arith.divf %916, %917 : vector<8x256xf32>
    %919 = vector.extract_strided_slice %918 {offsets = [0, 0], sizes = [8, 32], strides = [1, 1]} : vector<8x256xf32> to vector<8x32xf32>
    %920 = vector.extract_strided_slice %918 {offsets = [0, 32], sizes = [8, 32], strides = [1, 1]} : vector<8x256xf32> to vector<8x32xf32>
    %921 = vector.extract_strided_slice %913 {offsets = [0, 64], sizes = [8, 32], strides = [1, 1]} : vector<8x256xf32> to vector<8x32xf32>
    %922 = math.tanh %921 : vector<8x32xf32>
    %923 = vector.extract_strided_slice %918 {offsets = [0, 96], sizes = [8, 32], strides = [1, 1]} : vector<8x256xf32> to vector<8x32xf32>
    %c0_484 = arith.constant 0 : index
    %c0_485 = arith.constant 0 : index
    %924 = vector.load %arg18[%c0_484, %c0_485] : memref<8x32xf32, #tpu.memory_space<vmem>>, vector<8x32xf32>
    %925 = arith.mulf %920, %924 : vector<8x32xf32>
    %926 = arith.mulf %919, %922 : vector<8x32xf32>
    %927 = arith.addf %925, %926 : vector<8x32xf32>
    %928 = math.tanh %927 : vector<8x32xf32>
    %929 = arith.mulf %923, %928 : vector<8x32xf32>
    %c5_i32_486 = arith.constant 5 : i32
    %930 = vector.broadcast %c5_i32_486 : i32 to vector<8x1xi32>
    %931 = arith.cmpi sgt, %0, %930 : vector<8x1xi32>
    %932 = vector.shape_cast %931 : vector<8x1xi1> to vector<8x1xi1>
    %933 = vector.broadcast %932 : vector<8x1xi1> to vector<8x32xi1>
    %934 = arith.select %933, %929, %908 : vector<8x32xi1>, vector<8x32xf32>
    %c0_487 = arith.constant 0 : index
    %c0_488 = arith.constant 0 : index
    %935 = vector.load %arg18[%c0_487, %c0_488] : memref<8x32xf32, #tpu.memory_space<vmem>>, vector<8x32xf32>
    %936 = vector.shape_cast %931 : vector<8x1xi1> to vector<8x1xi1>
    %937 = vector.broadcast %936 : vector<8x1xi1> to vector<8x32xi1>
    %938 = arith.select %937, %927, %935 : vector<8x32xi1>, vector<8x32xf32>
    %c0_489 = arith.constant 0 : index
    %c0_490 = arith.constant 0 : index
    %939 = vector.load %arg17[%c0_489, %c0_490] : memref<8x32xf32, #tpu.memory_space<vmem>>, vector<8x32xf32>
    tpu.vector_store %arg17[%c0_489, %c0_490], %934 {strides = array<i32>} : memref<8x32xf32, #tpu.memory_space<vmem>>, vector<8x32xf32>,
    %c0_491 = arith.constant 0 : index
    %c0_492 = arith.constant 0 : index
    %940 = vector.load %arg18[%c0_491, %c0_492] : memref<8x32xf32, #tpu.memory_space<vmem>>, vector<8x32xf32>
    tpu.vector_store %arg18[%c0_491, %c0_492], %938 {strides = array<i32>} : memref<8x32xf32, #tpu.memory_space<vmem>>, vector<8x32xf32>,
    %cst_493 = arith.constant 0.000000e+00 : f32
    %941 = vector.shape_cast %931 : vector<8x1xi1> to vector<8x1xi1>
    %942 = vector.broadcast %941 : vector<8x1xi1> to vector<8x32xi1>
    %943 = vector.broadcast %cst_493 : f32 to vector<8x32xf32>
    %944 = arith.select %942, %934, %943 : vector<8x32xi1>, vector<8x32xf32>
    %c40_494 = arith.constant 40 : index
    %c0_495 = arith.constant 0 : index
    %945 = vector.load %arg15[%c40_494, %c0_495] : memref<64x32xf32, #tpu.memory_space<vmem>>, vector<8x32xf32>
    tpu.vector_store %arg15[%c40_494, %c0_495], %944 {strides = array<i32>} : memref<64x32xf32, #tpu.memory_space<vmem>>, vector<8x32xf32>,
    %946 = vector.extract_strided_slice %918 {offsets = [0, 128], sizes = [8, 32], strides = [1, 1]} : vector<8x256xf32> to vector<8x32xf32>
    %947 = vector.extract_strided_slice %918 {offsets = [0, 160], sizes = [8, 32], strides = [1, 1]} : vector<8x256xf32> to vector<8x32xf32>
    %948 = vector.extract_strided_slice %913 {offsets = [0, 192], sizes = [8, 32], strides = [1, 1]} : vector<8x256xf32> to vector<8x32xf32>
    %949 = math.tanh %948 : vector<8x32xf32>
    %950 = vector.extract_strided_slice %918 {offsets = [0, 224], sizes = [8, 32], strides = [1, 1]} : vector<8x256xf32> to vector<8x32xf32>
    %c0_496 = arith.constant 0 : index
    %c0_497 = arith.constant 0 : index
    %951 = vector.load %arg20[%c0_496, %c0_497] : memref<8x32xf32, #tpu.memory_space<vmem>>, vector<8x32xf32>
    %952 = arith.mulf %947, %951 : vector<8x32xf32>
    %953 = arith.mulf %946, %949 : vector<8x32xf32>
    %954 = arith.addf %952, %953 : vector<8x32xf32>
    %955 = math.tanh %954 : vector<8x32xf32>
    %956 = arith.mulf %950, %955 : vector<8x32xf32>
    %c2_i32_498 = arith.constant 2 : i32
    %957 = vector.broadcast %c2_i32_498 : i32 to vector<8x1xi32>
    %958 = arith.cmpi sgt, %0, %957 : vector<8x1xi32>
    %959 = vector.shape_cast %958 : vector<8x1xi1> to vector<8x1xi1>
    %960 = vector.broadcast %959 : vector<8x1xi1> to vector<8x32xi1>
    %961 = arith.select %960, %956, %909 : vector<8x32xi1>, vector<8x32xf32>
    %c0_499 = arith.constant 0 : index
    %c0_500 = arith.constant 0 : index
    %962 = vector.load %arg20[%c0_499, %c0_500] : memref<8x32xf32, #tpu.memory_space<vmem>>, vector<8x32xf32>
    %963 = vector.shape_cast %958 : vector<8x1xi1> to vector<8x1xi1>
    %964 = vector.broadcast %963 : vector<8x1xi1> to vector<8x32xi1>
    %965 = arith.select %964, %954, %962 : vector<8x32xi1>, vector<8x32xf32>
    %c0_501 = arith.constant 0 : index
    %c0_502 = arith.constant 0 : index
    %966 = vector.load %arg19[%c0_501, %c0_502] : memref<8x32xf32, #tpu.memory_space<vmem>>, vector<8x32xf32>
    tpu.vector_store %arg19[%c0_501, %c0_502], %961 {strides = array<i32>} : memref<8x32xf32, #tpu.memory_space<vmem>>, vector<8x32xf32>,
    %c0_503 = arith.constant 0 : index
    %c0_504 = arith.constant 0 : index
    %967 = vector.load %arg20[%c0_503, %c0_504] : memref<8x32xf32, #tpu.memory_space<vmem>>, vector<8x32xf32>
    tpu.vector_store %arg20[%c0_503, %c0_504], %965 {strides = array<i32>} : memref<8x32xf32, #tpu.memory_space<vmem>>, vector<8x32xf32>,
    %cst_505 = arith.constant 0.000000e+00 : f32
    %968 = vector.shape_cast %958 : vector<8x1xi1> to vector<8x1xi1>
    %969 = vector.broadcast %968 : vector<8x1xi1> to vector<8x32xi1>
    %970 = vector.broadcast %cst_505 : f32 to vector<8x32xf32>
    %971 = arith.select %969, %961, %970 : vector<8x32xi1>, vector<8x32xf32>
    %c16_506 = arith.constant 16 : index
    %c0_507 = arith.constant 0 : index
    %972 = vector.load %arg16[%c16_506, %c0_507] : memref<64x32xf32, #tpu.memory_space<vmem>>, vector<8x32xf32>
    tpu.vector_store %arg16[%c16_506, %c0_507], %971 {strides = array<i32>} : memref<64x32xf32, #tpu.memory_space<vmem>>, vector<8x32xf32>,
    %c48_508 = arith.constant 48 : index
    %c0_509 = arith.constant 0 : index
    %973 = vector.load %arg14[%c48_508, %c0_509] : memref<64x256xf32, #tpu.memory_space<vmem>>, vector<8x128xf32>
    %c8_510 = arith.constant 8 : index
    %c128_511 = arith.constant 128 : index
    %974 = vector.load %arg14[%c8_510, %c128_511] : memref<64x256xf32, #tpu.memory_space<vmem>>, vector<8x128xf32>
    %c0_512 = arith.constant 0 : index
    %c0_513 = arith.constant 0 : index
    %975 = vector.load %arg17[%c0_512, %c0_513] : memref<8x32xf32, #tpu.memory_space<vmem>>, vector<8x32xf32>
    %c0_514 = arith.constant 0 : index
    %c0_515 = arith.constant 0 : index
    %976 = vector.load %arg19[%c0_514, %c0_515] : memref<8x32xf32, #tpu.memory_space<vmem>>, vector<8x32xf32>
    %977 = tpu.concatenate %975, %976 in 1 : vector<8x32xf32>, vector<8x32xf32> -> vector<8x64xf32>
    %cst_516 = arith.constant dense<0.000000e+00> : vector<8x256xf32>
    %978 = tpu.matmul %977, %562, %cst_516 {dimension_numbers = #tpu.dot_dimension_numbers<[1], [0], [0], [1], [0, 0, 1, 1], [], []>} : vector<8x64xf32>, vector<64x256xf32>, vector<8x256xf32> -> vector<8x256xf32>
    %979 = tpu.concatenate %973, %974 in 1 : vector<8x128xf32>, vector<8x128xf32> -> vector<8x256xf32>
    %980 = arith.addf %979, %978 : vector<8x256xf32>
    %981 = arith.negf %980 : vector<8x256xf32>
    %982 = math.exp %981 : vector<8x256xf32>
    %cst_517 = arith.constant 1.000000e+00 : f32
    %983 = vector.broadcast %cst_517 : f32 to vector<8x256xf32>
    %984 = arith.addf %983, %982 : vector<8x256xf32>
    %985 = arith.divf %983, %984 : vector<8x256xf32>
    %986 = vector.extract_strided_slice %985 {offsets = [0, 0], sizes = [8, 32], strides = [1, 1]} : vector<8x256xf32> to vector<8x32xf32>
    %987 = vector.extract_strided_slice %985 {offsets = [0, 32], sizes = [8, 32], strides = [1, 1]} : vector<8x256xf32> to vector<8x32xf32>
    %988 = vector.extract_strided_slice %980 {offsets = [0, 64], sizes = [8, 32], strides = [1, 1]} : vector<8x256xf32> to vector<8x32xf32>
    %989 = math.tanh %988 : vector<8x32xf32>
    %990 = vector.extract_strided_slice %985 {offsets = [0, 96], sizes = [8, 32], strides = [1, 1]} : vector<8x256xf32> to vector<8x32xf32>
    %c0_518 = arith.constant 0 : index
    %c0_519 = arith.constant 0 : index
    %991 = vector.load %arg18[%c0_518, %c0_519] : memref<8x32xf32, #tpu.memory_space<vmem>>, vector<8x32xf32>
    %992 = arith.mulf %987, %991 : vector<8x32xf32>
    %993 = arith.mulf %986, %989 : vector<8x32xf32>
    %994 = arith.addf %992, %993 : vector<8x32xf32>
    %995 = math.tanh %994 : vector<8x32xf32>
    %996 = arith.mulf %990, %995 : vector<8x32xf32>
    %c6_i32_520 = arith.constant 6 : i32
    %997 = vector.broadcast %c6_i32_520 : i32 to vector<8x1xi32>
    %998 = arith.cmpi sgt, %0, %997 : vector<8x1xi32>
    %999 = vector.shape_cast %998 : vector<8x1xi1> to vector<8x1xi1>
    %1000 = vector.broadcast %999 : vector<8x1xi1> to vector<8x32xi1>
    %1001 = arith.select %1000, %996, %975 : vector<8x32xi1>, vector<8x32xf32>
    %c0_521 = arith.constant 0 : index
    %c0_522 = arith.constant 0 : index
    %1002 = vector.load %arg18[%c0_521, %c0_522] : memref<8x32xf32, #tpu.memory_space<vmem>>, vector<8x32xf32>
    %1003 = vector.shape_cast %998 : vector<8x1xi1> to vector<8x1xi1>
    %1004 = vector.broadcast %1003 : vector<8x1xi1> to vector<8x32xi1>
    %1005 = arith.select %1004, %994, %1002 : vector<8x32xi1>, vector<8x32xf32>
    %c0_523 = arith.constant 0 : index
    %c0_524 = arith.constant 0 : index
    %1006 = vector.load %arg17[%c0_523, %c0_524] : memref<8x32xf32, #tpu.memory_space<vmem>>, vector<8x32xf32>
    tpu.vector_store %arg17[%c0_523, %c0_524], %1001 {strides = array<i32>} : memref<8x32xf32, #tpu.memory_space<vmem>>, vector<8x32xf32>,
    %c0_525 = arith.constant 0 : index
    %c0_526 = arith.constant 0 : index
    %1007 = vector.load %arg18[%c0_525, %c0_526] : memref<8x32xf32, #tpu.memory_space<vmem>>, vector<8x32xf32>
    tpu.vector_store %arg18[%c0_525, %c0_526], %1005 {strides = array<i32>} : memref<8x32xf32, #tpu.memory_space<vmem>>, vector<8x32xf32>,
    %cst_527 = arith.constant 0.000000e+00 : f32
    %1008 = vector.shape_cast %998 : vector<8x1xi1> to vector<8x1xi1>
    %1009 = vector.broadcast %1008 : vector<8x1xi1> to vector<8x32xi1>
    %1010 = vector.broadcast %cst_527 : f32 to vector<8x32xf32>
    %1011 = arith.select %1009, %1001, %1010 : vector<8x32xi1>, vector<8x32xf32>
    %c48_528 = arith.constant 48 : index
    %c0_529 = arith.constant 0 : index
    %1012 = vector.load %arg15[%c48_528, %c0_529] : memref<64x32xf32, #tpu.memory_space<vmem>>, vector<8x32xf32>
    tpu.vector_store %arg15[%c48_528, %c0_529], %1011 {strides = array<i32>} : memref<64x32xf32, #tpu.memory_space<vmem>>, vector<8x32xf32>,
    %1013 = vector.extract_strided_slice %985 {offsets = [0, 128], sizes = [8, 32], strides = [1, 1]} : vector<8x256xf32> to vector<8x32xf32>
    %1014 = vector.extract_strided_slice %985 {offsets = [0, 160], sizes = [8, 32], strides = [1, 1]} : vector<8x256xf32> to vector<8x32xf32>
    %1015 = vector.extract_strided_slice %980 {offsets = [0, 192], sizes = [8, 32], strides = [1, 1]} : vector<8x256xf32> to vector<8x32xf32>
    %1016 = math.tanh %1015 : vector<8x32xf32>
    %1017 = vector.extract_strided_slice %985 {offsets = [0, 224], sizes = [8, 32], strides = [1, 1]} : vector<8x256xf32> to vector<8x32xf32>
    %c0_530 = arith.constant 0 : index
    %c0_531 = arith.constant 0 : index
    %1018 = vector.load %arg20[%c0_530, %c0_531] : memref<8x32xf32, #tpu.memory_space<vmem>>, vector<8x32xf32>
    %1019 = arith.mulf %1014, %1018 : vector<8x32xf32>
    %1020 = arith.mulf %1013, %1016 : vector<8x32xf32>
    %1021 = arith.addf %1019, %1020 : vector<8x32xf32>
    %1022 = math.tanh %1021 : vector<8x32xf32>
    %1023 = arith.mulf %1017, %1022 : vector<8x32xf32>
    %c1_i32_532 = arith.constant 1 : i32
    %1024 = vector.broadcast %c1_i32_532 : i32 to vector<8x1xi32>
    %1025 = arith.cmpi sgt, %0, %1024 : vector<8x1xi32>
    %1026 = vector.shape_cast %1025 : vector<8x1xi1> to vector<8x1xi1>
    %1027 = vector.broadcast %1026 : vector<8x1xi1> to vector<8x32xi1>
    %1028 = arith.select %1027, %1023, %976 : vector<8x32xi1>, vector<8x32xf32>
    %c0_533 = arith.constant 0 : index
    %c0_534 = arith.constant 0 : index
    %1029 = vector.load %arg20[%c0_533, %c0_534] : memref<8x32xf32, #tpu.memory_space<vmem>>, vector<8x32xf32>
    %1030 = vector.shape_cast %1025 : vector<8x1xi1> to vector<8x1xi1>
    %1031 = vector.broadcast %1030 : vector<8x1xi1> to vector<8x32xi1>
    %1032 = arith.select %1031, %1021, %1029 : vector<8x32xi1>, vector<8x32xf32>
    %c0_535 = arith.constant 0 : index
    %c0_536 = arith.constant 0 : index
    %1033 = vector.load %arg19[%c0_535, %c0_536] : memref<8x32xf32, #tpu.memory_space<vmem>>, vector<8x32xf32>
    tpu.vector_store %arg19[%c0_535, %c0_536], %1028 {strides = array<i32>} : memref<8x32xf32, #tpu.memory_space<vmem>>, vector<8x32xf32>,
    %c0_537 = arith.constant 0 : index
    %c0_538 = arith.constant 0 : index
    %1034 = vector.load %arg20[%c0_537, %c0_538] : memref<8x32xf32, #tpu.memory_space<vmem>>, vector<8x32xf32>
    tpu.vector_store %arg20[%c0_537, %c0_538], %1032 {strides = array<i32>} : memref<8x32xf32, #tpu.memory_space<vmem>>, vector<8x32xf32>,
    %cst_539 = arith.constant 0.000000e+00 : f32
    %1035 = vector.shape_cast %1025 : vector<8x1xi1> to vector<8x1xi1>
    %1036 = vector.broadcast %1035 : vector<8x1xi1> to vector<8x32xi1>
    %1037 = vector.broadcast %cst_539 : f32 to vector<8x32xf32>
    %1038 = arith.select %1036, %1028, %1037 : vector<8x32xi1>, vector<8x32xf32>
    %c8_540 = arith.constant 8 : index
    %c0_541 = arith.constant 0 : index
    %1039 = vector.load %arg16[%c8_540, %c0_541] : memref<64x32xf32, #tpu.memory_space<vmem>>, vector<8x32xf32>
    tpu.vector_store %arg16[%c8_540, %c0_541], %1038 {strides = array<i32>} : memref<64x32xf32, #tpu.memory_space<vmem>>, vector<8x32xf32>,
    %c56_542 = arith.constant 56 : index
    %c0_543 = arith.constant 0 : index
    %1040 = vector.load %arg14[%c56_542, %c0_543] : memref<64x256xf32, #tpu.memory_space<vmem>>, vector<8x128xf32>
    %c0_544 = arith.constant 0 : index
    %c128_545 = arith.constant 128 : index
    %1041 = vector.load %arg14[%c0_544, %c128_545] : memref<64x256xf32, #tpu.memory_space<vmem>>, vector<8x128xf32>
    %c0_546 = arith.constant 0 : index
    %c0_547 = arith.constant 0 : index
    %1042 = vector.load %arg17[%c0_546, %c0_547] : memref<8x32xf32, #tpu.memory_space<vmem>>, vector<8x32xf32>
    %c0_548 = arith.constant 0 : index
    %c0_549 = arith.constant 0 : index
    %1043 = vector.load %arg19[%c0_548, %c0_549] : memref<8x32xf32, #tpu.memory_space<vmem>>, vector<8x32xf32>
    %1044 = tpu.concatenate %1042, %1043 in 1 : vector<8x32xf32>, vector<8x32xf32> -> vector<8x64xf32>
    %cst_550 = arith.constant dense<0.000000e+00> : vector<8x256xf32>
    %1045 = tpu.matmul %1044, %562, %cst_550 {dimension_numbers = #tpu.dot_dimension_numbers<[1], [0], [0], [1], [0, 0, 1, 1], [], []>} : vector<8x64xf32>, vector<64x256xf32>, vector<8x256xf32> -> vector<8x256xf32>
    %1046 = tpu.concatenate %1040, %1041 in 1 : vector<8x128xf32>, vector<8x128xf32> -> vector<8x256xf32>
    %1047 = arith.addf %1046, %1045 : vector<8x256xf32>
    %1048 = arith.negf %1047 : vector<8x256xf32>
    %1049 = math.exp %1048 : vector<8x256xf32>
    %cst_551 = arith.constant 1.000000e+00 : f32
    %1050 = vector.broadcast %cst_551 : f32 to vector<8x256xf32>
    %1051 = arith.addf %1050, %1049 : vector<8x256xf32>
    %1052 = arith.divf %1050, %1051 : vector<8x256xf32>
    %1053 = vector.extract_strided_slice %1052 {offsets = [0, 0], sizes = [8, 32], strides = [1, 1]} : vector<8x256xf32> to vector<8x32xf32>
    %1054 = vector.extract_strided_slice %1052 {offsets = [0, 32], sizes = [8, 32], strides = [1, 1]} : vector<8x256xf32> to vector<8x32xf32>
    %1055 = vector.extract_strided_slice %1047 {offsets = [0, 64], sizes = [8, 32], strides = [1, 1]} : vector<8x256xf32> to vector<8x32xf32>
    %1056 = math.tanh %1055 : vector<8x32xf32>
    %1057 = vector.extract_strided_slice %1052 {offsets = [0, 96], sizes = [8, 32], strides = [1, 1]} : vector<8x256xf32> to vector<8x32xf32>
    %c0_552 = arith.constant 0 : index
    %c0_553 = arith.constant 0 : index
    %1058 = vector.load %arg18[%c0_552, %c0_553] : memref<8x32xf32, #tpu.memory_space<vmem>>, vector<8x32xf32>
    %1059 = arith.mulf %1054, %1058 : vector<8x32xf32>
    %1060 = arith.mulf %1053, %1056 : vector<8x32xf32>
    %1061 = arith.addf %1059, %1060 : vector<8x32xf32>
    %1062 = math.tanh %1061 : vector<8x32xf32>
    %1063 = arith.mulf %1057, %1062 : vector<8x32xf32>
    %c7_i32_554 = arith.constant 7 : i32
    %1064 = vector.broadcast %c7_i32_554 : i32 to vector<8x1xi32>
    %1065 = arith.cmpi sgt, %0, %1064 : vector<8x1xi32>
    %1066 = vector.shape_cast %1065 : vector<8x1xi1> to vector<8x1xi1>
    %1067 = vector.broadcast %1066 : vector<8x1xi1> to vector<8x32xi1>
    %1068 = arith.select %1067, %1063, %1042 : vector<8x32xi1>, vector<8x32xf32>
    %c0_555 = arith.constant 0 : index
    %c0_556 = arith.constant 0 : index
    %1069 = vector.load %arg18[%c0_555, %c0_556] : memref<8x32xf32, #tpu.memory_space<vmem>>, vector<8x32xf32>
    %1070 = vector.shape_cast %1065 : vector<8x1xi1> to vector<8x1xi1>
    %1071 = vector.broadcast %1070 : vector<8x1xi1> to vector<8x32xi1>
    %1072 = arith.select %1071, %1061, %1069 : vector<8x32xi1>, vector<8x32xf32>
    %c0_557 = arith.constant 0 : index
    %c0_558 = arith.constant 0 : index
    %1073 = vector.load %arg17[%c0_557, %c0_558] : memref<8x32xf32, #tpu.memory_space<vmem>>, vector<8x32xf32>
    tpu.vector_store %arg17[%c0_557, %c0_558], %1068 {strides = array<i32>} : memref<8x32xf32, #tpu.memory_space<vmem>>, vector<8x32xf32>,
    %c0_559 = arith.constant 0 : index
    %c0_560 = arith.constant 0 : index
    %1074 = vector.load %arg18[%c0_559, %c0_560] : memref<8x32xf32, #tpu.memory_space<vmem>>, vector<8x32xf32>
    tpu.vector_store %arg18[%c0_559, %c0_560], %1072 {strides = array<i32>} : memref<8x32xf32, #tpu.memory_space<vmem>>, vector<8x32xf32>,
    %cst_561 = arith.constant 0.000000e+00 : f32
    %1075 = vector.shape_cast %1065 : vector<8x1xi1> to vector<8x1xi1>
    %1076 = vector.broadcast %1075 : vector<8x1xi1> to vector<8x32xi1>
    %1077 = vector.broadcast %cst_561 : f32 to vector<8x32xf32>
    %1078 = arith.select %1076, %1068, %1077 : vector<8x32xi1>, vector<8x32xf32>
    %c56_562 = arith.constant 56 : index
    %c0_563 = arith.constant 0 : index
    %1079 = vector.load %arg15[%c56_562, %c0_563] : memref<64x32xf32, #tpu.memory_space<vmem>>, vector<8x32xf32>
    tpu.vector_store %arg15[%c56_562, %c0_563], %1078 {strides = array<i32>} : memref<64x32xf32, #tpu.memory_space<vmem>>, vector<8x32xf32>,
    %1080 = vector.extract_strided_slice %1052 {offsets = [0, 128], sizes = [8, 32], strides = [1, 1]} : vector<8x256xf32> to vector<8x32xf32>
    %1081 = vector.extract_strided_slice %1052 {offsets = [0, 160], sizes = [8, 32], strides = [1, 1]} : vector<8x256xf32> to vector<8x32xf32>
    %1082 = vector.extract_strided_slice %1047 {offsets = [0, 192], sizes = [8, 32], strides = [1, 1]} : vector<8x256xf32> to vector<8x32xf32>
    %1083 = math.tanh %1082 : vector<8x32xf32>
    %1084 = vector.extract_strided_slice %1052 {offsets = [0, 224], sizes = [8, 32], strides = [1, 1]} : vector<8x256xf32> to vector<8x32xf32>
    %c0_564 = arith.constant 0 : index
    %c0_565 = arith.constant 0 : index
    %1085 = vector.load %arg20[%c0_564, %c0_565] : memref<8x32xf32, #tpu.memory_space<vmem>>, vector<8x32xf32>
    %1086 = arith.mulf %1081, %1085 : vector<8x32xf32>
    %1087 = arith.mulf %1080, %1083 : vector<8x32xf32>
    %1088 = arith.addf %1086, %1087 : vector<8x32xf32>
    %1089 = math.tanh %1088 : vector<8x32xf32>
    %1090 = arith.mulf %1084, %1089 : vector<8x32xf32>
    %c0_i32_566 = arith.constant 0 : i32
    %1091 = vector.broadcast %c0_i32_566 : i32 to vector<8x1xi32>
    %1092 = arith.cmpi sgt, %0, %1091 : vector<8x1xi32>
    %1093 = vector.shape_cast %1092 : vector<8x1xi1> to vector<8x1xi1>
    %1094 = vector.broadcast %1093 : vector<8x1xi1> to vector<8x32xi1>
    %1095 = arith.select %1094, %1090, %1043 : vector<8x32xi1>, vector<8x32xf32>
    %c0_567 = arith.constant 0 : index
    %c0_568 = arith.constant 0 : index
    %1096 = vector.load %arg20[%c0_567, %c0_568] : memref<8x32xf32, #tpu.memory_space<vmem>>, vector<8x32xf32>
    %1097 = vector.shape_cast %1092 : vector<8x1xi1> to vector<8x1xi1>
    %1098 = vector.broadcast %1097 : vector<8x1xi1> to vector<8x32xi1>
    %1099 = arith.select %1098, %1088, %1096 : vector<8x32xi1>, vector<8x32xf32>
    %c0_569 = arith.constant 0 : index
    %c0_570 = arith.constant 0 : index
    %1100 = vector.load %arg19[%c0_569, %c0_570] : memref<8x32xf32, #tpu.memory_space<vmem>>, vector<8x32xf32>
    tpu.vector_store %arg19[%c0_569, %c0_570], %1095 {strides = array<i32>} : memref<8x32xf32, #tpu.memory_space<vmem>>, vector<8x32xf32>,
    %c0_571 = arith.constant 0 : index
    %c0_572 = arith.constant 0 : index
    %1101 = vector.load %arg20[%c0_571, %c0_572] : memref<8x32xf32, #tpu.memory_space<vmem>>, vector<8x32xf32>
    tpu.vector_store %arg20[%c0_571, %c0_572], %1099 {strides = array<i32>} : memref<8x32xf32, #tpu.memory_space<vmem>>, vector<8x32xf32>,
    %cst_573 = arith.constant 0.000000e+00 : f32
    %1102 = vector.shape_cast %1092 : vector<8x1xi1> to vector<8x1xi1>
    %1103 = vector.broadcast %1102 : vector<8x1xi1> to vector<8x32xi1>
    %1104 = vector.broadcast %cst_573 : f32 to vector<8x32xf32>
    %1105 = arith.select %1103, %1095, %1104 : vector<8x32xi1>, vector<8x32xf32>
    %c0_574 = arith.constant 0 : index
    %c0_575 = arith.constant 0 : index
    %1106 = vector.load %arg16[%c0_574, %c0_575] : memref<64x32xf32, #tpu.memory_space<vmem>>, vector<8x32xf32>
    tpu.vector_store %arg16[%c0_574, %c0_575], %1105 {strides = array<i32>} : memref<64x32xf32, #tpu.memory_space<vmem>>, vector<8x32xf32>,
    %c0_576 = arith.constant 0 : index
    %c0_577 = arith.constant 0 : index
    %1107 = vector.load %arg15[%c0_576, %c0_577] : memref<64x32xf32, #tpu.memory_space<vmem>>, vector<64x32xf32>
    %c0_578 = arith.constant 0 : index
    %c0_579 = arith.constant 0 : index
    %1108 = vector.load %arg16[%c0_578, %c0_579] : memref<64x32xf32, #tpu.memory_space<vmem>>, vector<64x32xf32>
    %1109 = tpu.concatenate %1107, %1108 in 1 : vector<64x32xf32>, vector<64x32xf32> -> vector<64x64xf32>
    %c0_580 = arith.constant 0 : index
    %c0_581 = arith.constant 0 : index
    %1110 = vector.load %arg8[%c0_580, %c0_581] : memref<64x128xf32, #tpu.memory_space<vmem>>, vector<64x128xf32>
    %cst_582 = arith.constant dense<0.000000e+00> : vector<64x128xf32>
    %1111 = tpu.matmul %1109, %1110, %cst_582 {dimension_numbers = #tpu.dot_dimension_numbers<[1], [0], [0], [1], [0, 0, 1, 1], [], []>} : vector<64x64xf32>, vector<64x128xf32>, vector<64x128xf32> -> vector<64x128xf32>
    %c0_583 = arith.constant 0 : index
    %c0_584 = arith.constant 0 : index
    %1112 = vector.load %arg9[%c0_583, %c0_584] : memref<1x128xf32, #tpu.memory_space<vmem>>, vector<1x128xf32>
    %1113 = vector.broadcast %1112 : vector<1x128xf32> to vector<64x128xf32>
    %1114 = arith.addf %1111, %1113 : vector<64x128xf32>
    %c0_585 = arith.constant 0 : index
    %c0_586 = arith.constant 0 : index
    %1115 = vector.load %arg12[%c0_585, %c0_586] : memref<64x128xf32, #tpu.memory_space<vmem>>, vector<64x128xf32>
    tpu.vector_store %arg12[%c0_585, %c0_586], %1114 {strides = array<i32>} : memref<64x128xf32, #tpu.memory_space<vmem>>, vector<64x128xf32>,
    %c0_587 = arith.constant 0 : index
    %c0_588 = arith.constant 0 : index
    %1116 = vector.load %arg19[%c0_587, %c0_588] : memref<8x32xf32, #tpu.memory_space<vmem>>, vector<8x32xf32>
    %c0_589 = arith.constant 0 : index
    %c0_590 = arith.constant 0 : index
    %1117 = vector.load %arg17[%c0_589, %c0_590] : memref<8x32xf32, #tpu.memory_space<vmem>>, vector<8x32xf32>
    %1118 = tpu.concatenate %1116, %1117 in 1 : vector<8x32xf32>, vector<8x32xf32> -> vector<8x64xf32>
    %c0_591 = arith.constant 0 : index
    %c0_592 = arith.constant 0 : index
    %1119 = vector.load %arg10[%c0_591, %c0_592] : memref<64x128xf32, #tpu.memory_space<vmem>>, vector<64x128xf32>
    %cst_593 = arith.constant dense<0.000000e+00> : vector<8x128xf32>
    %1120 = tpu.matmul %1118, %1119, %cst_593 {dimension_numbers = #tpu.dot_dimension_numbers<[1], [0], [0], [1], [0, 0, 1, 1], [], []>} : vector<8x64xf32>, vector<64x128xf32>, vector<8x128xf32> -> vector<8x128xf32>
    %c0_594 = arith.constant 0 : index
    %c0_595 = arith.constant 0 : index
    %1121 = vector.load %arg11[%c0_594, %c0_595] : memref<1x128xf32, #tpu.memory_space<vmem>>, vector<1x128xf32>
    %1122 = vector.broadcast %1121 : vector<1x128xf32> to vector<8x128xf32>
    %1123 = arith.addf %1120, %1122 : vector<8x128xf32>
    %c0_596 = arith.constant 0 : index
    %c0_597 = arith.constant 0 : index
    %1124 = vector.load %arg13[%c0_596, %c0_597] : memref<8x128xf32, #tpu.memory_space<vmem>>, vector<8x128xf32>
    tpu.vector_store %arg13[%c0_596, %c0_597], %1123 {strides = array<i32>} : memref<8x128xf32, #tpu.memory_space<vmem>>, vector<8x128xf32>,
    return
  }
}

</mosaic_0001>

<bundles_post_ra>
// kernel: nersa_forward.1
= control target key start
LH: loop header
LB: loop body
LE: loop exit
PB: predicated region body
PF: predicated region fallthrough
CT: control target
= control target key end

     0   :  { %19 = vsyncpa [#allocation10], 0  ;;  %s6161_s0 = inlined_call_operand.vmem [shape: f32[64,32], index: 0, kind: input, shape index: {}]   ;;  %s6162_s1 = inlined_call_operand.vmem [shape: s32[8,1], index: 1, kind: input, shape index: {}]   ;;  %s6163_s2 = inlined_call_operand.hbm [shape: f32[32,256], index: 2, kind: input, shape index: {}]   ;;  %s6164_s3 = inlined_call_operand.vmem [shape: f32[64,256], index: 3, kind: input, shape index: {}]   ;;  %s6165_s4 = inlined_call_operand.vmem [shape: f32[1,256], index: 4, kind: input, shape index: {}]   ;;  %s6166_s5 = inlined_call_operand.vmem [shape: f32[64,256], index: 5, kind: input, shape index: {}]   ;;  %s6167_s6 = inlined_call_operand.hbm [shape: f32[64,256], index: 6, kind: input, shape index: {}]   ;;  %s6168_s7 = inlined_call_operand.vmem [shape: f32[1,256], index: 7, kind: input, shape index: {}]   ;;  %s6169_s8 = inlined_call_operand.hbm [shape: f32[64,128], index: 8, kind: input, shape index: {}]   ;;  %s6170_s9 = inlined_call_operand.vmem [shape: f32[1,128], index: 9, kind: input, shape index: {}]   ;;  %s6171_s10 = inlined_call_operand.hbm [shape: f32[64,128], index: 10, kind: input, shape index: {}]   ;;  %s6172_s11 = inlined_call_operand.vmem [shape: f32[1,128], index: 11, kind: input, shape index: {}]   ;;  %s6173_s12 = inlined_call_operand.vmem [shape: f32[64,128], index: 12, kind: output, shape index: {0}]   ;;  %s6174_s13 = inlined_call_operand.vmem [shape: f32[8,128], index: 13, kind: output, shape index: {1}]  }
   0x1   :  { %20 = vsyncpa [#allocation12], 0 }
   0x2   :  { %21 = vsyncpa [#allocation15], 0  ;;  %s4433_s25 = smov [#allocation11]   ;;  %s4434_s27 = smov [#allocation9]  }
   0x3   :  { %s49_s26 = sshll.u32 %s4433_s25, 4  ;;  %s31_s28 = sshll.u32 %s4434_s27, 4  ;;  %s50_s26 = int_to_ptr.vmem [resolvable:$true] %s49_s26  ;;  %s32_s28 = int_to_ptr.vmem [resolvable:$true] %s31_s28 }
   0x4   :  { %s4355_s29 = scalar_lea.vmem %s50_s26, 2048  ;;  %p4360_p1 = scmp.lt.s32.totalorder %s50_s26, %s50_s26 }
   0x5   :  { %p4356_p0 = scmp.ne.s32.totalorder %s50_s26, %s4355_s29  ;;  %p4361_p2 = scmp.lt.s32.totalorder %s4355_s29, %s4355_s29 }
   0x7   :  { %p4362_p3 = por %p4361_p2, %p4360_p1 }
   0x9   :  { %p4363_p4 = pnand %p4362_p3, %p4356_p0 }
   0xb   :  { %4366 = shalt.err (!%p4363_p4)
}
   0xc   :  { %s4435_s30 = smov 256   ;;  %s4436_s14 = smov 16  }
   0xd   :  { %55 = dma.hbm_to_vmem [thread:$0]  %s6167_s6, 2048, %s50_s26, [#allocation12], %s4435_s30, %s4435_s30, %s4436_s14  }
   0xe   :  { %s4375_s17 = scalar_lea.vmem %s32_s28, 1024  ;;  %p4380_p6 = scmp.lt.s32.totalorder %s32_s28, %s32_s28 }
   0xf   :  { %p4376_p5 = scmp.ne.s32.totalorder %s32_s28, %s4375_s17  ;;  %p4381_p7 = scmp.lt.s32.totalorder %s4375_s17, %s4375_s17 }
  0x11   :  { %p4382_p8 = por %p4381_p7, %p4380_p6 }
  0x13   :  { %p4383_p9 = pnand %p4382_p8, %p4376_p5 }
  0x15   :  { %4386 = shalt.err (!%p4383_p9)
}
  0x16   :  { %37 = dma.hbm_to_vmem [thread:$0]  %s6163_s2, 1024, %s32_s28, [#allocation10], %s4435_s30, %s4435_s30, %s4436_s14  }
  0x17   :  { %s4437_s20 = smov [#allocation13]  }
  0x18   :  { %s63_s21 = sshll.u32 %s4437_s20, 4  ;;  %s64_s21 = int_to_ptr.vmem [resolvable:$true] %s63_s21 }
  0x19   :  { %s4395_s22 = scalar_lea.vmem %s64_s21, 1024  ;;  %p4400_p11 = scmp.lt.s32.totalorder %s64_s21, %s64_s21 }
  0x1a   :  { %p4396_p10 = scmp.ne.s32.totalorder %s64_s21, %s4395_s22  ;;  %p4401_p12 = scmp.lt.s32.totalorder %s4395_s22, %s4395_s22 }
  0x1c   :  { %p4402_p13 = por %p4401_p12, %p4400_p11 }
  0x1e   :  { %p4403_p0 = pnand %p4402_p13, %p4396_p10 }
  0x20   :  { %4406 = shalt.err (!%p4403_p0)
}
  0x21   :  { %s4438_s6 = smov 128   ;;  %s4439_s23 = smov 8  }
  0x22   :  { %69 = dma.hbm_to_vmem [thread:$0]  %s6169_s8, 1024, %s64_s21, [#allocation12], %s4438_s6, %s4438_s6, %s4439_s23  }
  0x23   :  { %s4440_s26 = smov [#allocation14]  }
  0x24   :  { %s77_s27 = sshll.u32 %s4440_s26, 4  ;;  %s78_s27 = int_to_ptr.vmem [resolvable:$true] %s77_s27 }
  0x25   :  { %s4415_s2 = scalar_lea.vmem %s78_s27, 1024  ;;  %p4420_p2 = scmp.lt.s32.totalorder %s78_s27, %s78_s27 }
  0x26   :  { %p4416_p1 = scmp.ne.s32.totalorder %s78_s27, %s4415_s2  ;;  %p4421_p3 = scmp.lt.s32.totalorder %s4415_s2, %s4415_s2 }
  0x28   :  { %p4422_p4 = por %p4421_p3, %p4420_p2 }
  0x2a   :  { %p4423_p5 = pnand %p4422_p4, %p4416_p1 }
  0x2c   :  { %4426 = shalt.err (!%p4423_p5)
}
  0x2d   :  { %83 = dma.hbm_to_vmem [thread:$0]  %s6171_s10, 1024, %s78_s27, [#allocation15], %s4438_s6, %s4438_s6, %s4439_s23  }
  0x2e   :  { %4427 = dma.done.wait [#allocation10], 1024  }
  0x2f   :  { %4428 = vsyncadd [#allocation10], 4294966272 }
  0x30   :  { %4429 = dma.done.wait [#allocation12], 3072  }
  0x31   :  { %4430 = vsyncadd [#allocation12], 4294964224 }
  0x32   :  { %4431 = dma.done.wait [#allocation15], 1024  }
  0x33   :  { %4432 = vsyncadd [#allocation15], 4294966272  ;;  %vm127_vm0 = vcmask 261120   ;;  %v4441_v0 = vmov 0.0   ;;  %v114_v1 = vld [vmem:[#allocation9 + $0x38] sm:$0xff]  ;;  %v113_v2 = vld [vmem:[#allocation9 + $0x30] sm:$0xff]  ;;  %v117_v37 = vlaneseq }
  0x34   :  { %299 = vst.msk [vmem:[#allocation7] sm:$0xff] %vm127_vm0, %v4441_v0  ;;  %297 = vst.msk [vmem:[#allocation5] sm:$0xff] %vm127_vm0, %v4441_v0  ;;  %216 = vmatprep.mubr.f32.mxu0 %v4441_v0  ;;  %378 = vmatprep.mubr.f32.mxu1 %v4441_v0  ;;  %v112_v3 = vld [vmem:[#allocation9 + $0x28] sm:$0xff]  ;;  %v111_v5 = vld [vmem:[#allocation9 + $0x20] sm:$0xff]  ;;  %s4442_s8 = smov 32   ;;  %vm310_vm1 = vcmask 523264  }
  0x35   :  { %298 = vst.msk [vmem:[#allocation6] sm:$0xff] %vm127_vm0, %v4441_v0  ;;  %300 = vst.msk [vmem:[#allocation8] sm:$0xff] %vm127_vm0, %v4441_v0  ;;  %176 = vmatprep.subr.mxu0 %v114_v1  ;;  %v110_v6 = vld [vmem:[#allocation9 + $0x18] sm:$0xff]  ;;  %v109_v7 = vld [vmem:[#allocation9 + $0x10] sm:$0xff]  ;;  %v4719_v38 = vshrl.u32 %v117_v37, 7  ;;  %v4443_v51 = vmov 0  }
  0x36   :  { %177 = vmatpush1.msra.mxu0 %v113_v2  ;;  %v108_v8 = vld [vmem:[#allocation9 + $0x8] sm:$0xff]  ;;  %v107_v9 = vld [vmem:[#allocation9] sm:$0xff]  ;;  %v4546_v10 = vld [vmem:[%s6164_s3 + $0x78] sm:$0xff]  ;;  %4059 = vset.pattern.permute.xlu1 %v4443_v51 }
  0x37   :  { %178 = vmatprep.subr.mxu0 %v112_v3  ;;  %330 = vmatprep.subr.mxu1 %v4546_v10  ;;  %v4552_v11 = vld [vmem:[%s6164_s3 + $0x70] sm:$0xff]  ;;  %v4557_v12 = vld [vmem:[%s6164_s3 + $0x68] sm:$0xff]  ;;  %v4562_v13 = vld [vmem:[%s6164_s3 + $0x60] sm:$0xff]  ;;  %v123_v39 = vsub.s32 1, %v4719_v38  ;;  %v119_v41 = vsub.s32 0, %v4719_v38 }
  0x38   :  { %179 = vmatpush1.msra.mxu0 %v111_v5  ;;  %v99_v14 = vld [vmem:[%s6161_s0] sm:$0xff]  ;;  %331 = vmatpush1.msra.mxu1 %v4552_v11  ;;  %v4571_v15 = vld [vmem:[%s6164_s3 + $0x58] sm:$0xff]  ;;  %v4577_v16 = vld [vmem:[%s6164_s3 + $0x50] sm:$0xff] }
  0x39   :  { %180 = vmatprep.subr.mxu0 %v110_v6  ;;  %332 = vmatprep.subr.mxu1 %v4557_v12  ;;  %v4583_v17 = vld [vmem:[%s6164_s3 + $0x48] sm:$0xff]  ;;  %v4590_v18 = vld [vmem:[%s6164_s3 + $0x40] sm:$0xff]  ;;  %v4600_v20 = vld [vmem:[%s6164_s3 + $0x38] sm:$0xff] }
  0x3a   :  { %181 = vmatpush1.msra.mxu0 %v109_v7  ;;  %333 = vmatpush1.msra.mxu1 %v4562_v13  ;;  %v100_v19 = vld [vmem:[%s6161_s0 + $0x8] sm:$0xff]  ;;  %v4606_v21 = vld [vmem:[%s6164_s3 + $0x30] sm:$0xff]  ;;  %v4621_v23 = vld [vmem:[%s6164_s3 + $0x20] sm:$0xff] }
  0x3b   :  { %v4539_v4 = vld [vmem:[#allocation7] sm:$0xff]  ;;  %182 = vmatprep.subr.mxu0 %v108_v8  ;;  %334 = vmatprep.subr.mxu1 %v4571_v15  ;;  %v4613_v22 = vld [vmem:[%s6164_s3 + $0x28] sm:$0xff]  ;;  %v4631_v25 = vld [vmem:[%s6164_s3 + $0x18] sm:$0xff] }
  0x3c   :  { %306 = vrot.lane.b32.xlu0 %v4539_v4, %s4442_s8  ;;  %183 = vmatpush1.msra.mxu0 %v107_v9  ;;  %v101_v24 = vld [vmem:[%s6161_s0 + $0x10] sm:$0xff]  ;;  %v4644_v27 = vld [vmem:[%s6164_s3 + $0x8] sm:$0xff]  ;;  %v4652_v28 = vld [vmem:[%s6164_s3] sm:$0xff] }
  0x3d   :  { %3898 = vmatmul.mubr.msk.f32.vlgmr.msra.gmra.mxu0 %vm127_vm0, %v99_v14  ;;  %335 = vmatpush1.msra.mxu1 %v4577_v16  ;;  %v4637_v26 = vld [vmem:[%s6164_s3 + $0x10] sm:$0xff]  ;;  %v102_v29 = vld [vmem:[%s6161_s0 + $0x18] sm:$0xff]  ;;  %v103_v30 = vld [vmem:[%s6161_s0 + $0x20] sm:$0xff] }
  0x3e   :  { %222 = vmatprep.mubr.f32.mxu0 %v4441_v0  ;;  %336 = vmatprep.subr.mxu1 %v4583_v17  ;;  %v104_v31 = vld [vmem:[%s6161_s0 + $0x28] sm:$0xff]  ;;  %v105_v32 = vld [vmem:[%s6161_s0 + $0x30] sm:$0xff]  ;;  %v106_v33 = vld [vmem:[%s6161_s0 + $0x38] sm:$0xff] }
  0x3f   :  { %726 = vmatprep.subr.mxu0 %v4546_v10  ;;  %337 = vmatpush1.msra.mxu1 %v4590_v18  ;;  %v4697_v34 = vld [vmem:[#allocation5] sm:$0xff]  ;;  %v451_v37 = vld [vmem:[#allocation8] sm:$0xff] }
  0x40   :  { %727 = vmatpush1.msra.mxu0 %v4552_v11  ;;  %338 = vmatprep.subr.mxu1 %v4600_v20  ;;  %v115_v40 = vld [vmem:[%s6165_s4] sm:$0x3]  ;;  %s4444_s4 = smov 64  }
  0x41   :  { %3899 = vmatmul.mubr.msk.f32.gmra.mxu0 %vm127_vm0, %v100_v19  ;;  %339 = vmatpush1.msra.mxu1 %v4606_v21  ;;  %v124_v42 = vrot.slane %v115_v40, %v123_v39  ;;  %v120_v45 = vrot.slane %v115_v40, %v119_v41 }
  0x42   :  { %228 = vmatprep.mubr.f32.mxu0 %v4441_v0  ;;  %340 = vmatprep.subr.mxu1 %v4613_v22 }
  0x43   :  { %728 = vmatprep.subr.mxu0 %v4557_v12  ;;  %341 = vmatpush1.msra.mxu1 %v4621_v23 }
  0x44   :  { %729 = vmatpush1.msra.mxu0 %v4562_v13  ;;  %342 = vmatprep.subr.mxu1 %v4631_v25 }
  0x45   :  { %3900 = vmatmul.mubr.msk.f32.gmra.mxu0 %vm127_vm0, %v101_v24  ;;  %343 = vmatpush1.msra.mxu1 %v4637_v26 }
  0x46   :  { %234 = vmatprep.mubr.f32.mxu0 %v4441_v0  ;;  %344 = vmatprep.subr.mxu1 %v4644_v27 }
  0x47   :  { %730 = vmatprep.subr.mxu0 %v4571_v15  ;;  %345 = vmatpush1.msra.mxu1 %v4652_v28 }
  0x48   :  { %731 = vmatpush1.msra.mxu0 %v4577_v16  ;;  %528 = vmatprep.subr.mxu1 %v4546_v10 }
  0x49   :  { %3901 = vmatmul.mubr.msk.f32.gmra.mxu0 %vm127_vm0, %v102_v29  ;;  %732 = vmatprep.subr.mxu0 %v4583_v17 }
  0x4a   :  { %240 = vmatprep.mubr.f32.mxu0 %v4441_v0  ;;  %733 = vmatpush1.msra.mxu0 %v4590_v18 }
  0x4b   :  { %734 = vmatprep.subr.mxu0 %v4600_v20  ;;  %4060 = vset.pattern.permute.xlu0 %v4443_v51 }
  0x4c   :  { %735 = vmatpush1.msra.mxu0 %v4606_v21 }
  0x4d   :  { %3902 = vmatmul.mubr.msk.f32.gmra.mxu0 %vm127_vm0, %v103_v30  ;;  %736 = vmatprep.subr.mxu0 %v4613_v22 }
  0x4e   :  { %246 = vmatprep.mubr.f32.mxu0 %v4441_v0  ;;  %737 = vmatpush1.msra.mxu0 %v4621_v23 }
  0x4f   :  { %738 = vmatprep.subr.mxu0 %v4631_v25 }
  0x50   :  { %739 = vmatpush1.msra.mxu0 %v4637_v26 }
  0x51   :  { %3903 = vmatmul.mubr.msk.f32.gmra.mxu0 %vm127_vm0, %v104_v31  ;;  %740 = vmatprep.subr.mxu0 %v4644_v27 }
  0x52   :  { %252 = vmatprep.mubr.f32.mxu0 %v4441_v0  ;;  %741 = vmatpush1.msra.mxu0 %v4652_v28 }
  0x53   :  { %1122 = vmatprep.subr.mxu0 %v4546_v10 }
  0x55   :  { %3904 = vmatmul.mubr.msk.f32.gmra.mxu0 %vm127_vm0, %v105_v32 }
  0x56   :  { %258 = vmatprep.mubr.f32.mxu0 %v4441_v0 }
  0x59   :  { %3905 = vmatmul.mubr.msk.f32.gmra.mxu0 %vm127_vm0, %v106_v33 }
  0x5a   :  { %774 = vmatprep.mubr.f32.mxu0 %v4441_v0 }
  0xae   :  { %v307_v35 = vpop.permute.xlu0 %306 }
  0xaf   :  { %v309_v36 = vsel %vm127_vm0, %v4697_v34, %v307_v35 }
  0xb0   :  { %3906 = vmatmul.mubr.msk.f32.vlgmr.msra.gmra.mxu1 %vm310_vm1, %v309_v36 }
  0xb1   :  { %529 = vmatpush1.msra.mxu1 %v4552_v11  ;;  %576 = vmatprep.mubr.f32.mxu1 %v4441_v0 }
  0xb2   :  { %530 = vmatprep.subr.mxu1 %v4557_v12 }
  0xb3   :  { %531 = vmatpush1.msra.mxu1 %v4562_v13 }
  0xb4   :  { %532 = vmatprep.subr.mxu1 %v4571_v15 }
  0xb5   :  { %533 = vmatpush1.msra.mxu1 %v4577_v16 }
  0xb6   :  { %534 = vmatprep.subr.mxu1 %v4583_v17 }
  0xb7   :  { %535 = vmatpush1.msra.mxu1 %v4590_v18 }
  0xb8   :  { %536 = vmatprep.subr.mxu1 %v4600_v20 }
  0xb9   :  { %537 = vmatpush1.msra.mxu1 %v4606_v21 }
  0xba   :  { %538 = vmatprep.subr.mxu1 %v4613_v22 }
  0xbb   :  { %539 = vmatpush1.msra.mxu1 %v4621_v23 }
  0xbc   :  { %540 = vmatprep.subr.mxu1 %v4631_v25 }
  0xbd   :  { %541 = vmatpush1.msra.mxu1 %v4637_v26 }
  0xbe   :  { %542 = vmatprep.subr.mxu1 %v4644_v27 }
  0xbf   :  { %543 = vmatpush1.msra.mxu1 %v4652_v28 }
  0xc0   :  { %924 = vmatprep.subr.mxu1 %v4546_v10 }
  0xfd   :  { %v218_v43 = vpop.f32.mrf.mxu0 }
  0xfe   :  { %v219_v29 = vadd.f32 %v218_v43, %v120_v45 }
  0xff   :  { %v220_v44 = vpop.f32.mrf.mxu0 }
 0x100   :  { %v4730_v46 = vadd.f32 %v220_v44, %v124_v42  ;;  %v4765_v44 = vld [vmem:[%s6162_s1] sm:$0xff]  ;;  %s4445_s1 = smov 96  }
 0x101   :  { %v224_v47 = vpop.f32.mrf.mxu0  ;;  %vm473_vm2 = vcmp.gt.s32.totalorder %v4765_v44, 7  ;;  %vm422_vm3 = vcmp.gt.s32.totalorder %v4765_v44, 0  ;;  %vm671_vm6 = vcmp.gt.s32.totalorder %v4765_v44, 6  ;;  %vm620_vm7 = vcmp.gt.s32.totalorder %v4765_v44, 1 }
 0x102   :  { %v4732_v48 = vadd.f32 %v224_v47, %v120_v45  ;;  %v474_v43 = vsel %vm473_vm2, 1, %v4443_v51  ;;  %vm869_vm10 = vcmp.gt.s32.totalorder %v4765_v44, 5  ;;  %vm818_vm11 = vcmp.gt.s32.totalorder %v4765_v44, 2 }
 0x103   :  { %v226_v49 = vpop.f32.mrf.mxu0  ;;  %vm1067_vm14 = vcmp.gt.s32.totalorder %v4765_v44, 4  ;;  %vm1016_vm15 = vcmp.gt.s32.totalorder %v4765_v44, 3 }
 0x104   :  { %v4734_v50 = vadd.f32 %v226_v49, %v124_v42 }
 0x105   :  { %v230_v52 = vpop.f32.mrf.mxu0 }
 0x106   :  { %v4738_v53 = vadd.f32 %v230_v52, %v120_v45 }
 0x107   :  { %v232_v54 = vpop.f32.mrf.mxu0 }
 0x108   :  { %v4740_v55 = vadd.f32 %v232_v54, %v124_v42 }
 0x109   :  { %v236_v56 = vpop.f32.mrf.mxu0 }
 0x10a   :  { %v4742_v57 = vadd.f32 %v236_v56, %v120_v45 }
 0x10b   :  { %v238_v58 = vpop.f32.mrf.mxu0 }
 0x10c   :  { %v4744_v59 = vadd.f32 %v238_v58, %v124_v42 }
 0x10d   :  { %v242_v60 = vpop.f32.mrf.mxu0 }
 0x10e   :  { %v4746_v61 = vadd.f32 %v242_v60, %v120_v45 }
 0x10f   :  { %v244_v62 = vpop.f32.mrf.mxu0 }
 0x110   :  { %v4748_v63 = vadd.f32 %v244_v62, %v124_v42 }
 0x111   :  { %v248_v1 = vpop.f32.mrf.mxu0 }
 0x112   :  { %v4750_v2 = vadd.f32 %v248_v1, %v120_v45 }
 0x113   :  { %v250_v3 = vpop.f32.mrf.mxu0 }
 0x114   :  { %v4752_v5 = vadd.f32 %v250_v3, %v124_v42 }
 0x115   :  { %v254_v6 = vpop.f32.mrf.mxu0 }
 0x116   :  { %v4754_v7 = vadd.f32 %v254_v6, %v120_v45 }
 0x117   :  { %v256_v8 = vpop.f32.mrf.mxu0 }
 0x118   :  { %v4756_v9 = vadd.f32 %v256_v8, %v124_v42 }
 0x119   :  { %v260_v14 = vpop.f32.mrf.mxu0 }
 0x11a   :  { %v4758_v19 = vadd.f32 %v260_v14, %v120_v45 }
 0x11b   :  { %v262_v24 = vpop.f32.mrf.mxu0 }
 0x11c   :  { %v263_v31 = vadd.f32 %v262_v24, %v124_v42  ;;  %v400_v42 = vld [vmem:[#allocation6] sm:$0xff] }
 0x170   :  { %v380_v30 = vpop.f32.mrf.mxu1 }
 0x171   :  { %v385_v32 = vadd.f32 %v380_v30, %v219_v29 }
 0x172   :  { %v382_v33 = vpop.f32.mrf.mxu1 }
 0x173   :  { %4061 = vtanh.f32 %v385_v32  ;;  %v386_v35 = vadd.f32 %v382_v33, %v263_v31  ;;  %v3907_v47 = vmul.f32 -1.442695, %v385_v32 }
 0x175   :  { %4063 = vtanh.f32 %v386_v35  ;;  %v3908_v45 = vmul.f32 -1.442695, %v386_v35 }
 0x177   :  { %4065 = vpow2.f32 %v3908_v45 }
 0x178   :  { %4067 = vpow2.f32 %v3907_v47 }
 0x180   :  { %v4062_v36 = vpop.eup %4061 }
 0x181   :  { %407 = vrot.lane.b32.xlu1 %v4062_v36, %s4444_s4  ;;  %v423_v36 = vsel %vm422_vm3, 1, %v4443_v51 }
 0x182   :  { %v4064_v40 = vpop.eup %4063 }
 0x183   :  { %458 = vrot.lane.b32.xlu0 %v4064_v40, %s4444_s4 }
 0x184   :  { %v4066_v49 = vpop.eup %4065 }
 0x185   :  { %453 = vrot.lane.b32.xlu1 %v451_v37, %s4442_s8  ;;  %v394_v52 = vadd.f32 1.0, %v4066_v49  ;;  %v4068_v54 = vpop.eup %4067 }
 0x186   :  { %v393_v56 = vadd.f32 1.0, %v4068_v54 }
 0x187   :  { %4069 = vrcp.f32 %v394_v52 }
 0x188   :  { %4071 = vrcp.f32 %v393_v56 }
 0x189   :  { %402 = vrot.lane.b32.xlu1 %v400_v42, %s4442_s8 }
 0x18d   :  { %476 = vperm.xlu1 %4059, %v474_v43  }
 0x191   :  { %479 = vrot.lane.b32.xlu1 %v4539_v4, %s4445_s1 }
 0x194   :  { %v4070_v58 = vpop.eup %4069 }
 0x195   :  { %v4072_v3 = vpop.eup %4071 }
 0x1f3   :  { %v408_v1 = vpop.permute.xlu1 %407 }
 0x1f4   :  { %v410_v6 = vmul.f32 %v4072_v3, %v408_v1 }
 0x1f5   :  { %v459_v60 = vpop.permute.xlu0 %458 }
 0x1f6   :  { %v461_v62 = vmul.f32 %v4070_v58, %v459_v60 }
 0x1f7   :  { %v454_v8 = vpop.permute.xlu1 %453 }
 0x1f8   :  { %463 = vrot.lane.b32.xlu0 %v461_v62, %s4442_s8  ;;  %v456_v14 = vmul.f32 %v4070_v58, %v454_v8 }
 0x1fb   :  { %v403_v24 = vpop.permute.xlu1 %402 }
 0x1fc   :  { %412 = vrot.lane.b32.xlu0 %v410_v6, %s4442_s8  ;;  %v405_v31 = vmul.f32 %v4072_v3, %v403_v24 }
 0x208   :  { %v4781_v37 = vpop.permute.xlu1 %476 }
 0x209   :  { %vm478_vm4 = vcmp.eq.s32.totalorder %v4781_v37, 1 }
 0x20c   :  { %v480_v43 = vpop.permute.xlu1 %479 }
 0x26a   :  { %v464_v29 = vpop.permute.xlu0 %463 }
 0x26b   :  { %v466_v30 = vadd.f32 %v464_v29, %v456_v14 }
 0x26d   :  { %4073 = vtanh.f32 %v466_v30  ;;  %v483_v56 = vsel %vm478_vm4, %v466_v30, %v454_v8 }
 0x26e   :  { %v413_v32 = vpop.permute.xlu0 %412 }
 0x26f   :  { %v415_v33 = vadd.f32 %v413_v32, %v405_v31 }
 0x271   :  { %4075 = vtanh.f32 %v415_v33 }
 0x27a   :  { %v4074_v35 = vpop.eup %4073 }
 0x27b   :  { %469 = vrot.lane.b32.xlu0 %v4074_v35, %s4444_s4 }
 0x27e   :  { %v4076_v4 = vpop.eup %4075 }
 0x27f   :  { %418 = vrot.lane.b32.xlu1 %v4076_v4, %s4444_s4  ;;  %425 = vperm.xlu0 %4060, %v423_v36  }
 0x283   :  { %429 = vrot.lane.b32.xlu1 %v4697_v34, %s4445_s1 }
 0x2ed   :  { %v470_v40 = vpop.permute.xlu0 %469 }
 0x2ee   :  { %v4783_v42 = vmul.f32 %v4070_v58, %v470_v40 }
 0x2f0   :  { %v482_v45 = vsel %vm478_vm4, %v4783_v42, %v480_v43 }
 0x2f1   :  { %485 = vrot.lane.b32.xlu0 %v482_v45, %s4442_s8  ;;  %v419_v47 = vpop.permute.xlu1 %418 }
 0x2f2   :  { %v4790_v52 = vmul.f32 %v4072_v3, %v419_v47 }
 0x2f5   :  { %v430_v49 = vpop.permute.xlu1 %429 }
 0x2fa   :  { %v4792_v54 = vpop.permute.xlu0 %425 }
 0x2fb   :  { %vm427_vm5 = vcmp.eq.s32.totalorder %v4792_v54, 1 }
 0x2fc   :  { %v432_v34 = vsel %vm427_vm5, %v4790_v52, %v430_v49  ;;  %v433_v58 = vsel %vm427_vm5, %v415_v33, %v403_v24  ;;  %v672_v24 = vsel %vm671_vm6, 1, %v4443_v51  ;;  %vm4446_vm6 = vmmov 0  }
 0x2fd   :  { %435 = vrot.lane.b32.xlu1 %v432_v34, %s4442_s8 }
 0x301   :  { %490 = vrot.lane.b32.xlu1 %v483_v56, %s4445_s1 }
 0x305   :  { %440 = vrot.lane.b32.xlu1 %v433_v58, %s4445_s1 }
 0x363   :  { %v486_v60 = vpop.permute.xlu0 %485 }
 0x364   :  { %488 = vst.msk [vmem:[#allocation7] sm:$0xff] %vm127_vm0, %v486_v60 }
 0x36b   :  { %v503_v62 = vld [vmem:[#allocation7] sm:$0xff] }
 0x36c   :  { %505 = vrot.lane.b32.xlu0 %v503_v62, %s4442_s8 }
 0x36f   :  { %v436_v1 = vpop.permute.xlu1 %435 }
 0x370   :  { %438 = vst.msk [vmem:[#allocation5] sm:$0xff] %vm127_vm0, %v436_v1 }
 0x373   :  { %v491_v3 = vpop.permute.xlu1 %490 }
 0x374   :  { %493 = vst.msk [vmem:[#allocation8] sm:$0xff] %vm127_vm0, %v491_v3 }
 0x377   :  { %v441_v6 = vpop.permute.xlu1 %440  ;;  %v4815_v29 = vld [vmem:[#allocation5] sm:$0xff] }
 0x378   :  { %443 = vst.msk [vmem:[#allocation6] sm:$0xff] %vm127_vm0, %v441_v6 }
 0x37b   :  { %v649_v8 = vld [vmem:[#allocation8] sm:$0xff] }
 0x37c   :  { %651 = vrot.lane.b32.xlu1 %v649_v8, %s4442_s8 }
 0x37f   :  { %v598_v14 = vld [vmem:[#allocation6] sm:$0xff] }
 0x380   :  { %600 = vrot.lane.b32.xlu1 %v598_v14, %s4442_s8 }
 0x384   :  { %674 = vperm.xlu1 %4059, %v672_v24  }
 0x388   :  { %677 = vrot.lane.b32.xlu1 %v503_v62, %s4445_s1 }
 0x3de   :  { %v506_v30 = vpop.permute.xlu0 %505 }
 0x3df   :  { %v508_v31 = vsel %vm127_vm0, %v4815_v29, %v506_v30 }
 0x3e0   :  { %3909 = vmatmul.mubr.msk.f32.vlgmr.msra.gmra.mxu1 %vm310_vm1, %v508_v31 }
 0x3e1   :  { %925 = vmatpush1.msra.mxu1 %v4552_v11  ;;  %972 = vmatprep.mubr.f32.mxu1 %v4441_v0 }
 0x3e2   :  { %926 = vmatprep.subr.mxu1 %v4557_v12 }
 0x3e3   :  { %927 = vmatpush1.msra.mxu1 %v4562_v13 }
 0x3e4   :  { %928 = vmatprep.subr.mxu1 %v4571_v15 }
 0x3e5   :  { %929 = vmatpush1.msra.mxu1 %v4577_v16 }
 0x3e6   :  { %930 = vmatprep.subr.mxu1 %v4583_v17 }
 0x3e7   :  { %931 = vmatpush1.msra.mxu1 %v4590_v18 }
 0x3e8   :  { %932 = vmatprep.subr.mxu1 %v4600_v20 }
 0x3e9   :  { %933 = vmatpush1.msra.mxu1 %v4606_v21 }
 0x3ea   :  { %934 = vmatprep.subr.mxu1 %v4613_v22 }
 0x3eb   :  { %935 = vmatpush1.msra.mxu1 %v4621_v23 }
 0x3ec   :  { %936 = vmatprep.subr.mxu1 %v4631_v25 }
 0x3ed   :  { %937 = vmatpush1.msra.mxu1 %v4637_v26 }
 0x3ee   :  { %938 = vmatprep.subr.mxu1 %v4644_v27  ;;  %v652_v3 = vpop.permute.xlu1 %651 }
 0x3ef   :  { %939 = vmatpush1.msra.mxu1 %v4652_v28 }
 0x3f0   :  { %1308 = vmatprep.subr.mxu1 %v4546_v10 }
 0x3f2   :  { %v601_v24 = vpop.permute.xlu1 %600 }
 0x4a0   :  { %v578_v32 = vpop.f32.mrf.mxu1 }
 0x4a1   :  { %v583_v36 = vadd.f32 %v578_v32, %v4732_v48 }
 0x4a2   :  { %v580_v33 = vpop.f32.mrf.mxu1 }
 0x4a3   :  { %v584_v35 = vadd.f32 %v580_v33, %v4756_v9  ;;  %v3910_v45 = vmul.f32 -1.442695, %v583_v36 }
 0x4a5   :  { %4077 = vtanh.f32 %v584_v35  ;;  %v3911_v43 = vmul.f32 -1.442695, %v584_v35  ;;  %v621_v35 = vsel %vm620_vm7, 1, %v4443_v51 }
 0x4a6   :  { %4079 = vtanh.f32 %v583_v36 }
 0x4a7   :  { %4081 = vpow2.f32 %v3911_v43 }
 0x4a8   :  { %4083 = vpow2.f32 %v3910_v45 }
 0x4b2   :  { %v4078_v4 = vpop.eup %4077 }
 0x4b3   :  { %656 = vrot.lane.b32.xlu0 %v4078_v4, %s4444_s4  ;;  %v4080_v40 = vpop.eup %4079  ;;  %v4849_v4 = vpop.permute.xlu1 %674 }
 0x4b4   :  { %v4082_v47 = vpop.eup %4081  ;;  %vm676_vm8 = vcmp.eq.s32.totalorder %v4849_v4, 1  ;;  %v3639_v4 = vld [vmem:[#allocation13] sm:$0xff] }
 0x4b5   :  { %v592_v49 = vadd.f32 1.0, %v4082_v47  ;;  %v4084_v34 = vpop.eup %4083 }
 0x4b6   :  { %v591_v56 = vadd.f32 1.0, %v4084_v34 }
 0x4b7   :  { %605 = vrot.lane.b32.xlu0 %v4080_v40, %s4444_s4  ;;  %4085 = vrcp.f32 %v592_v49  ;;  %v678_v45 = vpop.permute.xlu1 %677 }
 0x4b8   :  { %4087 = vrcp.f32 %v591_v56 }
 0x4c4   :  { %v4086_v9 = vpop.eup %4085 }
 0x4c5   :  { %v4088_v60 = vpop.eup %4087  ;;  %v654_v6 = vmul.f32 %v4086_v9, %v652_v3 }
 0x4c6   :  { %v603_v30 = vmul.f32 %v4088_v60, %v601_v24 }
 0x525   :  { %v657_v48 = vpop.permute.xlu0 %656 }
 0x526   :  { %v659_v58 = vmul.f32 %v4086_v9, %v657_v48 }
 0x528   :  { %661 = vrot.lane.b32.xlu0 %v659_v58, %s4442_s8 }
 0x529   :  { %v606_v62 = vpop.permute.xlu0 %605 }
 0x52a   :  { %v608_v1 = vmul.f32 %v4088_v60, %v606_v62 }
 0x52c   :  { %610 = vrot.lane.b32.xlu0 %v608_v1, %s4442_s8 }
 0x59a   :  { %v662_v8 = vpop.permute.xlu0 %661 }
 0x59b   :  { %v664_v14 = vadd.f32 %v662_v8, %v654_v6 }
 0x59d   :  { %4089 = vtanh.f32 %v664_v14  ;;  %v681_v48 = vsel %vm676_vm8, %v664_v14, %v652_v3 }
 0x59e   :  { %v611_v31 = vpop.permute.xlu0 %610 }
 0x59f   :  { %v613_v32 = vadd.f32 %v611_v31, %v603_v30 }
 0x5a1   :  { %4091 = vtanh.f32 %v613_v32 }
 0x5aa   :  { %v4090_v33 = vpop.eup %4089 }
 0x5ab   :  { %667 = vrot.lane.b32.xlu0 %v4090_v33, %s4444_s4 }
 0x5ae   :  { %v4092_v36 = vpop.eup %4091 }
 0x5af   :  { %616 = vrot.lane.b32.xlu1 %v4092_v36, %s4444_s4  ;;  %623 = vperm.xlu0 %4060, %v621_v35  }
 0x5b3   :  { %627 = vrot.lane.b32.xlu0 %v4815_v29, %s4445_s1 }
 0x61d   :  { %v668_v40 = vpop.permute.xlu0 %667 }
 0x61e   :  { %v4851_v43 = vmul.f32 %v4086_v9, %v668_v40 }
 0x620   :  { %v680_v47 = vsel %vm676_vm8, %v4851_v43, %v678_v45 }
 0x621   :  { %683 = vrot.lane.b32.xlu1 %v680_v47, %s4442_s8  ;;  %v617_v49 = vpop.permute.xlu1 %616 }
 0x622   :  { %v4860_v56 = vmul.f32 %v4088_v60, %v617_v49 }
 0x62a   :  { %v4858_v34 = vpop.permute.xlu0 %623 }
 0x62b   :  { %vm625_vm9 = vcmp.eq.s32.totalorder %v4858_v34, 1 }
 0x62c   :  { %v631_v58 = vsel %vm625_vm9, %v613_v32, %v601_v24  ;;  %v870_v24 = vsel %vm869_vm10, 1, %v4443_v51 }
 0x62e   :  { %v628_v29 = vpop.permute.xlu0 %627 }
 0x62f   :  { %v630_v9 = vsel %vm625_vm9, %v4860_v56, %v628_v29 }
 0x630   :  { %633 = vrot.lane.b32.xlu0 %v630_v9, %s4442_s8 }
 0x634   :  { %688 = vrot.lane.b32.xlu0 %v681_v48, %s4445_s1 }
 0x638   :  { %638 = vrot.lane.b32.xlu0 %v631_v58, %s4445_s1 }
 0x693   :  { %v684_v60 = vpop.permute.xlu1 %683 }
 0x694   :  { %686 = vst.msk [vmem:[#allocation7] sm:$0xff] %vm127_vm0, %v684_v60 }
 0x69b   :  { %v701_v62 = vld [vmem:[#allocation7] sm:$0xff] }
 0x69c   :  { %703 = vrot.lane.b32.xlu1 %v701_v62, %s4442_s8 }
 0x6a2   :  { %v634_v1 = vpop.permute.xlu0 %633 }
 0x6a3   :  { %636 = vst.msk [vmem:[#allocation5] sm:$0xff] %vm127_vm0, %v634_v1 }
 0x6a6   :  { %v689_v6 = vpop.permute.xlu0 %688 }
 0x6a7   :  { %691 = vst.msk [vmem:[#allocation8] sm:$0xff] %vm127_vm0, %v689_v6 }
 0x6aa   :  { %v639_v3 = vpop.permute.xlu0 %638  ;;  %v4883_v31 = vld [vmem:[#allocation5] sm:$0xff] }
 0x6ab   :  { %641 = vst.msk [vmem:[#allocation6] sm:$0xff] %vm127_vm0, %v639_v3 }
 0x6ae   :  { %v847_v8 = vld [vmem:[#allocation8] sm:$0xff] }
 0x6af   :  { %849 = vrot.lane.b32.xlu0 %v847_v8, %s4442_s8 }
 0x6b2   :  { %v796_v14 = vld [vmem:[#allocation6] sm:$0xff] }
 0x6b3   :  { %798 = vrot.lane.b32.xlu0 %v796_v14, %s4442_s8 }
 0x6b7   :  { %872 = vperm.xlu0 %4060, %v870_v24  }
 0x6bb   :  { %875 = vrot.lane.b32.xlu0 %v701_v62, %s4445_s1 }
 0x70e   :  { %v704_v30 = vpop.permute.xlu1 %703 }
 0x70f   :  { %v706_v32 = vsel %vm127_vm0, %v4883_v31, %v704_v30 }
 0x710   :  { %3912 = vmatmul.mubr.msk.f32.vlgmr.msra.gmra.mxu0 %vm310_vm1, %v706_v32 }
 0x711   :  { %1123 = vmatpush1.msra.mxu0 %v4552_v11  ;;  %1170 = vmatprep.mubr.f32.mxu0 %v4441_v0 }
 0x712   :  { %1124 = vmatprep.subr.mxu0 %v4557_v12 }
 0x713   :  { %1125 = vmatpush1.msra.mxu0 %v4562_v13 }
 0x714   :  { %1126 = vmatprep.subr.mxu0 %v4571_v15 }
 0x715   :  { %1127 = vmatpush1.msra.mxu0 %v4577_v16 }
 0x716   :  { %1128 = vmatprep.subr.mxu0 %v4583_v17 }
 0x717   :  { %1129 = vmatpush1.msra.mxu0 %v4590_v18 }
 0x718   :  { %1130 = vmatprep.subr.mxu0 %v4600_v20 }
 0x719   :  { %1131 = vmatpush1.msra.mxu0 %v4606_v21 }
 0x71a   :  { %1132 = vmatprep.subr.mxu0 %v4613_v22 }
 0x71b   :  { %1133 = vmatpush1.msra.mxu0 %v4621_v23 }
 0x71c   :  { %1134 = vmatprep.subr.mxu0 %v4631_v25 }
 0x71d   :  { %1135 = vmatpush1.msra.mxu0 %v4637_v26 }
 0x71e   :  { %1136 = vmatprep.subr.mxu0 %v4644_v27 }
 0x71f   :  { %1137 = vmatpush1.msra.mxu0 %v4652_v28 }
 0x720   :  { %1494 = vmatprep.subr.mxu0 %v4546_v10 }
 0x721   :  { %v850_v8 = vpop.permute.xlu0 %849 }
 0x725   :  { %v799_v32 = vpop.permute.xlu0 %798 }
 0x7d0   :  { %v776_v33 = vpop.f32.mrf.mxu0 }
 0x7d1   :  { %v781_v40 = vadd.f32 %v776_v33, %v4738_v53 }
 0x7d2   :  { %v778_v35 = vpop.f32.mrf.mxu0 }
 0x7d3   :  { %v782_v36 = vadd.f32 %v778_v35, %v4752_v5  ;;  %v3913_v29 = vmul.f32 -1.442695, %v781_v40 }
 0x7d5   :  { %4093 = vtanh.f32 %v782_v36  ;;  %v3914_v49 = vmul.f32 -1.442695, %v782_v36 }
 0x7d6   :  { %4095 = vtanh.f32 %v781_v40 }
 0x7d7   :  { %4097 = vpow2.f32 %v3914_v49  ;;  %v4917_v49 = vpop.permute.xlu0 %872 }
 0x7d8   :  { %4099 = vpow2.f32 %v3913_v29  ;;  %vm874_vm12 = vcmp.eq.s32.totalorder %v4917_v49, 1 }
 0x7e2   :  { %v4094_v45 = vpop.eup %4093 }
 0x7e3   :  { %854 = vrot.lane.b32.xlu1 %v4094_v45, %s4444_s4  ;;  %v4096_v47 = vpop.eup %4095  ;;  %v819_v45 = vsel %vm818_vm11, 1, %v4443_v51 }
 0x7e4   :  { %v4098_v9 = vpop.eup %4097 }
 0x7e5   :  { %v790_v48 = vadd.f32 1.0, %v4098_v9  ;;  %v4100_v58 = vpop.eup %4099 }
 0x7e6   :  { %v789_v60 = vadd.f32 1.0, %v4100_v58 }
 0x7e7   :  { %803 = vrot.lane.b32.xlu1 %v4096_v47, %s4444_s4  ;;  %4101 = vrcp.f32 %v790_v48  ;;  %v876_v48 = vpop.permute.xlu0 %875 }
 0x7e8   :  { %4103 = vrcp.f32 %v789_v60 }
 0x7f4   :  { %v4102_v5 = vpop.eup %4101 }
 0x7f5   :  { %v4104_v1 = vpop.eup %4103  ;;  %v852_v14 = vmul.f32 %v4102_v5, %v850_v8 }
 0x7f6   :  { %v801_v33 = vmul.f32 %v4104_v1, %v799_v32 }
 0x855   :  { %v855_v53 = vpop.permute.xlu1 %854 }
 0x856   :  { %v857_v62 = vmul.f32 %v4102_v5, %v855_v53 }
 0x858   :  { %859 = vrot.lane.b32.xlu1 %v857_v62, %s4442_s8 }
 0x859   :  { %v804_v6 = vpop.permute.xlu1 %803 }
 0x85a   :  { %v806_v3 = vmul.f32 %v4104_v1, %v804_v6 }
 0x85c   :  { %808 = vrot.lane.b32.xlu1 %v806_v3, %s4442_s8 }
 0x8ca   :  { %v860_v24 = vpop.permute.xlu1 %859 }
 0x8cb   :  { %v862_v30 = vadd.f32 %v860_v24, %v852_v14 }
 0x8cd   :  { %4105 = vtanh.f32 %v862_v30  ;;  %v879_v6 = vsel %vm874_vm12, %v862_v30, %v850_v8 }
 0x8ce   :  { %v809_v35 = vpop.permute.xlu1 %808 }
 0x8cf   :  { %v811_v36 = vadd.f32 %v809_v35, %v801_v33  ;;  %v1068_v35 = vsel %vm1067_vm14, 1, %v4443_v51 }
 0x8d1   :  { %4107 = vtanh.f32 %v811_v36 }
 0x8da   :  { %v4106_v40 = vpop.eup %4105 }
 0x8db   :  { %865 = vrot.lane.b32.xlu1 %v4106_v40, %s4444_s4 }
 0x8de   :  { %v4108_v47 = vpop.eup %4107 }
 0x8df   :  { %821 = vperm.xlu1 %4059, %v819_v45   ;;  %814 = vrot.lane.b32.xlu0 %v4108_v47, %s4444_s4 }
 0x8e3   :  { %825 = vrot.lane.b32.xlu1 %v4883_v31, %s4445_s1 }
 0x94d   :  { %v866_v29 = vpop.permute.xlu1 %865 }
 0x94e   :  { %v4919_v9 = vmul.f32 %v4102_v5, %v866_v29 }
 0x950   :  { %v878_v58 = vsel %vm874_vm12, %v4919_v9, %v876_v48 }
 0x951   :  { %881 = vrot.lane.b32.xlu0 %v878_v58, %s4442_s8  ;;  %v815_v60 = vpop.permute.xlu0 %814 }
 0x952   :  { %v4928_v62 = vmul.f32 %v4104_v1, %v815_v60 }
 0x95a   :  { %v4926_v53 = vpop.permute.xlu1 %821 }
 0x95b   :  { %vm823_vm13 = vcmp.eq.s32.totalorder %v4926_v53, 1  ;;  %v3643_v53 = vld [vmem:[#allocation13 + $0x20] sm:$0xff] }
 0x95c   :  { %v829_v3 = vsel %vm823_vm13, %v811_v36, %v799_v32 }
 0x95e   :  { %v826_v31 = vpop.permute.xlu1 %825 }
 0x95f   :  { %v828_v5 = vsel %vm823_vm13, %v4928_v62, %v826_v31 }
 0x960   :  { %831 = vrot.lane.b32.xlu1 %v828_v5, %s4442_s8 }
 0x964   :  { %886 = vrot.lane.b32.xlu1 %v879_v6, %s4445_s1 }
 0x968   :  { %836 = vrot.lane.b32.xlu1 %v829_v3, %s4445_s1 }
 0x9c3   :  { %v882_v1 = vpop.permute.xlu0 %881 }
 0x9c4   :  { %884 = vst.msk [vmem:[#allocation7] sm:$0xff] %vm127_vm0, %v882_v1  ;;  %v1017_v1 = vsel %vm1016_vm15, 1, %v4443_v51 }
 0x9cb   :  { %v899_v14 = vld [vmem:[#allocation7] sm:$0xff] }
 0x9cc   :  { %901 = vrot.lane.b32.xlu0 %v899_v14, %s4442_s8 }
 0x9d2   :  { %v832_v24 = vpop.permute.xlu1 %831 }
 0x9d3   :  { %834 = vst.msk [vmem:[#allocation5] sm:$0xff] %vm127_vm0, %v832_v24 }
 0x9d6   :  { %v887_v33 = vpop.permute.xlu1 %886 }
 0x9d7   :  { %889 = vst.msk [vmem:[#allocation8] sm:$0xff] %vm127_vm0, %v887_v33 }
 0x9da   :  { %v837_v8 = vpop.permute.xlu1 %836  ;;  %v4951_v36 = vld [vmem:[#allocation5] sm:$0xff] }
 0x9db   :  { %839 = vst.msk [vmem:[#allocation6] sm:$0xff] %vm127_vm0, %v837_v8 }
 0x9de   :  { %v1045_v30 = vld [vmem:[#allocation8] sm:$0xff] }
 0x9df   :  { %1047 = vrot.lane.b32.xlu1 %v1045_v30, %s4442_s8 }
 0x9e2   :  { %v994_v32 = vld [vmem:[#allocation6] sm:$0xff] }
 0x9e3   :  { %996 = vrot.lane.b32.xlu1 %v994_v32, %s4442_s8 }
 0x9e7   :  { %1070 = vperm.xlu1 %4059, %v1068_v35  }
 0x9eb   :  { %1073 = vrot.lane.b32.xlu1 %v899_v14, %s4445_s1 }
 0xa3e   :  { %v902_v40 = vpop.permute.xlu0 %901 }
 0xa3f   :  { %v904_v45 = vsel %vm127_vm0, %v4951_v36, %v902_v40 }
 0xa40   :  { %3915 = vmatmul.mubr.msk.f32.vlgmr.msra.gmra.mxu1 %vm310_vm1, %v904_v45 }
 0xa41   :  { %1309 = vmatpush1.msra.mxu1 %v4552_v11  ;;  %1356 = vmatprep.mubr.f32.mxu1 %v4441_v0 }
 0xa42   :  { %1310 = vmatprep.subr.mxu1 %v4557_v12 }
 0xa43   :  { %1311 = vmatpush1.msra.mxu1 %v4562_v13 }
 0xa44   :  { %1312 = vmatprep.subr.mxu1 %v4571_v15 }
 0xa45   :  { %1313 = vmatpush1.msra.mxu1 %v4577_v16 }
 0xa46   :  { %1314 = vmatprep.subr.mxu1 %v4583_v17 }
 0xa47   :  { %1315 = vmatpush1.msra.mxu1 %v4590_v18 }
 0xa48   :  { %1316 = vmatprep.subr.mxu1 %v4600_v20 }
 0xa49   :  { %1317 = vmatpush1.msra.mxu1 %v4606_v21 }
 0xa4a   :  { %1318 = vmatprep.subr.mxu1 %v4613_v22 }
 0xa4b   :  { %1319 = vmatpush1.msra.mxu1 %v4621_v23 }
 0xa4c   :  { %1320 = vmatprep.subr.mxu1 %v4631_v25 }
 0xa4d   :  { %1321 = vmatpush1.msra.mxu1 %v4637_v26 }
 0xa4e   :  { %1322 = vmatprep.subr.mxu1 %v4644_v27 }
 0xa4f   :  { %1323 = vmatpush1.msra.mxu1 %v4652_v28 }
 0xa50   :  { %1680 = vmatprep.subr.mxu1 %v4546_v10 }
 0xa51   :  { %v1048_v47 = vpop.permute.xlu1 %1047 }
 0xa55   :  { %v997_v60 = vpop.permute.xlu1 %996 }
 0xa62   :  { %v4985_v24 = vpop.permute.xlu1 %1070 }
 0xa63   :  { %vm1072_vm2 = vcmp.eq.s32.totalorder %v4985_v24, 1  ;;  %v3642_v24 = vld [vmem:[#allocation13 + $0x18] sm:$0xff] }
 0xa66   :  { %v1074_v44 = vpop.permute.xlu1 %1073 }
 0xb00   :  { %v974_v11 = vpop.f32.mrf.mxu1 }
 0xb01   :  { %v979_v15 = vadd.f32 %v974_v11, %v4742_v57 }
 0xb02   :  { %v976_v12 = vpop.f32.mrf.mxu1 }
 0xb03   :  { %v980_v13 = vadd.f32 %v976_v12, %v4748_v63  ;;  %v3916_v20 = vmul.f32 -1.442695, %v979_v15 }
 0xb05   :  { %4109 = vtanh.f32 %v980_v13  ;;  %v3917_v18 = vmul.f32 -1.442695, %v980_v13 }
 0xb06   :  { %4111 = vtanh.f32 %v979_v15 }
 0xb07   :  { %4113 = vpow2.f32 %v3917_v18 }
 0xb08   :  { %4115 = vpow2.f32 %v3916_v20 }
 0xb12   :  { %v4110_v16 = vpop.eup %4109 }
 0xb13   :  { %1052 = vrot.lane.b32.xlu0 %v4110_v16, %s4444_s4  ;;  %v4112_v17 = vpop.eup %4111 }
 0xb14   :  { %v4114_v21 = vpop.eup %4113 }
 0xb15   :  { %v988_v10 = vadd.f32 1.0, %v4114_v21  ;;  %v4116_v22 = vpop.eup %4115 }
 0xb16   :  { %v987_v23 = vadd.f32 1.0, %v4116_v22 }
 0xb17   :  { %1001 = vrot.lane.b32.xlu0 %v4112_v17, %s4444_s4  ;;  %4117 = vrcp.f32 %v988_v10 }
 0xb18   :  { %4119 = vrcp.f32 %v987_v23  ;;  %v5024_v23 = vld [vmem:[%s6164_s3 + $0x70] sm:$0xff] }
 0xb24   :  { %v4118_v25 = vpop.eup %4117 }
 0xb25   :  { %v4120_v28 = vpop.eup %4119  ;;  %v1050_v29 = vmul.f32 %v4118_v25, %v1048_v47 }
 0xb26   :  { %v999_v31 = vmul.f32 %v4120_v28, %v997_v60 }
 0xb85   :  { %v1053_v26 = vpop.permute.xlu0 %1052 }
 0xb86   :  { %v1055_v27 = vmul.f32 %v4118_v25, %v1053_v26  ;;  %v5037_v26 = vld [vmem:[%s6164_s3 + $0x60] sm:$0xff] }
 0xb88   :  { %1057 = vrot.lane.b32.xlu0 %v1055_v27, %s4442_s8  ;;  %v5043_v27 = vld [vmem:[%s6164_s3 + $0x58] sm:$0xff] }
 0xb89   :  { %v1002_v57 = vpop.permute.xlu0 %1001 }
 0xb8a   :  { %v1004_v63 = vmul.f32 %v4120_v28, %v1002_v57  ;;  %v5055_v57 = vld [vmem:[%s6164_s3 + $0x48] sm:$0xff] }
 0xb8c   :  { %1006 = vrot.lane.b32.xlu0 %v1004_v63, %s4442_s8  ;;  %v5061_v63 = vld [vmem:[%s6164_s3 + $0x40] sm:$0xff] }
 0xbfa   :  { %v1058_v48 = vpop.permute.xlu0 %1057 }
 0xbfb   :  { %v1060_v58 = vadd.f32 %v1058_v48, %v1050_v29  ;;  %v5073_v29 = vld [vmem:[%s6164_s3 + $0x30] sm:$0xff]  ;;  %v5079_v48 = vld [vmem:[%s6164_s3 + $0x28] sm:$0xff] }
 0xbfd   :  { %4121 = vtanh.f32 %v1060_v58  ;;  %v1077_v45 = vsel %vm1072_vm2, %v1060_v58, %v1048_v47  ;;  %v5067_v47 = vld [vmem:[%s6164_s3 + $0x38] sm:$0xff]  ;;  %v5085_v58 = vld [vmem:[%s6164_s3 + $0x20] sm:$0xff] }
 0xbfe   :  { %v1007_v5 = vpop.permute.xlu0 %1006 }
 0xbff   :  { %v1009_v6 = vadd.f32 %v1007_v5, %v999_v31  ;;  %v5097_v31 = vld [vmem:[%s6164_s3 + $0x10] sm:$0xff]  ;;  %v5103_v5 = vld [vmem:[%s6164_s3 + $0x8] sm:$0xff] }
 0xc01   :  { %4123 = vtanh.f32 %v1009_v6 }
 0xc0a   :  { %v4122_v3 = vpop.eup %4121 }
 0xc0b   :  { %1063 = vrot.lane.b32.xlu0 %v4122_v3, %s4444_s4 }
 0xc0e   :  { %v4124_v14 = vpop.eup %4123 }
 0xc0f   :  { %1012 = vrot.lane.b32.xlu1 %v4124_v14, %s4444_s4  ;;  %1019 = vperm.xlu0 %4060, %v1017_v1  }
 0xc13   :  { %1023 = vrot.lane.b32.xlu0 %v4951_v36, %s4445_s1 }
 0xc7d   :  { %v1064_v33 = vpop.permute.xlu0 %1063 }
 0xc7e   :  { %v4987_v8 = vmul.f32 %v4118_v25, %v1064_v33  ;;  %v5031_v25 = vld [vmem:[%s6164_s3 + $0x68] sm:$0xff] }
 0xc80   :  { %v1076_v30 = vsel %vm1072_vm2, %v4987_v8, %v1074_v44 }
 0xc81   :  { %1079 = vrot.lane.b32.xlu1 %v1076_v30, %s4442_s8  ;;  %v1013_v51 = vpop.permute.xlu1 %1012 }
 0xc82   :  { %v4996_v35 = vmul.f32 %v4120_v28, %v1013_v51  ;;  %v5049_v28 = vld [vmem:[%s6164_s3 + $0x50] sm:$0xff] }
 0xc8a   :  { %v4994_v32 = vpop.permute.xlu0 %1019 }
 0xc8b   :  { %vm1021_vm3 = vcmp.eq.s32.totalorder %v4994_v32, 1 }
 0xc8c   :  { %v1027_v11 = vsel %vm1021_vm3, %v1009_v6, %v997_v60  ;;  %v5091_v60 = vld [vmem:[%s6164_s3 + $0x18] sm:$0xff]  ;;  %v5109_v6 = vld [vmem:[%s6164_s3] sm:$0xff] }
 0xc8e   :  { %v1024_v36 = vpop.permute.xlu0 %1023 }
 0xc8f   :  { %v1026_v40 = vsel %vm1021_vm3, %v4996_v35, %v1024_v36 }
 0xc90   :  { %1029 = vrot.lane.b32.xlu0 %v1026_v40, %s4442_s8 }
 0xc94   :  { %1084 = vrot.lane.b32.xlu0 %v1077_v45, %s4445_s1 }
 0xc98   :  { %1034 = vrot.lane.b32.xlu0 %v1027_v11, %s4445_s1 }
 0xcf3   :  { %v1080_v12 = vpop.permute.xlu1 %1079 }
 0xcf4   :  { %1082 = vst.msk [vmem:[#allocation7] sm:$0xff] %vm127_vm0, %v1080_v12 }
 0xcfb   :  { %v5010_v13 = vld [vmem:[#allocation7] sm:$0xff] }
 0xcfc   :  { %1099 = vrot.lane.b32.xlu1 %v5010_v13, %s4442_s8 }
 0xd02   :  { %v1030_v15 = vpop.permute.xlu0 %1029 }
 0xd03   :  { %1032 = vst.msk [vmem:[#allocation5] sm:$0xff] %vm127_vm0, %v1030_v15 }
 0xd06   :  { %v1085_v16 = vpop.permute.xlu0 %1084 }
 0xd07   :  { %1087 = vst.msk [vmem:[#allocation8] sm:$0xff] %vm127_vm0, %v1085_v16 }
 0xd0a   :  { %v1035_v17 = vpop.permute.xlu0 %1034  ;;  %v1096_v10 = vld [vmem:[#allocation5] sm:$0xff] }
 0xd0b   :  { %1037 = vst.msk [vmem:[#allocation6] sm:$0xff] %vm127_vm0, %v1035_v17 }
 0xd0e   :  { %v1237_v18 = vld [vmem:[#allocation8] sm:$0xff] }
 0xd0f   :  { %1239 = vrot.lane.b32.xlu0 %v1237_v18, %s4442_s8 }
 0xd12   :  { %v1192_v20 = vld [vmem:[#allocation6] sm:$0xff] }
 0xd13   :  { %1194 = vrot.lane.b32.xlu0 %v1192_v20, %s4442_s8 }
 0xd6e   :  { %v1100_v21 = vpop.permute.xlu1 %1099 }
 0xd6f   :  { %v1102_v22 = vsel %vm127_vm0, %v1096_v10, %v1100_v21 }
 0xd70   :  { %3918 = vmatmul.mubr.msk.f32.vlgmr.msra.gmra.mxu0 %vm310_vm1, %v1102_v22 }
 0xd71   :  { %1495 = vmatpush1.msra.mxu0 %v5024_v23  ;;  %1542 = vmatprep.mubr.f32.mxu0 %v4441_v0 }
 0xd72   :  { %1496 = vmatprep.subr.mxu0 %v5031_v25 }
 0xd73   :  { %1497 = vmatpush1.msra.mxu0 %v5037_v26 }
 0xd74   :  { %1498 = vmatprep.subr.mxu0 %v5043_v27 }
 0xd75   :  { %1499 = vmatpush1.msra.mxu0 %v5049_v28 }
 0xd76   :  { %1500 = vmatprep.subr.mxu0 %v5055_v57 }
 0xd77   :  { %1501 = vmatpush1.msra.mxu0 %v5061_v63 }
 0xd78   :  { %1502 = vmatprep.subr.mxu0 %v5067_v47 }
 0xd79   :  { %1503 = vmatpush1.msra.mxu0 %v5073_v29 }
 0xd7a   :  { %1504 = vmatprep.subr.mxu0 %v5079_v48 }
 0xd7b   :  { %1505 = vmatpush1.msra.mxu0 %v5085_v58 }
 0xd7c   :  { %1506 = vmatprep.subr.mxu0 %v5091_v60 }
 0xd7d   :  { %1507 = vmatpush1.msra.mxu0 %v5097_v31 }
 0xd7e   :  { %1508 = vmatprep.subr.mxu0 %v5103_v5 }
 0xd7f   :  { %1509 = vmatpush1.msra.mxu0 %v5109_v6 }
 0xd81   :  { %v1240_v20 = vpop.permute.xlu0 %1239 }
 0xe30   :  { %v1172_v3 = vpop.f32.mrf.mxu0 }
 0xe31   :  { %v1177_v33 = vadd.f32 %v1172_v3, %v4746_v61 }
 0xe32   :  { %v1174_v1 = vpop.f32.mrf.mxu0 }
 0xe33   :  { %v1178_v14 = vadd.f32 %v1174_v1, %v4744_v59  ;;  %v3919_v36 = vmul.f32 -1.442695, %v1177_v33  ;;  %v1195_v1 = vpop.permute.xlu0 %1194 }
 0xe35   :  { %4125 = vtanh.f32 %v1178_v14  ;;  %v3920_v51 = vmul.f32 -1.442695, %v1178_v14 }
 0xe36   :  { %4127 = vtanh.f32 %v1177_v33 }
 0xe37   :  { %4129 = vpow2.f32 %v3920_v51 }
 0xe38   :  { %4131 = vpow2.f32 %v3919_v36 }
 0xe42   :  { %v4126_v44 = vpop.eup %4125 }
 0xe43   :  { %1244 = vrot.lane.b32.xlu1 %v4126_v44, %s4444_s4  ;;  %v4128_v30 = vpop.eup %4127 }
 0xe44   :  { %v4130_v40 = vpop.eup %4129 }
 0xe45   :  { %v1186_v45 = vadd.f32 1.0, %v4130_v40  ;;  %v4132_v11 = vpop.eup %4131 }
 0xe46   :  { %v1185_v12 = vadd.f32 1.0, %v4132_v11 }
 0xe47   :  { %1199 = vrot.lane.b32.xlu1 %v4128_v30, %s4444_s4  ;;  %4133 = vrcp.f32 %v1186_v45 }
 0xe48   :  { %4135 = vrcp.f32 %v1185_v12 }
 0xe54   :  { %v4134_v59 = vpop.eup %4133 }
 0xe55   :  { %v4136_v16 = vpop.eup %4135  ;;  %v1242_v21 = vmul.f32 %v4134_v59, %v1240_v20 }
 0xe56   :  { %v1197_v14 = vmul.f32 %v4136_v16, %v1195_v1 }
 0xeb5   :  { %v1245_v61 = vpop.permute.xlu1 %1244 }
 0xeb6   :  { %v1247_v15 = vmul.f32 %v4134_v59, %v1245_v61 }
 0xeb8   :  { %1249 = vrot.lane.b32.xlu1 %v1247_v15, %s4442_s8 }
 0xeb9   :  { %v1200_v17 = vpop.permute.xlu1 %1199 }
 0xeba   :  { %v1202_v18 = vmul.f32 %v4136_v16, %v1200_v17 }
 0xebc   :  { %1204 = vrot.lane.b32.xlu1 %v1202_v18, %s4442_s8 }
 0xec0   :  { %1259 = vrot.lane.b32.xlu1 %v5010_v13, %s4445_s1 }
 0xec4   :  { %1215 = vrot.lane.b32.xlu1 %v1096_v10, %s4445_s1 }
 0xf2a   :  { %v1250_v22 = vpop.permute.xlu1 %1249 }
 0xf2b   :  { %v1252_v3 = vadd.f32 %v1250_v22, %v1242_v21 }
 0xf2d   :  { %4137 = vtanh.f32 %v1252_v3 }
 0xf2e   :  { %v1205_v33 = vpop.permute.xlu1 %1204 }
 0xf2f   :  { %v1207_v44 = vadd.f32 %v1205_v33, %v1197_v14 }
 0xf31   :  { %4139 = vtanh.f32 %v1207_v44  ;;  %v1219_v15 = vsel %vm1072_vm2, %v1207_v44, %v1195_v1 }
 0xf32   :  { %v1260_v36 = vpop.permute.xlu1 %1259 }
 0xf36   :  { %v1216_v12 = vpop.permute.xlu1 %1215 }
 0xf3a   :  { %v4138_v30 = vpop.eup %4137 }
 0xf3b   :  { %1255 = vrot.lane.b32.xlu0 %v4138_v30, %s4444_s4 }
 0xf3e   :  { %v4140_v51 = vpop.eup %4139 }
 0xf3f   :  { %1210 = vrot.lane.b32.xlu0 %v4140_v51, %s4444_s4 }
 0xfad   :  { %v1256_v13 = vpop.permute.xlu0 %1255 }
 0xfae   :  { %v5123_v40 = vmul.f32 %v4134_v59, %v1256_v13  ;;  %v1263_v59 = vsel %vm1021_vm3, %v1252_v3, %v1240_v20 }
 0xfb0   :  { %v1262_v10 = vsel %vm1021_vm3, %v5123_v40, %v1260_v36 }
 0xfb1   :  { %1265 = vrot.lane.b32.xlu0 %v1262_v10, %s4442_s8  ;;  %v1211_v45 = vpop.permute.xlu0 %1210 }
 0xfb2   :  { %v5129_v11 = vmul.f32 %v4136_v16, %v1211_v45 }
 0xfb4   :  { %v1218_v61 = vsel %vm1072_vm2, %v5129_v11, %v1216_v12 }
 0xfb5   :  { %1221 = vrot.lane.b32.xlu1 %v1218_v61, %s4442_s8 }
 0xfb9   :  { %1270 = vrot.lane.b32.xlu1 %v1263_v59, %s4445_s1 }
 0xfbd   :  { %1226 = vrot.lane.b32.xlu1 %v1219_v15, %s4445_s1 }
0x1023   :  { %v1266_v17 = vpop.permute.xlu0 %1265 }
0x1024   :  { %1268 = vst.msk [vmem:[#allocation7] sm:$0xff] %vm127_vm0, %v1266_v17 }
0x1027   :  { %v1222_v16 = vpop.permute.xlu1 %1221 }
0x1028   :  { %1224 = vst.msk [vmem:[#allocation5] sm:$0xff] %vm127_vm0, %v1222_v16 }
0x102b   :  { %v1271_v18 = vpop.permute.xlu1 %1270  ;;  %v1283_v21 = vld [vmem:[#allocation7] sm:$0xff] }
0x102c   :  { %1273 = vst.msk [vmem:[#allocation8] sm:$0xff] %vm127_vm0, %v1271_v18  ;;  %1285 = vrot.lane.b32.xlu0 %v1283_v21, %s4442_s8 }
0x102f   :  { %v1227_v20 = vpop.permute.xlu1 %1226  ;;  %v1282_v1 = vld [vmem:[#allocation5] sm:$0xff] }
0x1030   :  { %1229 = vst.msk [vmem:[#allocation6] sm:$0xff] %vm127_vm0, %v1227_v20 }
0x1033   :  { %v1423_v22 = vld [vmem:[#allocation8] sm:$0xff] }
0x1034   :  { %1425 = vrot.lane.b32.xlu1 %v1423_v22, %s4442_s8 }
0x1037   :  { %v1378_v3 = vld [vmem:[#allocation6] sm:$0xff] }
0x1038   :  { %1380 = vrot.lane.b32.xlu1 %v1378_v3, %s4442_s8 }
0x109e   :  { %v1286_v14 = vpop.permute.xlu0 %1285 }
0x109f   :  { %v1288_v33 = vsel %vm127_vm0, %v1282_v1, %v1286_v14 }
0x10a0   :  { %3921 = vmatmul.mubr.msk.f32.vlgmr.msra.gmra.mxu1 %vm310_vm1, %v1288_v33 }
0x10a1   :  { %1681 = vmatpush1.msra.mxu1 %v5024_v23  ;;  %1728 = vmatprep.mubr.f32.mxu1 %v4441_v0 }
0x10a2   :  { %1682 = vmatprep.subr.mxu1 %v5031_v25 }
0x10a3   :  { %1683 = vmatpush1.msra.mxu1 %v5037_v26 }
0x10a4   :  { %1684 = vmatprep.subr.mxu1 %v5043_v27 }
0x10a5   :  { %1685 = vmatpush1.msra.mxu1 %v5049_v28 }
0x10a6   :  { %1686 = vmatprep.subr.mxu1 %v5055_v57  ;;  %v1426_v30 = vpop.permute.xlu1 %1425 }
0x10a7   :  { %1687 = vmatpush1.msra.mxu1 %v5061_v63 }
0x10a8   :  { %1688 = vmatprep.subr.mxu1 %v5067_v47 }
0x10a9   :  { %1689 = vmatpush1.msra.mxu1 %v5073_v29 }
0x10aa   :  { %1690 = vmatprep.subr.mxu1 %v5079_v48  ;;  %v1381_v10 = vpop.permute.xlu1 %1380 }
0x10ab   :  { %1691 = vmatpush1.msra.mxu1 %v5085_v58 }
0x10ac   :  { %1692 = vmatprep.subr.mxu1 %v5091_v60 }
0x10ad   :  { %1693 = vmatpush1.msra.mxu1 %v5097_v31 }
0x10ae   :  { %1694 = vmatprep.subr.mxu1 %v5103_v5 }
0x10af   :  { %1695 = vmatpush1.msra.mxu1 %v5109_v6 }
0x1160   :  { %v1358_v23 = vpop.f32.mrf.mxu1 }
0x1161   :  { %v1363_v27 = vadd.f32 %v1358_v23, %v4750_v2 }
0x1162   :  { %v1360_v25 = vpop.f32.mrf.mxu1 }
0x1163   :  { %v1364_v26 = vadd.f32 %v1360_v25, %v4740_v55  ;;  %v3922_v47 = vmul.f32 -1.442695, %v1363_v27 }
0x1165   :  { %4141 = vtanh.f32 %v1364_v26  ;;  %v3923_v63 = vmul.f32 -1.442695, %v1364_v26 }
0x1166   :  { %4143 = vtanh.f32 %v1363_v27 }
0x1167   :  { %4145 = vpow2.f32 %v3923_v63 }
0x1168   :  { %4147 = vpow2.f32 %v3922_v47 }
0x1172   :  { %v4142_v28 = vpop.eup %4141 }
0x1173   :  { %1430 = vrot.lane.b32.xlu0 %v4142_v28, %s4444_s4  ;;  %v4144_v57 = vpop.eup %4143 }
0x1174   :  { %v4146_v29 = vpop.eup %4145 }
0x1175   :  { %v1372_v48 = vadd.f32 1.0, %v4146_v29  ;;  %v4148_v58 = vpop.eup %4147 }
0x1176   :  { %v1371_v60 = vadd.f32 1.0, %v4148_v58 }
0x1177   :  { %1385 = vrot.lane.b32.xlu0 %v4144_v57, %s4444_s4  ;;  %4149 = vrcp.f32 %v1372_v48 }
0x1178   :  { %4151 = vrcp.f32 %v1371_v60 }
0x1184   :  { %v4150_v55 = vpop.eup %4149 }
0x1185   :  { %v4152_v5 = vpop.eup %4151  ;;  %v1428_v51 = vmul.f32 %v4150_v55, %v1426_v30 }
0x1186   :  { %v1383_v45 = vmul.f32 %v4152_v5, %v1381_v10 }
0x11e5   :  { %v1431_v2 = vpop.permute.xlu0 %1430 }
0x11e6   :  { %v1433_v31 = vmul.f32 %v4150_v55, %v1431_v2 }
0x11e8   :  { %1435 = vrot.lane.b32.xlu0 %v1433_v31, %s4442_s8 }
0x11e9   :  { %v1386_v6 = vpop.permute.xlu0 %1385 }
0x11ea   :  { %v1388_v44 = vmul.f32 %v4152_v5, %v1386_v6 }
0x11ec   :  { %1390 = vrot.lane.b32.xlu0 %v1388_v44, %s4442_s8 }
0x11f0   :  { %1445 = vrot.lane.b32.xlu0 %v1283_v21, %s4445_s1 }
0x11f4   :  { %1401 = vrot.lane.b32.xlu0 %v1282_v1, %s4445_s1 }
0x125a   :  { %v1436_v36 = vpop.permute.xlu0 %1435 }
0x125b   :  { %v1438_v13 = vadd.f32 %v1436_v36, %v1428_v51 }
0x125d   :  { %4153 = vtanh.f32 %v1438_v13  ;;  %v1449_v14 = vsel %vm823_vm13, %v1438_v13, %v1426_v30 }
0x125e   :  { %v1391_v12 = vpop.permute.xlu0 %1390 }
0x125f   :  { %v1393_v61 = vadd.f32 %v1391_v12, %v1383_v45 }
0x1261   :  { %4155 = vtanh.f32 %v1393_v61  ;;  %v1405_v33 = vsel %vm874_vm12, %v1393_v61, %v1381_v10 }
0x1262   :  { %v1446_v17 = vpop.permute.xlu0 %1445 }
0x1266   :  { %v1402_v3 = vpop.permute.xlu0 %1401 }
0x126a   :  { %v4154_v59 = vpop.eup %4153 }
0x126b   :  { %1441 = vrot.lane.b32.xlu1 %v4154_v59, %s4444_s4 }
0x126e   :  { %v4156_v15 = vpop.eup %4155 }
0x126f   :  { %1396 = vrot.lane.b32.xlu1 %v4156_v15, %s4444_s4 }
0x12dd   :  { %v1442_v16 = vpop.permute.xlu1 %1441 }
0x12de   :  { %v5176_v18 = vmul.f32 %v4150_v55, %v1442_v16 }
0x12e0   :  { %v1448_v21 = vsel %vm823_vm13, %v5176_v18, %v1446_v17 }
0x12e1   :  { %1451 = vrot.lane.b32.xlu1 %v1448_v21, %s4442_s8  ;;  %v1397_v20 = vpop.permute.xlu1 %1396 }
0x12e2   :  { %v5182_v22 = vmul.f32 %v4152_v5, %v1397_v20 }
0x12e4   :  { %v1404_v1 = vsel %vm874_vm12, %v5182_v22, %v1402_v3 }
0x12e5   :  { %1407 = vrot.lane.b32.xlu0 %v1404_v1, %s4442_s8 }
0x12e9   :  { %1456 = vrot.lane.b32.xlu0 %v1449_v14, %s4445_s1 }
0x12ed   :  { %1412 = vrot.lane.b32.xlu0 %v1405_v33, %s4445_s1 }
0x1353   :  { %v1452_v23 = vpop.permute.xlu1 %1451 }
0x1354   :  { %1454 = vst.msk [vmem:[#allocation7] sm:$0xff] %vm127_vm0, %v1452_v23 }
0x1357   :  { %v1408_v25 = vpop.permute.xlu0 %1407 }
0x1358   :  { %1410 = vst.msk [vmem:[#allocation5] sm:$0xff] %vm127_vm0, %v1408_v25 }
0x135b   :  { %v1457_v26 = vpop.permute.xlu0 %1456  ;;  %v1469_v27 = vld [vmem:[#allocation7] sm:$0xff] }
0x135c   :  { %1459 = vst.msk [vmem:[#allocation8] sm:$0xff] %vm127_vm0, %v1457_v26  ;;  %1471 = vrot.lane.b32.xlu1 %v1469_v27, %s4442_s8 }
0x135f   :  { %v1413_v28 = vpop.permute.xlu0 %1412  ;;  %v1468_v47 = vld [vmem:[#allocation5] sm:$0xff] }
0x1360   :  { %1415 = vst.msk [vmem:[#allocation6] sm:$0xff] %vm127_vm0, %v1413_v28 }
0x1363   :  { %v1609_v57 = vld [vmem:[#allocation8] sm:$0xff] }
0x1364   :  { %1611 = vrot.lane.b32.xlu0 %v1609_v57, %s4442_s8 }
0x1367   :  { %v1564_v63 = vld [vmem:[#allocation6] sm:$0xff] }
0x1368   :  { %1566 = vrot.lane.b32.xlu0 %v1564_v63, %s4442_s8 }
0x13ce   :  { %v1472_v29 = vpop.permute.xlu1 %1471 }
0x13cf   :  { %v1474_v48 = vsel %vm127_vm0, %v1468_v47, %v1472_v29 }
0x13d0   :  { %3924 = vmatmul.mubr.msk.f32.vlgmr.msra.gmra.mxu0 %vm310_vm1, %v1474_v48 }
0x13d1   :  { %2010 = vmatprep.mubr.f32.mxu0 %v4441_v0 }
0x13d6   :  { %v1612_v59 = vpop.permute.xlu0 %1611 }
0x13da   :  { %v1567_v21 = vpop.permute.xlu0 %1566 }
0x1490   :  { %v1544_v58 = vpop.f32.mrf.mxu0 }
0x1491   :  { %v1549_v2 = vadd.f32 %v1544_v58, %v4754_v7 }
0x1492   :  { %v1546_v60 = vpop.f32.mrf.mxu0 }
0x1493   :  { %v1550_v55 = vadd.f32 %v1546_v60, %v4734_v50  ;;  %v3925_v44 = vmul.f32 -1.442695, %v1549_v2 }
0x1495   :  { %4157 = vtanh.f32 %v1550_v55  ;;  %v3926_v6 = vmul.f32 -1.442695, %v1550_v55 }
0x1496   :  { %4159 = vtanh.f32 %v1549_v2 }
0x1497   :  { %4161 = vpow2.f32 %v3926_v6 }
0x1498   :  { %4163 = vpow2.f32 %v3925_v44 }
0x14a2   :  { %v4158_v31 = vpop.eup %4157 }
0x14a3   :  { %1616 = vrot.lane.b32.xlu1 %v4158_v31, %s4444_s4  ;;  %v4160_v5 = vpop.eup %4159 }
0x14a4   :  { %v4162_v30 = vpop.eup %4161 }
0x14a5   :  { %v1558_v51 = vadd.f32 1.0, %v4162_v30  ;;  %v4164_v36 = vpop.eup %4163 }
0x14a6   :  { %v1557_v13 = vadd.f32 1.0, %v4164_v36 }
0x14a7   :  { %1571 = vrot.lane.b32.xlu1 %v4160_v5, %s4444_s4  ;;  %4165 = vrcp.f32 %v1558_v51 }
0x14a8   :  { %4167 = vrcp.f32 %v1557_v13 }
0x14b4   :  { %v4166_v50 = vpop.eup %4165 }
0x14b5   :  { %v4168_v45 = vpop.eup %4167  ;;  %v1614_v15 = vmul.f32 %v4166_v50, %v1612_v59 }
0x14b6   :  { %v1569_v20 = vmul.f32 %v4168_v45, %v1567_v21 }
0x1515   :  { %v1617_v7 = vpop.permute.xlu1 %1616 }
0x1516   :  { %v1619_v10 = vmul.f32 %v4166_v50, %v1617_v7 }
0x1518   :  { %1621 = vrot.lane.b32.xlu1 %v1619_v10, %s4442_s8 }
0x1519   :  { %v1572_v12 = vpop.permute.xlu1 %1571 }
0x151a   :  { %v1574_v61 = vmul.f32 %v4168_v45, %v1572_v12 }
0x151c   :  { %1576 = vrot.lane.b32.xlu1 %v1574_v61, %s4442_s8 }
0x1520   :  { %1631 = vrot.lane.b32.xlu1 %v1469_v27, %s4445_s1 }
0x1524   :  { %1587 = vrot.lane.b32.xlu1 %v1468_v47, %s4445_s1 }
0x158a   :  { %v1622_v17 = vpop.permute.xlu1 %1621 }
0x158b   :  { %v1624_v16 = vadd.f32 %v1622_v17, %v1614_v15 }
0x158d   :  { %4169 = vtanh.f32 %v1624_v16  ;;  %v1635_v29 = vsel %vm625_vm9, %v1624_v16, %v1612_v59 }
0x158e   :  { %v1577_v3 = vpop.permute.xlu1 %1576 }
0x158f   :  { %v1579_v1 = vadd.f32 %v1577_v3, %v1569_v20  ;;  %v890_v20 = vsel %vm874_vm12, %v4919_v9, 0.0 }
0x1591   :  { %4171 = vtanh.f32 %v1579_v1  ;;  %v1591_v31 = vsel %vm676_vm8, %v1579_v1, %v1567_v21  ;;  %v1274_v21 = vsel %vm1021_vm3, %v5123_v40, 0.0 }
0x1592   :  { %v1632_v23 = vpop.permute.xlu1 %1631 }
0x1596   :  { %v1588_v63 = vpop.permute.xlu1 %1587 }
0x159a   :  { %v4170_v14 = vpop.eup %4169 }
0x159b   :  { %1627 = vrot.lane.b32.xlu0 %v4170_v14, %s4444_s4 }
0x159e   :  { %v4172_v33 = vpop.eup %4171 }
0x159f   :  { %1582 = vrot.lane.b32.xlu0 %v4172_v33, %s4444_s4 }
0x160d   :  { %v1628_v25 = vpop.permute.xlu0 %1627 }
0x160e   :  { %v1630_v26 = vmul.f32 %v4166_v50, %v1628_v25 }
0x1610   :  { %v1634_v27 = vsel %vm625_vm9, %v1630_v26, %v1632_v23 }
0x1611   :  { %1637 = vrot.lane.b32.xlu0 %v1634_v27, %s4442_s8  ;;  %v1583_v28 = vpop.permute.xlu0 %1582 }
0x1612   :  { %v5217_v57 = vmul.f32 %v4168_v45, %v1583_v28 }
0x1614   :  { %v1590_v47 = vsel %vm676_vm8, %v5217_v57, %v1588_v63 }
0x1615   :  { %1593 = vrot.lane.b32.xlu1 %v1590_v47, %s4442_s8 }
0x1619   :  { %1642 = vrot.lane.b32.xlu1 %v1635_v29, %s4445_s1 }
0x1683   :  { %v1638_v48 = vpop.permute.xlu0 %1637 }
0x1684   :  { %1640 = vst.msk [vmem:[#allocation7] sm:$0xff] %vm127_vm0, %v1638_v48 }
0x1687   :  { %v1594_v58 = vpop.permute.xlu1 %1593 }
0x1688   :  { %1596 = vst.msk [vmem:[#allocation5] sm:$0xff] %vm127_vm0, %v1594_v58 }
0x168b   :  { %v1643_v60 = vpop.permute.xlu1 %1642  ;;  %v1655_v55 = vld [vmem:[#allocation7] sm:$0xff] }
0x168c   :  { %1645 = vst.msk [vmem:[#allocation8] sm:$0xff] %vm127_vm0, %v1643_v60  ;;  %1657 = vrot.lane.b32.xlu0 %v1655_v55, %s4442_s8 }
0x168f   :  { %v5234_v5 = vld [vmem:[#allocation5] sm:$0xff] }
0x1693   :  { %v1795_v2 = vld [vmem:[#allocation8] sm:$0xff] }
0x1694   :  { %1797 = vrot.lane.b32.xlu1 %v1795_v2, %s4442_s8 }
0x1698   :  { %1598 = vrot.lane.b32.xlu1 %v1591_v31, %s4445_s1 }
0x16fe   :  { %v1658_v6 = vpop.permute.xlu0 %1657 }
0x16ff   :  { %v1660_v44 = vsel %vm127_vm0, %v5234_v5, %v1658_v6 }
0x1700   :  { %3927 = vmatmul.mubr.msk.f32.vlgmr.msra.gmra.mxu1 %vm310_vm1, %v1660_v44  ;;  %v1460_v44 = vsel %vm823_vm13, %v5176_v18, 0.0  ;;  %v840_v18 = vsel %vm823_vm13, %v4928_v62, 0.0  ;;  %v1906_v62 = vld [vmem:[%s6166_s5 + $0x60] sm:$0xff] }
0x1701   :  { %2171 = vmatprep.mubr.f32.mxu1 %v4441_v0 }
0x1706   :  { %v5240_v30 = vpop.permute.xlu1 %1797 }
0x170a   :  { %v1599_v51 = vpop.permute.xlu1 %1598 }
0x170b   :  { %1601 = vst.msk [vmem:[#allocation6] sm:$0xff] %vm127_vm0, %v1599_v51  ;;  %v1088_v51 = vsel %vm1072_vm2, %v4987_v8, 0.0 }
0x17c0   :  { %v1730_v36 = vpop.f32.mrf.mxu1 }
0x17c1   :  { %v1735_v13 = vadd.f32 %v1730_v36, %v4758_v19  ;;  %v1750_v19 = vld [vmem:[#allocation6] sm:$0xff]  ;;  %v692_v36 = vsel %vm676_vm8, %v4851_v43, 0.0  ;;  %v642_v43 = vsel %vm625_vm9, %v4860_v56, 0.0  ;;  %v1909_v56 = vld [vmem:[%s6166_s5 + $0x78] sm:$0xff] }
0x17c2   :  { %v1732_v50 = vpop.f32.mrf.mxu1  ;;  %1962 = vmatprep.subr.mxu0 %v1909_v56  ;;  %v5442_v56 = vld [vmem:[#allocation11] sm:$0xff] }
0x17c3   :  { %v1736_v7 = vadd.f32 %v1732_v50, %v4730_v46  ;;  %v1646_v46 = vsel %vm625_vm9, %v1630_v26, 0.0  ;;  %v3928_v3 = vmul.f32 -1.442695, %v1735_v13 }
0x17c5   :  { %4173 = vtanh.f32 %v1736_v7  ;;  %v3929_v45 = vmul.f32 -1.442695, %v1736_v7  ;;  %v1907_v7 = vld [vmem:[%s6166_s5 + $0x68] sm:$0xff] }
0x17c7   :  { %4175 = vpow2.f32 %v3929_v45  ;;  %v1230_v45 = vsel %vm1072_vm2, %v5129_v11, 0.0  ;;  %v1900_v11 = vld [vmem:[%s6166_s5 + $0x30] sm:$0xff] }
0x17d2   :  { %v4174_v10 = vpop.eup %4173 }
0x17d3   :  { %1802 = vrot.lane.b32.xlu0 %v4174_v10, %s4444_s4  ;;  %v1904_v10 = vld [vmem:[%s6166_s5 + $0x50] sm:$0xff] }
0x17d4   :  { %v4176_v12 = vpop.eup %4175 }
0x17d5   :  { %v1744_v61 = vadd.f32 1.0, %v4176_v12  ;;  %v1903_v12 = vld [vmem:[%s6166_s5 + $0x48] sm:$0xff] }
0x17d7   :  { %4177 = vrcp.f32 %v1744_v61  ;;  %v1902_v61 = vld [vmem:[%s6166_s5 + $0x40] sm:$0xff] }
0x17d8   :  { %4179 = vtanh.f32 %v1735_v13  ;;  %v494_v13 = vsel %vm478_vm4, %v4783_v42, 0.0  ;;  %v444_v42 = vsel %vm427_vm5, %v4790_v52, 0.0  ;;  %v1908_v52 = vld [vmem:[%s6166_s5 + $0x70] sm:$0xff] }
0x17d9   :  { %4181 = vpow2.f32 %v3928_v3  ;;  %1963 = vmatpush1.msra.mxu0 %v1908_v52 }
0x17da   :  { %1964 = vmatprep.subr.mxu0 %v1907_v7 }
0x17db   :  { %1965 = vmatpush1.msra.mxu0 %v1906_v62 }
0x17e4   :  { %v4178_v59 = vpop.eup %4177 }
0x17e5   :  { %v4180_v16 = vpop.eup %4179  ;;  %v1800_v14 = vmul.f32 %v4178_v59, %v5240_v30 }
0x17e6   :  { %v4182_v1 = vpop.eup %4181 }
0x17e7   :  { %v1743_v23 = vadd.f32 1.0, %v4182_v1 }
0x1845   :  { %v1803_v15 = vpop.permute.xlu0 %1802 }
0x1846   :  { %v1805_v17 = vmul.f32 %v4178_v59, %v1803_v15  ;;  %v1416_v15 = vsel %vm874_vm12, %v5182_v22, 0.0  ;;  %v1896_v22 = vld [vmem:[%s6166_s5 + $0x10] sm:$0xff] }
0x1848   :  { %1807 = vrot.lane.b32.xlu0 %v1805_v17, %s4442_s8  ;;  %v1899_v17 = vld [vmem:[%s6166_s5 + $0x28] sm:$0xff] }
0x184c   :  { %1757 = vrot.lane.b32.xlu0 %v4180_v16, %s4444_s4  ;;  %v1898_v16 = vld [vmem:[%s6166_s5 + $0x20] sm:$0xff] }
0x1850   :  { %1752 = vrot.lane.b32.xlu0 %v1750_v19, %s4442_s8  ;;  %v1897_v19 = vld [vmem:[%s6166_s5 + $0x18] sm:$0xff] }
0x1854   :  { %1817 = vrot.lane.b32.xlu0 %v1655_v55, %s4445_s1 }
0x1858   :  { %1648 = vrot.lane.b32.xlu0 %v1646_v46, %s4442_s8  ;;  %v1602_v46 = vsel %vm676_vm8, %v5217_v57, 0.0 }
0x185c   :  { %1276 = vrot.lane.b32.xlu0 %v1274_v21, %s4442_s8  ;;  %v1895_v21 = vld [vmem:[%s6166_s5 + $0x8] sm:$0xff] }
0x1860   :  { %892 = vrot.lane.b32.xlu0 %v890_v20, %s4442_s8  ;;  %v1894_v20 = vld [vmem:[%s6166_s5] sm:$0xff] }
0x18ba   :  { %v1808_v33 = vpop.permute.xlu0 %1807 }
0x18bb   :  { %v5262_v25 = vadd.f32 %v1808_v33, %v1800_v14  ;;  %v5383_v33 = vld [vmem:[#allocation11 + $0x78] sm:$0xff] }
0x18bc   :  { %2123 = vmatprep.subr.mxu1 %v5383_v33 }
0x18bd   :  { %4183 = vtanh.f32 %v5262_v25 }
0x18be   :  { %v1758_v40 = vpop.permute.xlu0 %1757  ;;  %4185 = vrcp.f32 %v1743_v23  ;;  %v5388_v23 = vld [vmem:[#allocation11 + $0x70] sm:$0xff] }
0x18bf   :  { %2124 = vmatpush1.msra.mxu1 %v5388_v23 }
0x18c2   :  { %v5265_v26 = vpop.permute.xlu0 %1752 }
0x18c6   :  { %v1818_v27 = vpop.permute.xlu0 %1817 }
0x18ca   :  { %v4184_v28 = vpop.eup %4183  ;;  %v1649_v9 = vpop.permute.xlu0 %1648 }
0x18cb   :  { %1651 = vst.msk [vmem:[#allocation4 + $0x8] sm:$0xff] %vm127_vm0, %v1649_v9  ;;  %1813 = vrot.lane.b32.xlu1 %v4184_v28, %s4444_s4  ;;  %v5269_v63 = vpop.eup %4185 }
0x18cc   :  { %v1760_v47 = vmul.f32 %v5269_v63, %v1758_v40  ;;  %v1755_v55 = vmul.f32 %v5269_v63, %v5265_v26  ;;  %v5390_v40 = vld [vmem:[#allocation11 + $0x68] sm:$0xff] }
0x18cd   :  { %2125 = vmatprep.subr.mxu1 %v5390_v40 }
0x18ce   :  { %v1277_v29 = vpop.permute.xlu0 %1276 }
0x18cf   :  { %1279 = vst.msk [vmem:[#allocation4 + $0x18] sm:$0xff] %vm127_vm0, %v1277_v29  ;;  %1762 = vrot.lane.b32.xlu1 %v1760_v47, %s4442_s8  ;;  %v5398_v47 = vld [vmem:[#allocation11 + $0x58] sm:$0xff]  ;;  %v5403_v29 = vld [vmem:[#allocation11 + $0x50] sm:$0xff] }
0x18d2   :  { %v893_v48 = vpop.permute.xlu0 %892  ;;  %v1847_v9 = vld [vmem:[#allocation4 + $0x8] sm:$0xff] }
0x18d3   :  { %895 = vst.msk [vmem:[#allocation4 + $0x28] sm:$0xff] %vm127_vm0, %v893_v48  ;;  %v5405_v48 = vld [vmem:[#allocation11 + $0x48] sm:$0xff] }
0x193d   :  { %v1814_v58 = vpop.permute.xlu1 %1813 }
0x193e   :  { %v1816_v60 = vmul.f32 %v4178_v59, %v1814_v58  ;;  %v1901_v59 = vld [vmem:[%s6166_s5 + $0x38] sm:$0xff]  ;;  %v5409_v58 = vld [vmem:[#allocation11 + $0x40] sm:$0xff] }
0x1940   :  { %v1832_v2 = vsel %vm427_vm5, %v1816_v60, 0.0  ;;  %v1820_v8 = vsel %vm427_vm5, %v1816_v60, %v1818_v27  ;;  %v5395_v27 = vld [vmem:[#allocation11 + $0x60] sm:$0xff] }
0x1941   :  { %1834 = vrot.lane.b32.xlu1 %v1832_v2, %s4442_s8  ;;  %v1763_v31 = vpop.permute.xlu1 %1762  ;;  %2126 = vmatpush1.msra.mxu1 %v5395_v27  ;;  %v5412_v2 = vld [vmem:[#allocation11 + $0x38] sm:$0xff] }
0x1942   :  { %v5280_v6 = vadd.f32 %v1763_v31, %v1755_v55  ;;  %2127 = vmatprep.subr.mxu1 %v5398_v47 }
0x1943   :  { %2128 = vmatpush1.msra.mxu1 %v5403_v29 }
0x1944   :  { %4187 = vtanh.f32 %v5280_v6  ;;  %2129 = vmatprep.subr.mxu1 %v5405_v48 }
0x1945   :  { %1462 = vrot.lane.b32.xlu1 %v1460_v44, %s4442_s8  ;;  %2130 = vmatpush1.msra.mxu1 %v5409_v58  ;;  %v5417_v44 = vld [vmem:[#allocation11 + $0x30] sm:$0xff] }
0x1946   :  { %2131 = vmatprep.subr.mxu1 %v5412_v2 }
0x1947   :  { %2132 = vmatpush1.msra.mxu1 %v5417_v44 }
0x1949   :  { %1090 = vrot.lane.b32.xlu1 %v1088_v51, %s4442_s8  ;;  %v5419_v51 = vld [vmem:[#allocation11 + $0x28] sm:$0xff] }
0x194a   :  { %2133 = vmatprep.subr.mxu1 %v5419_v51 }
0x194d   :  { %694 = vrot.lane.b32.xlu1 %v692_v36, %s4442_s8 }
0x1951   :  { %v4188_v50 = vpop.eup %4187  ;;  %496 = vrot.lane.b32.xlu1 %v494_v13, %s4442_s8  ;;  %v5424_v13 = vld [vmem:[#allocation11 + $0x20] sm:$0xff] }
0x1952   :  { %1768 = vrot.lane.b32.xlu0 %v4188_v50, %s4444_s4  ;;  %2134 = vmatpush1.msra.mxu1 %v5424_v13 }
0x1955   :  { %1823 = vrot.lane.b32.xlu1 %v1820_v8, %s4442_s8 }
0x1956   :  { %1773 = vrot.lane.b32.xlu0 %v5234_v5, %s4445_s1  ;;  %v1038_v5 = vsel %vm1021_vm3, %v4996_v35, 0.0  ;;  %v1905_v35 = vld [vmem:[%s6166_s5 + $0x58] sm:$0xff] }
0x1957   :  { %1966 = vmatprep.subr.mxu0 %v1905_v35 }
0x1958   :  { %1967 = vmatpush1.msra.mxu0 %v1904_v10  ;;  %v1851_v10 = vld [vmem:[#allocation4 + $0x28] sm:$0xff] }
0x1959   :  { %644 = vrot.lane.b32.xlu1 %v642_v43, %s4442_s8  ;;  %1968 = vmatprep.subr.mxu0 %v1903_v12  ;;  %v1849_v43 = vld [vmem:[#allocation4 + $0x18] sm:$0xff] }
0x195a   :  { %446 = vrot.lane.b32.xlu0 %v444_v42, %s4442_s8  ;;  %1969 = vmatpush1.msra.mxu0 %v1902_v61  ;;  %v5429_v42 = vld [vmem:[#allocation11 + $0x18] sm:$0xff] }
0x195b   :  { %1970 = vmatprep.subr.mxu0 %v1901_v59  ;;  %2135 = vmatprep.subr.mxu1 %v5429_v42  ;;  %v1821_v59 = vsel %vm427_vm5, %v5262_v25, %v5240_v30 }
0x195c   :  { %1971 = vmatpush1.msra.mxu0 %v1900_v11 }
0x195d   :  { %1972 = vmatprep.subr.mxu0 %v1899_v17  ;;  %v1777_v17 = vsel %vm478_vm4, %v5280_v6, %v5265_v26 }
0x195e   :  { %842 = vrot.lane.b32.xlu0 %v840_v18, %s4442_s8  ;;  %1973 = vmatpush1.msra.mxu0 %v1898_v16  ;;  %v5434_v18 = vld [vmem:[#allocation11 + $0x10] sm:$0xff] }
0x195f   :  { %1974 = vmatprep.subr.mxu0 %v1897_v19  ;;  %2136 = vmatpush1.msra.mxu1 %v5434_v18 }
0x1960   :  { %1975 = vmatpush1.msra.mxu0 %v1896_v22 }
0x1961   :  { %1976 = vmatprep.subr.mxu0 %v1895_v21 }
0x1962   :  { %1040 = vrot.lane.b32.xlu0 %v1038_v5, %s4442_s8  ;;  %1977 = vmatpush1.msra.mxu0 %v1894_v20  ;;  %v5436_v5 = vld [vmem:[#allocation11 + $0x8] sm:$0xff] }
0x1963   :  { %2495 = vmatprep.subr.mxu0 %v5383_v33  ;;  %2137 = vmatprep.subr.mxu1 %v5436_v5 }
0x1964   :  { %2138 = vmatpush1.msra.mxu1 %v5442_v56 }
0x1965   :  { %2309 = vmatprep.subr.mxu1 %v5383_v33 }
0x1966   :  { %1232 = vrot.lane.b32.xlu0 %v1230_v45, %s4442_s8 }
0x196a   :  { %1418 = vrot.lane.b32.xlu0 %v1416_v15, %s4442_s8 }
0x196e   :  { %1604 = vrot.lane.b32.xlu0 %v1602_v46, %s4442_s8 }
0x19b3   :  { %v1835_v3 = vpop.permute.xlu1 %1834 }
0x19b4   :  { %1837 = vst.msk [vmem:[#allocation4] sm:$0xff] %vm127_vm0, %v1835_v3 }
0x19b7   :  { %v1463_v1 = vpop.permute.xlu1 %1462 }
0x19b8   :  { %1465 = vst.msk [vmem:[#allocation4 + $0x10] sm:$0xff] %vm127_vm0, %v1463_v1 }
0x19bb   :  { %v1091_v57 = vpop.permute.xlu1 %1090  ;;  %v1846_v14 = vld [vmem:[#allocation4] sm:$0xff] }
0x19bc   :  { %1093 = vst.msk [vmem:[#allocation4 + $0x20] sm:$0xff] %vm127_vm0, %v1091_v57  ;;  %1862 = vrot.lane.b32.xlu1 %v1846_v14, %s4442_s8 }
0x19bf   :  { %v695_v28 = vpop.permute.xlu1 %694  ;;  %v1848_v55 = vld [vmem:[#allocation4 + $0x10] sm:$0xff] }
0x19c0   :  { %697 = vst.msk [vmem:[#allocation4 + $0x30] sm:$0xff] %vm127_vm0, %v695_v28  ;;  %1864 = vrot.lane.b32.xlu1 %v1847_v9, %s4442_s8 }
0x19c3   :  { %v497_v60 = vpop.permute.xlu1 %496  ;;  %v1850_v62 = vld [vmem:[#allocation4 + $0x20] sm:$0xff] }
0x19c4   :  { %499 = vst.msk [vmem:[#allocation4 + $0x38] sm:$0xff] %vm127_vm0, %v497_v60  ;;  %v1769_v31 = vpop.permute.xlu0 %1768  ;;  %1866 = vrot.lane.b32.xlu1 %v1848_v55, %s4442_s8 }
0x19c5   :  { %v1771_v36 = vmul.f32 %v5269_v63, %v1769_v31 }
0x19c7   :  { %v1824_v50 = vpop.permute.xlu1 %1823  ;;  %v1788_v8 = vsel %vm478_vm4, %v1771_v36, 0.0  ;;  %v1852_v61 = vld [vmem:[#allocation4 + $0x30] sm:$0xff] }
0x19c8   :  { %1826 = vst.msk [vmem:[#allocation7] sm:$0xff] %vm127_vm0, %v1824_v50  ;;  %1790 = vrot.lane.b32.xlu0 %v1788_v8, %s4442_s8  ;;  %v1774_v63 = vpop.permute.xlu0 %1773  ;;  %1868 = vrot.lane.b32.xlu1 %v1849_v43, %s4442_s8 }
0x19c9   :  { %2093 = vst.msk [vmem:[#allocation7] sm:$0xff] %vm127_vm0, %v4441_v0  ;;  %v1776_v52 = vsel %vm478_vm4, %v1771_v36, %v1774_v63 }
0x19cb   :  { %v645_v7 = vpop.permute.xlu1 %644  ;;  %v1853_v45 = vld [vmem:[#allocation4 + $0x38] sm:$0xff] }
0x19cc   :  { %647 = vst.msk [vmem:[#allocation3 + $0x8] sm:$0xff] %vm127_vm0, %v645_v7  ;;  %1779 = vrot.lane.b32.xlu0 %v1776_v52, %s4442_s8  ;;  %v447_v35 = vpop.permute.xlu0 %446  ;;  %1870 = vrot.lane.b32.xlu1 %v1850_v62, %s4442_s8 }
0x19cd   :  { %449 = vst.msk [vmem:[#allocation3] sm:$0xff] %vm127_vm0, %v447_v35 }
0x19d0   :  { %v843_v12 = vpop.permute.xlu0 %842  ;;  %1872 = vrot.lane.b32.xlu1 %v1851_v10, %s4442_s8  ;;  %1876 = vrot.lane.b32.xlu0 %v1853_v45, %s4442_s8  ;;  %v5463_v15 = vld [vmem:[#allocation7] sm:$0xff] }
0x19d1   :  { %845 = vst.msk [vmem:[#allocation3 + $0x10] sm:$0xff] %vm127_vm0, %v843_v12 }
0x19d3   :  { %v1839_v26 = vld [vmem:[#allocation3 + $0x8] sm:$0xff] }
0x19d4   :  { %v1041_v11 = vpop.permute.xlu0 %1040  ;;  %1874 = vrot.lane.b32.xlu1 %v1852_v61, %s4442_s8  ;;  %1828 = vrot.lane.b32.xlu0 %v1821_v59, %s4445_s1  ;;  %v1838_v19 = vld [vmem:[#allocation3] sm:$0xff] }
0x19d5   :  { %1043 = vst.msk [vmem:[#allocation3 + $0x18] sm:$0xff] %vm127_vm0, %v1041_v11 }
0x19d8   :  { %v1233_v16 = vpop.permute.xlu0 %1232  ;;  %1784 = vrot.lane.b32.xlu0 %v1777_v17, %s4445_s1  ;;  %2100 = vrot.lane.b32.xlu1 %v5463_v15, %s4442_s8  ;;  %v1840_v20 = vld [vmem:[#allocation3 + $0x10] sm:$0xff] }
0x19d9   :  { %1235 = vst.msk [vmem:[#allocation3 + $0x20] sm:$0xff] %vm127_vm0, %v1233_v16 }
0x19dc   :  { %v1419_v30 = vpop.permute.xlu0 %1418  ;;  %v1841_v14 = vld [vmem:[#allocation3 + $0x18] sm:$0xff] }
0x19dd   :  { %1421 = vst.msk [vmem:[#allocation3 + $0x28] sm:$0xff] %vm127_vm0, %v1419_v30  ;;  %v1910_v30 = vld [vmem:[%s6168_s7] sm:$0x3] }
0x19e0   :  { %v1605_v25 = vpop.permute.xlu0 %1604  ;;  %v1842_v55 = vld [vmem:[#allocation3 + $0x20] sm:$0xff] }
0x19e1   :  { %1607 = vst.msk [vmem:[#allocation3 + $0x30] sm:$0xff] %vm127_vm0, %v1605_v25  ;;  %v1919_v25 = vrot.slane %v1910_v30, %v123_v39 }
0x19e4   :  { %v1843_v8 = vld [vmem:[#allocation3 + $0x28] sm:$0xff] }
0x19e8   :  { %v1844_v7 = vld [vmem:[#allocation3 + $0x30] sm:$0xff] }
0x1a2e   :  { %v1863_v22 = vpop.permute.xlu1 %1862 }
0x1a2f   :  { %v1886_v46 = vsel %vm127_vm0, %v1838_v19, %v1863_v22 }
0x1a30   :  { %3930 = vmatmul.mubr.msk.f32.vlgmr.msra.gmra.mxu0 %vm310_vm1, %v1886_v46  ;;  %v1915_v46 = vrot.slane %v1910_v30, %v119_v41 }
0x1a31   :  { %2016 = vmatprep.mubr.f32.mxu0 %v4441_v0  ;;  %2496 = vmatpush1.msra.mxu0 %v5388_v23 }
0x1a32   :  { %v1865_v6 = vpop.permute.xlu1 %1864  ;;  %2497 = vmatprep.subr.mxu0 %v5390_v40 }
0x1a33   :  { %v1887_v21 = vsel %vm127_vm0, %v1839_v26, %v1865_v6  ;;  %2498 = vmatpush1.msra.mxu0 %v5395_v27 }
0x1a34   :  { %3931 = vmatmul.mubr.msk.f32.gmra.mxu0 %vm310_vm1, %v1887_v21  ;;  %2499 = vmatprep.subr.mxu0 %v5398_v47 }
0x1a35   :  { %2022 = vmatprep.mubr.f32.mxu0 %v4441_v0  ;;  %2500 = vmatpush1.msra.mxu0 %v5403_v29 }
0x1a36   :  { %v1867_v3 = vpop.permute.xlu1 %1866  ;;  %2501 = vmatprep.subr.mxu0 %v5405_v48 }
0x1a37   :  { %v1888_v1 = vsel %vm127_vm0, %v1840_v20, %v1867_v3  ;;  %2502 = vmatpush1.msra.mxu0 %v5409_v58 }
0x1a38   :  { %3932 = vmatmul.mubr.msk.f32.gmra.mxu0 %vm310_vm1, %v1888_v1  ;;  %2503 = vmatprep.subr.mxu0 %v5412_v2 }
0x1a39   :  { %2028 = vmatprep.mubr.f32.mxu0 %v4441_v0  ;;  %2504 = vmatpush1.msra.mxu0 %v5417_v44 }
0x1a3a   :  { %v1791_v57 = vpop.permute.xlu0 %1790  ;;  %v1869_v28 = vpop.permute.xlu1 %1868  ;;  %2505 = vmatprep.subr.mxu0 %v5419_v51 }
0x1a3b   :  { %1793 = vst.msk [vmem:[#allocation3 + $0x38] sm:$0xff] %vm127_vm0, %v1791_v57  ;;  %v1889_v9 = vsel %vm127_vm0, %v1841_v14, %v1869_v28  ;;  %2506 = vmatpush1.msra.mxu0 %v5424_v13 }
0x1a3c   :  { %3933 = vmatmul.mubr.msk.f32.gmra.mxu0 %vm310_vm1, %v1889_v9  ;;  %2507 = vmatprep.subr.mxu0 %v5429_v42 }
0x1a3d   :  { %2034 = vmatprep.mubr.f32.mxu0 %v4441_v0  ;;  %2508 = vmatpush1.msra.mxu0 %v5434_v18 }
0x1a3e   :  { %v1780_v60 = vpop.permute.xlu0 %1779  ;;  %v1871_v31 = vpop.permute.xlu1 %1870  ;;  %2509 = vmatprep.subr.mxu0 %v5436_v5 }
0x1a3f   :  { %1782 = vst.msk [vmem:[#allocation5] sm:$0xff] %vm127_vm0, %v1780_v60  ;;  %v1890_v36 = vsel %vm127_vm0, %v1842_v55, %v1871_v31  ;;  %2510 = vmatpush1.msra.mxu0 %v5442_v56 }
0x1a40   :  { %2091 = vst.msk [vmem:[#allocation5] sm:$0xff] %vm127_vm0, %v4441_v0  ;;  %3934 = vmatmul.mubr.msk.f32.gmra.mxu0 %vm310_vm1, %v1890_v36  ;;  %2867 = vmatprep.subr.mxu0 %v5383_v33 }
0x1a41   :  { %2040 = vmatprep.mubr.f32.mxu0 %v4441_v0 }
0x1a42   :  { %v1877_v50 = vpop.permute.xlu0 %1876  ;;  %v1873_v43 = vpop.permute.xlu1 %1872  ;;  %v1845_v10 = vld [vmem:[#allocation3 + $0x38] sm:$0xff] }
0x1a43   :  { %v1891_v63 = vsel %vm127_vm0, %v1843_v8, %v1873_v43  ;;  %v1893_v59 = vsel %vm127_vm0, %v1845_v10, %v1877_v50 }
0x1a44   :  { %3935 = vmatmul.mubr.msk.f32.gmra.mxu0 %vm310_vm1, %v1891_v63 }
0x1a45   :  { %2046 = vmatprep.mubr.f32.mxu0 %v4441_v0 }
0x1a46   :  { %v1829_v52 = vpop.permute.xlu0 %1828  ;;  %v1875_v62 = vpop.permute.xlu1 %1874 }
0x1a47   :  { %1831 = vst.msk [vmem:[#allocation8] sm:$0xff] %vm127_vm0, %v1829_v52  ;;  %v1892_v35 = vsel %vm127_vm0, %v1844_v7, %v1875_v62  ;;  %v5518_v45 = vld [vmem:[#allocation5] sm:$0xff] }
0x1a48   :  { %2094 = vst.msk [vmem:[#allocation8] sm:$0xff] %vm127_vm0, %v4441_v0  ;;  %3936 = vmatmul.mubr.msk.f32.gmra.mxu0 %vm310_vm1, %v1892_v35 }
0x1a49   :  { %2052 = vmatprep.mubr.f32.mxu0 %v4441_v0 }
0x1a4a   :  { %v1785_v12 = vpop.permute.xlu0 %1784  ;;  %v2101_v61 = vpop.permute.xlu1 %2100 }
0x1a4b   :  { %1787 = vst.msk [vmem:[#allocation6] sm:$0xff] %vm127_vm0, %v1785_v12  ;;  %v2103_v11 = vsel %vm127_vm0, %v5518_v45, %v2101_v61 }
0x1a4c   :  { %2092 = vst.msk [vmem:[#allocation6] sm:$0xff] %vm127_vm0, %v4441_v0  ;;  %3937 = vmatmul.mubr.msk.f32.gmra.mxu0 %vm310_vm1, %v1893_v59  ;;  %3938 = vmatmul.mubr.msk.f32.vlgmr.msra.gmra.mxu1 %vm310_vm1, %v2103_v11 }
0x1a4d   :  { %2310 = vmatpush1.msra.mxu1 %v5388_v23  ;;  %2357 = vmatprep.mubr.f32.mxu1 %v4441_v0 }
0x1a4e   :  { %2311 = vmatprep.subr.mxu1 %v5390_v40  ;;  %2543 = vmatprep.mubr.f32.mxu0 %v4441_v0 }
0x1a4f   :  { %v2238_v17 = vld [vmem:[#allocation8] sm:$0xff]  ;;  %2312 = vmatpush1.msra.mxu1 %v5395_v27 }
0x1a50   :  { %2240 = vrot.lane.b32.xlu0 %v2238_v17, %s4442_s8  ;;  %2313 = vmatprep.subr.mxu1 %v5398_v47 }
0x1a51   :  { %2314 = vmatpush1.msra.mxu1 %v5403_v29 }
0x1a52   :  { %2315 = vmatprep.subr.mxu1 %v5405_v48 }
0x1a53   :  { %v2193_v16 = vld [vmem:[#allocation6] sm:$0xff]  ;;  %2316 = vmatpush1.msra.mxu1 %v5409_v58 }
0x1a54   :  { %2195 = vrot.lane.b32.xlu0 %v2193_v16, %s4442_s8  ;;  %2317 = vmatprep.subr.mxu1 %v5412_v2 }
0x1a55   :  { %2318 = vmatpush1.msra.mxu1 %v5417_v44 }
0x1a56   :  { %2319 = vmatprep.subr.mxu1 %v5419_v51 }
0x1a57   :  { %2320 = vmatpush1.msra.mxu1 %v5424_v13 }
0x1a58   :  { %2321 = vmatprep.subr.mxu1 %v5429_v42 }
0x1a59   :  { %2322 = vmatpush1.msra.mxu1 %v5434_v18 }
0x1a5a   :  { %2323 = vmatprep.subr.mxu1 %v5436_v5 }
0x1a5b   :  { %2324 = vmatpush1.msra.mxu1 %v5442_v56 }
0x1a5c   :  { %2681 = vmatprep.subr.mxu1 %v5383_v33 }
0x1af0   :  { %v2012_v19 = vpop.f32.mrf.mxu0 }
0x1af1   :  { %v2013_v16 = vadd.f32 %v2012_v19, %v1915_v46 }
0x1af2   :  { %v2014_v22 = vpop.f32.mrf.mxu0 }
0x1af3   :  { %v5556_v26 = vadd.f32 %v2014_v22, %v1919_v25 }
0x1af4   :  { %v2018_v6 = vpop.f32.mrf.mxu0 }
0x1af5   :  { %v5558_v21 = vadd.f32 %v2018_v6, %v1915_v46 }
0x1af6   :  { %v2020_v20 = vpop.f32.mrf.mxu0 }
0x1af7   :  { %v5560_v3 = vadd.f32 %v2020_v20, %v1919_v25 }
0x1af8   :  { %v2024_v1 = vpop.f32.mrf.mxu0 }
0x1af9   :  { %v5562_v57 = vadd.f32 %v2024_v1, %v1915_v46 }
0x1afa   :  { %v2026_v14 = vpop.f32.mrf.mxu0 }
0x1afb   :  { %v5564_v28 = vadd.f32 %v2026_v14, %v1919_v25 }
0x1afc   :  { %v2030_v39 = vpop.f32.mrf.mxu0 }
0x1afd   :  { %v5566_v9 = vadd.f32 %v2030_v39, %v1915_v46 }
0x1afe   :  { %v2032_v60 = vpop.f32.mrf.mxu0 }
0x1aff   :  { %v5568_v38 = vadd.f32 %v2032_v60, %v1919_v25 }
0x1b00   :  { %v2036_v41 = vpop.f32.mrf.mxu0 }
0x1b01   :  { %v5570_v55 = vadd.f32 %v2036_v41, %v1915_v46 }
0x1b02   :  { %v2038_v31 = vpop.f32.mrf.mxu0 }
0x1b03   :  { %v5572_v36 = vadd.f32 %v2038_v31, %v1919_v25 }
0x1b04   :  { %v2042_v50 = vpop.f32.mrf.mxu0 }
0x1b05   :  { %v5574_v8 = vadd.f32 %v2042_v50, %v1915_v46 }
0x1b06   :  { %v2044_v43 = vpop.f32.mrf.mxu0 }
0x1b07   :  { %v5576_v63 = vadd.f32 %v2044_v43, %v1919_v25 }
0x1b08   :  { %v2048_v52 = vpop.f32.mrf.mxu0 }
0x1b09   :  { %v5578_v7 = vadd.f32 %v2048_v52, %v1915_v46 }
0x1b0a   :  { %v2050_v62 = vpop.f32.mrf.mxu0 }
0x1b0b   :  { %v5580_v35 = vadd.f32 %v2050_v62, %v1919_v25  ;;  %v2241_v62 = vpop.permute.xlu0 %2240 }
0x1b0c   :  { %v2054_v10 = vpop.f32.mrf.mxu0  ;;  %v2173_v12 = vpop.f32.mrf.mxu1 }
0x1b0d   :  { %v5582_v61 = vadd.f32 %v2054_v10, %v1915_v46  ;;  %v2178_v22 = vadd.f32 %v2173_v12, %v2013_v16 }
0x1b0e   :  { %v2056_v59 = vpop.f32.mrf.mxu0  ;;  %v2175_v17 = vpop.f32.mrf.mxu1 }
0x1b0f   :  { %v2057_v11 = vadd.f32 %v2056_v59, %v1919_v25  ;;  %v3939_v14 = vmul.f32 -1.442695, %v2178_v22  ;;  %v2196_v12 = vpop.permute.xlu0 %2195 }
0x1b11   :  { %v2179_v30 = vadd.f32 %v2175_v17, %v2057_v11 }
0x1b13   :  { %4189 = vtanh.f32 %v2179_v30  ;;  %v3940_v1 = vmul.f32 -1.442695, %v2179_v30 }
0x1b14   :  { %4191 = vtanh.f32 %v2178_v22 }
0x1b15   :  { %4193 = vpow2.f32 %v3940_v1 }
0x1b16   :  { %4195 = vpow2.f32 %v3939_v14 }
0x1b20   :  { %v4190_v6 = vpop.eup %4189 }
0x1b21   :  { %2245 = vrot.lane.b32.xlu1 %v4190_v6, %s4444_s4  ;;  %v4192_v20 = vpop.eup %4191 }
0x1b22   :  { %v4194_v39 = vpop.eup %4193 }
0x1b23   :  { %v2187_v60 = vadd.f32 1.0, %v4194_v39  ;;  %v4196_v41 = vpop.eup %4195 }
0x1b24   :  { %v2186_v25 = vadd.f32 1.0, %v4196_v41 }
0x1b25   :  { %2200 = vrot.lane.b32.xlu1 %v4192_v20, %s4444_s4  ;;  %4197 = vrcp.f32 %v2187_v60 }
0x1b26   :  { %4199 = vrcp.f32 %v2186_v25 }
0x1b32   :  { %v4198_v19 = vpop.eup %4197 }
0x1b33   :  { %v4200_v50 = vpop.eup %4199  ;;  %v2243_v10 = vmul.f32 %v4198_v19, %v2241_v62 }
0x1b34   :  { %v2198_v17 = vmul.f32 %v4200_v50, %v2196_v12 }
0x1b93   :  { %v2246_v46 = vpop.permute.xlu1 %2245 }
0x1b94   :  { %v2248_v31 = vmul.f32 %v4198_v19, %v2246_v46 }
0x1b96   :  { %2250 = vrot.lane.b32.xlu1 %v2248_v31, %s4442_s8 }
0x1b97   :  { %v2201_v43 = vpop.permute.xlu1 %2200 }
0x1b98   :  { %v2203_v52 = vmul.f32 %v4200_v50, %v2201_v43 }
0x1b9a   :  { %2205 = vrot.lane.b32.xlu1 %v2203_v52, %s4442_s8 }
0x1b9e   :  { %2260 = vrot.lane.b32.xlu1 %v5463_v15, %s4445_s1 }
0x1ba2   :  { %2216 = vrot.lane.b32.xlu1 %v5518_v45, %s4445_s1 }
0x1c08   :  { %v2251_v59 = vpop.permute.xlu1 %2250 }
0x1c09   :  { %v2253_v11 = vadd.f32 %v2251_v59, %v2243_v10 }
0x1c0b   :  { %4201 = vtanh.f32 %v2253_v11  ;;  %v2264_v25 = vsel %vm478_vm4, %v2253_v11, %v2241_v62 }
0x1c0c   :  { %v2206_v16 = vpop.permute.xlu1 %2205 }
0x1c0d   :  { %v2208_v30 = vadd.f32 %v2206_v16, %v2198_v17 }
0x1c0f   :  { %4203 = vtanh.f32 %v2208_v30 }
0x1c10   :  { %v2261_v15 = vpop.permute.xlu1 %2260 }
0x1c14   :  { %v2217_v39 = vpop.permute.xlu1 %2216 }
0x1c18   :  { %v4202_v22 = vpop.eup %4201 }
0x1c19   :  { %2256 = vrot.lane.b32.xlu0 %v4202_v22, %s4444_s4 }
0x1c1c   :  { %v4204_v6 = vpop.eup %4203 }
0x1c1d   :  { %2211 = vrot.lane.b32.xlu0 %v4204_v6, %s4444_s4 }
0x1c8b   :  { %v2257_v20 = vpop.permute.xlu0 %2256 }
0x1c8c   :  { %v5594_v1 = vmul.f32 %v4198_v19, %v2257_v20  ;;  %v2220_v19 = vsel %vm427_vm5, %v2208_v30, %v2196_v12 }
0x1c8e   :  { %v2263_v45 = vsel %vm478_vm4, %v5594_v1, %v2261_v15 }
0x1c8f   :  { %2266 = vrot.lane.b32.xlu0 %v2263_v45, %s4442_s8  ;;  %v2212_v14 = vpop.permute.xlu0 %2211 }
0x1c90   :  { %v5600_v60 = vmul.f32 %v4200_v50, %v2212_v14 }
0x1c92   :  { %v2219_v41 = vsel %vm427_vm5, %v5600_v60, %v2217_v39  ;;  %v2231_v32 = vsel %vm427_vm5, %v5600_v60, 0.0 }
0x1c93   :  { %2222 = vrot.lane.b32.xlu1 %v2219_v41, %s4442_s8 }
0x1c97   :  { %2271 = vrot.lane.b32.xlu1 %v2264_v25, %s4445_s1 }
0x1c9b   :  { %2227 = vrot.lane.b32.xlu1 %v2220_v19, %s4445_s1 }
0x1d01   :  { %v2267_v46 = vpop.permute.xlu0 %2266 }
0x1d02   :  { %2269 = vst.msk [vmem:[#allocation7] sm:$0xff] %vm127_vm0, %v2267_v46 }
0x1d05   :  { %v2223_v31 = vpop.permute.xlu1 %2222 }
0x1d06   :  { %2225 = vst.msk [vmem:[#allocation5] sm:$0xff] %vm127_vm0, %v2223_v31 }
0x1d09   :  { %v2272_v50 = vpop.permute.xlu1 %2271  ;;  %v2284_v43 = vld [vmem:[#allocation7] sm:$0xff] }
0x1d0a   :  { %2274 = vst.msk [vmem:[#allocation8] sm:$0xff] %vm127_vm0, %v2272_v50  ;;  %2286 = vrot.lane.b32.xlu0 %v2284_v43, %s4442_s8 }
0x1d0d   :  { %v2228_v52 = vpop.permute.xlu1 %2227  ;;  %v2283_v12 = vld [vmem:[#allocation5] sm:$0xff] }
0x1d0e   :  { %2230 = vst.msk [vmem:[#allocation6] sm:$0xff] %vm127_vm0, %v2228_v52 }
0x1d11   :  { %v2424_v62 = vld [vmem:[#allocation8] sm:$0xff] }
0x1d12   :  { %2426 = vrot.lane.b32.xlu1 %v2424_v62, %s4442_s8 }
0x1d15   :  { %v2379_v10 = vld [vmem:[#allocation6] sm:$0xff] }
0x1d16   :  { %2381 = vrot.lane.b32.xlu1 %v2379_v10, %s4442_s8 }
0x1d7c   :  { %v2287_v59 = vpop.permute.xlu0 %2286 }
0x1d7d   :  { %v2289_v11 = vsel %vm127_vm0, %v2283_v12, %v2287_v59 }
0x1d7e   :  { %3941 = vmatmul.mubr.msk.f32.vlgmr.msra.gmra.mxu1 %vm310_vm1, %v2289_v11 }
0x1d7f   :  { %2682 = vmatpush1.msra.mxu1 %v5388_v23  ;;  %2729 = vmatprep.mubr.f32.mxu1 %v4441_v0 }
0x1d80   :  { %2683 = vmatprep.subr.mxu1 %v5390_v40 }
0x1d81   :  { %2684 = vmatpush1.msra.mxu1 %v5395_v27 }
0x1d82   :  { %2685 = vmatprep.subr.mxu1 %v5398_v47 }
0x1d83   :  { %2686 = vmatpush1.msra.mxu1 %v5403_v29 }
0x1d84   :  { %2687 = vmatprep.subr.mxu1 %v5405_v48  ;;  %v2427_v52 = vpop.permute.xlu1 %2426 }
0x1d85   :  { %2688 = vmatpush1.msra.mxu1 %v5409_v58 }
0x1d86   :  { %2689 = vmatprep.subr.mxu1 %v5412_v2 }
0x1d87   :  { %2690 = vmatpush1.msra.mxu1 %v5417_v44 }
0x1d88   :  { %2691 = vmatprep.subr.mxu1 %v5419_v51  ;;  %v2382_v11 = vpop.permute.xlu1 %2381 }
0x1d89   :  { %2692 = vmatpush1.msra.mxu1 %v5424_v13 }
0x1d8a   :  { %2693 = vmatprep.subr.mxu1 %v5429_v42 }
0x1d8b   :  { %2694 = vmatpush1.msra.mxu1 %v5434_v18 }
0x1d8c   :  { %2695 = vmatprep.subr.mxu1 %v5436_v5 }
0x1d8d   :  { %2696 = vmatpush1.msra.mxu1 %v5442_v56 }
0x1d8e   :  { %3053 = vmatprep.subr.mxu1 %v5383_v33 }
0x1e3e   :  { %v2359_v17 = vpop.f32.mrf.mxu1 }
0x1e3f   :  { %v2364_v22 = vadd.f32 %v2359_v17, %v5558_v21 }
0x1e40   :  { %v2361_v16 = vpop.f32.mrf.mxu1 }
0x1e41   :  { %v2365_v30 = vadd.f32 %v2361_v16, %v5580_v35  ;;  %v3942_v45 = vmul.f32 -1.442695, %v2364_v22 }
0x1e43   :  { %4205 = vtanh.f32 %v2365_v30  ;;  %v3943_v20 = vmul.f32 -1.442695, %v2365_v30 }
0x1e44   :  { %4207 = vtanh.f32 %v2364_v22 }
0x1e45   :  { %4209 = vpow2.f32 %v3943_v20 }
0x1e46   :  { %4211 = vpow2.f32 %v3942_v45 }
0x1e50   :  { %v4206_v6 = vpop.eup %4205 }
0x1e51   :  { %2431 = vrot.lane.b32.xlu0 %v4206_v6, %s4444_s4  ;;  %v4208_v15 = vpop.eup %4207 }
0x1e52   :  { %v4210_v14 = vpop.eup %4209 }
0x1e53   :  { %v2373_v39 = vadd.f32 1.0, %v4210_v14  ;;  %v4212_v41 = vpop.eup %4211 }
0x1e54   :  { %v2372_v25 = vadd.f32 1.0, %v4212_v41 }
0x1e55   :  { %2386 = vrot.lane.b32.xlu0 %v4208_v15, %s4444_s4  ;;  %4213 = vrcp.f32 %v2373_v39 }
0x1e56   :  { %4215 = vrcp.f32 %v2372_v25 }
0x1e62   :  { %v4214_v35 = vpop.eup %4213 }
0x1e63   :  { %v4216_v46 = vpop.eup %4215  ;;  %v2429_v62 = vmul.f32 %v4214_v35, %v2427_v52 }
0x1e64   :  { %v2384_v17 = vmul.f32 %v4216_v46, %v2382_v11 }
0x1ec3   :  { %v2432_v21 = vpop.permute.xlu0 %2431 }
0x1ec4   :  { %v2434_v19 = vmul.f32 %v4214_v35, %v2432_v21 }
0x1ec6   :  { %2436 = vrot.lane.b32.xlu0 %v2434_v19, %s4442_s8 }
0x1ec7   :  { %v2387_v31 = vpop.permute.xlu0 %2386 }
0x1ec8   :  { %v2389_v50 = vmul.f32 %v4216_v46, %v2387_v31 }
0x1eca   :  { %2391 = vrot.lane.b32.xlu0 %v2389_v50, %s4442_s8 }
0x1ece   :  { %2446 = vrot.lane.b32.xlu0 %v2284_v43, %s4445_s1 }
0x1ed2   :  { %2402 = vrot.lane.b32.xlu0 %v2283_v12, %s4445_s1 }
0x1f38   :  { %v2437_v10 = vpop.permute.xlu0 %2436 }
0x1f39   :  { %v2439_v59 = vadd.f32 %v2437_v10, %v2429_v62 }
0x1f3b   :  { %4217 = vtanh.f32 %v2439_v59  ;;  %v2450_v25 = vsel %vm676_vm8, %v2439_v59, %v2427_v52 }
0x1f3c   :  { %v2392_v16 = vpop.permute.xlu0 %2391 }
0x1f3d   :  { %v2394_v30 = vadd.f32 %v2392_v16, %v2384_v17 }
0x1f3f   :  { %4219 = vtanh.f32 %v2394_v30 }
0x1f40   :  { %v2447_v15 = vpop.permute.xlu0 %2446 }
0x1f44   :  { %v2403_v39 = vpop.permute.xlu0 %2402 }
0x1f48   :  { %v4218_v22 = vpop.eup %4217 }
0x1f49   :  { %2442 = vrot.lane.b32.xlu1 %v4218_v22, %s4444_s4 }
0x1f4c   :  { %v4220_v6 = vpop.eup %4219 }
0x1f4d   :  { %2397 = vrot.lane.b32.xlu1 %v4220_v6, %s4444_s4 }
0x1fbb   :  { %v2443_v43 = vpop.permute.xlu1 %2442 }
0x1fbc   :  { %v5648_v20 = vmul.f32 %v4214_v35, %v2443_v43  ;;  %v2406_v35 = vsel %vm625_vm9, %v2394_v30, %v2382_v11 }
0x1fbe   :  { %v2449_v12 = vsel %vm676_vm8, %v5648_v20, %v2447_v15 }
0x1fbf   :  { %2452 = vrot.lane.b32.xlu1 %v2449_v12, %s4442_s8  ;;  %v2398_v45 = vpop.permute.xlu1 %2397 }
0x1fc0   :  { %v5654_v14 = vmul.f32 %v4216_v46, %v2398_v45 }
0x1fc2   :  { %v2405_v41 = vsel %vm625_vm9, %v5654_v14, %v2403_v39 }
0x1fc3   :  { %2408 = vrot.lane.b32.xlu0 %v2405_v41, %s4442_s8 }
0x1fc7   :  { %2457 = vrot.lane.b32.xlu0 %v2450_v25, %s4445_s1 }
0x1fcb   :  { %2413 = vrot.lane.b32.xlu0 %v2406_v35, %s4445_s1 }
0x2031   :  { %v2453_v21 = vpop.permute.xlu1 %2452 }
0x2032   :  { %2455 = vst.msk [vmem:[#allocation7] sm:$0xff] %vm127_vm0, %v2453_v21 }
0x2035   :  { %v2409_v19 = vpop.permute.xlu0 %2408 }
0x2036   :  { %2411 = vst.msk [vmem:[#allocation5] sm:$0xff] %vm127_vm0, %v2409_v19 }
0x2039   :  { %v2458_v46 = vpop.permute.xlu0 %2457  ;;  %v2470_v31 = vld [vmem:[#allocation7] sm:$0xff] }
0x203a   :  { %2460 = vst.msk [vmem:[#allocation8] sm:$0xff] %vm127_vm0, %v2458_v46  ;;  %2472 = vrot.lane.b32.xlu1 %v2470_v31, %s4442_s8 }
0x203d   :  { %v2414_v50 = vpop.permute.xlu0 %2413  ;;  %v2469_v10 = vld [vmem:[#allocation5] sm:$0xff] }
0x203e   :  { %2416 = vst.msk [vmem:[#allocation6] sm:$0xff] %vm127_vm0, %v2414_v50 }
0x2041   :  { %v2610_v52 = vld [vmem:[#allocation8] sm:$0xff] }
0x2042   :  { %2612 = vrot.lane.b32.xlu0 %v2610_v52, %s4442_s8 }
0x2045   :  { %v2565_v62 = vld [vmem:[#allocation6] sm:$0xff] }
0x2046   :  { %2567 = vrot.lane.b32.xlu0 %v2565_v62, %s4442_s8 }
0x20ac   :  { %v2473_v59 = vpop.permute.xlu1 %2472 }
0x20ad   :  { %v2475_v11 = vsel %vm127_vm0, %v2469_v10, %v2473_v59 }
0x20ae   :  { %3944 = vmatmul.mubr.msk.f32.vlgmr.msra.gmra.mxu0 %vm310_vm1, %v2475_v11 }
0x20af   :  { %2868 = vmatpush1.msra.mxu0 %v5388_v23  ;;  %2915 = vmatprep.mubr.f32.mxu0 %v4441_v0 }
0x20b0   :  { %2869 = vmatprep.subr.mxu0 %v5390_v40 }
0x20b1   :  { %2870 = vmatpush1.msra.mxu0 %v5395_v27 }
0x20b2   :  { %2871 = vmatprep.subr.mxu0 %v5398_v47 }
0x20b3   :  { %2872 = vmatpush1.msra.mxu0 %v5403_v29 }
0x20b4   :  { %2873 = vmatprep.subr.mxu0 %v5405_v48  ;;  %v2613_v50 = vpop.permute.xlu0 %2612 }
0x20b5   :  { %2874 = vmatpush1.msra.mxu0 %v5409_v58 }
0x20b6   :  { %2875 = vmatprep.subr.mxu0 %v5412_v2 }
0x20b7   :  { %2876 = vmatpush1.msra.mxu0 %v5417_v44 }
0x20b8   :  { %2877 = vmatprep.subr.mxu0 %v5419_v51  ;;  %v2568_v11 = vpop.permute.xlu0 %2567 }
0x20b9   :  { %2878 = vmatpush1.msra.mxu0 %v5424_v13 }
0x20ba   :  { %2879 = vmatprep.subr.mxu0 %v5429_v42 }
0x20bb   :  { %2880 = vmatpush1.msra.mxu0 %v5434_v18 }
0x20bc   :  { %2881 = vmatprep.subr.mxu0 %v5436_v5 }
0x20bd   :  { %2882 = vmatpush1.msra.mxu0 %v5442_v56 }
0x20be   :  { %3239 = vmatprep.subr.mxu0 %v5383_v33 }
0x216e   :  { %v2545_v17 = vpop.f32.mrf.mxu0 }
0x216f   :  { %v2550_v22 = vadd.f32 %v2545_v17, %v5562_v57 }
0x2170   :  { %v2547_v16 = vpop.f32.mrf.mxu0 }
0x2171   :  { %v2551_v30 = vadd.f32 %v2547_v16, %v5576_v63  ;;  %v3945_v12 = vmul.f32 -1.442695, %v2550_v22 }
0x2173   :  { %4221 = vtanh.f32 %v2551_v30  ;;  %v3946_v43 = vmul.f32 -1.442695, %v2551_v30 }
0x2174   :  { %4223 = vtanh.f32 %v2550_v22 }
0x2175   :  { %4225 = vpow2.f32 %v3946_v43 }
0x2176   :  { %4227 = vpow2.f32 %v3945_v12 }
0x2180   :  { %v4222_v6 = vpop.eup %4221 }
0x2181   :  { %2617 = vrot.lane.b32.xlu1 %v4222_v6, %s4444_s4  ;;  %v4224_v15 = vpop.eup %4223 }
0x2182   :  { %v4226_v45 = vpop.eup %4225 }
0x2183   :  { %v2559_v39 = vadd.f32 1.0, %v4226_v45  ;;  %v4228_v41 = vpop.eup %4227 }
0x2184   :  { %v2558_v25 = vadd.f32 1.0, %v4228_v41 }
0x2185   :  { %2572 = vrot.lane.b32.xlu1 %v4224_v15, %s4444_s4  ;;  %4229 = vrcp.f32 %v2559_v39 }
0x2186   :  { %4231 = vrcp.f32 %v2558_v25 }
0x2192   :  { %v4230_v63 = vpop.eup %4229 }
0x2193   :  { %v4232_v21 = vpop.eup %4231  ;;  %v2615_v52 = vmul.f32 %v4230_v63, %v2613_v50 }
0x2194   :  { %v2570_v17 = vmul.f32 %v4232_v21, %v2568_v11 }
0x21f3   :  { %v2618_v57 = vpop.permute.xlu1 %2617 }
0x21f4   :  { %v2620_v35 = vmul.f32 %v4230_v63, %v2618_v57 }
0x21f6   :  { %2622 = vrot.lane.b32.xlu1 %v2620_v35, %s4442_s8 }
0x21f7   :  { %v2573_v19 = vpop.permute.xlu1 %2572 }
0x21f8   :  { %v2575_v46 = vmul.f32 %v4232_v21, %v2573_v19 }
0x21fa   :  { %2577 = vrot.lane.b32.xlu1 %v2575_v46, %s4442_s8 }
0x21fe   :  { %2632 = vrot.lane.b32.xlu1 %v2470_v31, %s4445_s1 }
0x2202   :  { %2588 = vrot.lane.b32.xlu1 %v2469_v10, %s4445_s1 }
0x2268   :  { %v2623_v62 = vpop.permute.xlu1 %2622 }
0x2269   :  { %v2625_v59 = vadd.f32 %v2623_v62, %v2615_v52 }
0x226b   :  { %4233 = vtanh.f32 %v2625_v59  ;;  %v2636_v25 = vsel %vm874_vm12, %v2625_v59, %v2613_v50 }
0x226c   :  { %v2578_v16 = vpop.permute.xlu1 %2577 }
0x226d   :  { %v2580_v30 = vadd.f32 %v2578_v16, %v2570_v17 }
0x226f   :  { %4235 = vtanh.f32 %v2580_v30 }
0x2270   :  { %v2633_v15 = vpop.permute.xlu1 %2632 }
0x2274   :  { %v2589_v39 = vpop.permute.xlu1 %2588 }
0x2278   :  { %v4234_v22 = vpop.eup %4233 }
0x2279   :  { %2628 = vrot.lane.b32.xlu0 %v4234_v22, %s4444_s4 }
0x227c   :  { %v4236_v6 = vpop.eup %4235 }
0x227d   :  { %2583 = vrot.lane.b32.xlu0 %v4236_v6, %s4444_s4 }
0x22eb   :  { %v2629_v31 = vpop.permute.xlu0 %2628 }
0x22ec   :  { %v5702_v43 = vmul.f32 %v4230_v63, %v2629_v31  ;;  %v2592_v63 = vsel %vm823_vm13, %v2580_v30, %v2568_v11 }
0x22ee   :  { %v2635_v10 = vsel %vm874_vm12, %v5702_v43, %v2633_v15 }
0x22ef   :  { %2638 = vrot.lane.b32.xlu0 %v2635_v10, %s4442_s8  ;;  %v2584_v12 = vpop.permute.xlu0 %2583 }
0x22f0   :  { %v5708_v45 = vmul.f32 %v4232_v21, %v2584_v12 }
0x22f2   :  { %v2591_v41 = vsel %vm823_vm13, %v5708_v45, %v2589_v39 }
0x22f3   :  { %2594 = vrot.lane.b32.xlu1 %v2591_v41, %s4442_s8 }
0x22f7   :  { %2643 = vrot.lane.b32.xlu1 %v2636_v25, %s4445_s1 }
0x22fb   :  { %2599 = vrot.lane.b32.xlu1 %v2592_v63, %s4445_s1 }
0x2361   :  { %v2639_v57 = vpop.permute.xlu0 %2638 }
0x2362   :  { %2641 = vst.msk [vmem:[#allocation7] sm:$0xff] %vm127_vm0, %v2639_v57 }
0x2365   :  { %v2595_v35 = vpop.permute.xlu1 %2594 }
0x2366   :  { %2597 = vst.msk [vmem:[#allocation5] sm:$0xff] %vm127_vm0, %v2595_v35 }
0x2369   :  { %v2644_v21 = vpop.permute.xlu1 %2643  ;;  %v2656_v19 = vld [vmem:[#allocation7] sm:$0xff] }
0x236a   :  { %2646 = vst.msk [vmem:[#allocation8] sm:$0xff] %vm127_vm0, %v2644_v21  ;;  %2658 = vrot.lane.b32.xlu0 %v2656_v19, %s4442_s8 }
0x236d   :  { %v2600_v46 = vpop.permute.xlu1 %2599  ;;  %v2655_v62 = vld [vmem:[#allocation5] sm:$0xff] }
0x236e   :  { %2602 = vst.msk [vmem:[#allocation6] sm:$0xff] %vm127_vm0, %v2600_v46 }
0x2371   :  { %v2796_v50 = vld [vmem:[#allocation8] sm:$0xff] }
0x2372   :  { %2798 = vrot.lane.b32.xlu1 %v2796_v50, %s4442_s8 }
0x2375   :  { %v2751_v52 = vld [vmem:[#allocation6] sm:$0xff] }
0x2376   :  { %2753 = vrot.lane.b32.xlu1 %v2751_v52, %s4442_s8 }
0x23dc   :  { %v2659_v59 = vpop.permute.xlu0 %2658 }
0x23dd   :  { %v2661_v11 = vsel %vm127_vm0, %v2655_v62, %v2659_v59 }
0x23de   :  { %3947 = vmatmul.mubr.msk.f32.vlgmr.msra.gmra.mxu1 %vm310_vm1, %v2661_v11 }
0x23df   :  { %3054 = vmatpush1.msra.mxu1 %v5388_v23  ;;  %3101 = vmatprep.mubr.f32.mxu1 %v4441_v0 }
0x23e0   :  { %3055 = vmatprep.subr.mxu1 %v5390_v40 }
0x23e1   :  { %3056 = vmatpush1.msra.mxu1 %v5395_v27 }
0x23e2   :  { %3057 = vmatprep.subr.mxu1 %v5398_v47 }
0x23e3   :  { %3058 = vmatpush1.msra.mxu1 %v5403_v29 }
0x23e4   :  { %3059 = vmatprep.subr.mxu1 %v5405_v48  ;;  %v2799_v17 = vpop.permute.xlu1 %2798 }
0x23e5   :  { %3060 = vmatpush1.msra.mxu1 %v5409_v58 }
0x23e6   :  { %3061 = vmatprep.subr.mxu1 %v5412_v2 }
0x23e7   :  { %3062 = vmatpush1.msra.mxu1 %v5417_v44 }
0x23e8   :  { %3063 = vmatprep.subr.mxu1 %v5419_v51  ;;  %v2754_v6 = vpop.permute.xlu1 %2753 }
0x23e9   :  { %3064 = vmatpush1.msra.mxu1 %v5424_v13 }
0x23ea   :  { %3065 = vmatprep.subr.mxu1 %v5429_v42 }
0x23eb   :  { %3066 = vmatpush1.msra.mxu1 %v5434_v18 }
0x23ec   :  { %3067 = vmatprep.subr.mxu1 %v5436_v5 }
0x23ed   :  { %3068 = vmatpush1.msra.mxu1 %v5442_v56 }
0x23ee   :  { %3425 = vmatprep.subr.mxu1 %v5383_v33 }
0x249e   :  { %v2731_v23 = vpop.f32.mrf.mxu1 }
0x249f   :  { %v2736_v47 = vadd.f32 %v2731_v23, %v5566_v9 }
0x24a0   :  { %v2733_v40 = vpop.f32.mrf.mxu1 }
0x24a1   :  { %v2737_v27 = vadd.f32 %v2733_v40, %v5572_v36  ;;  %v3948_v2 = vmul.f32 -1.442695, %v2736_v47 }
0x24a3   :  { %4237 = vtanh.f32 %v2737_v27  ;;  %v3949_v58 = vmul.f32 -1.442695, %v2737_v27 }
0x24a4   :  { %4239 = vtanh.f32 %v2736_v47 }
0x24a5   :  { %4241 = vpow2.f32 %v3949_v58 }
0x24a6   :  { %4243 = vpow2.f32 %v3948_v2  ;;  %v5789_v2 = vld [vmem:[#allocation11 + $0x70] sm:$0xff] }
0x24b0   :  { %v4238_v29 = vpop.eup %4237 }
0x24b1   :  { %2803 = vrot.lane.b32.xlu0 %v4238_v29, %s4444_s4  ;;  %v4240_v48 = vpop.eup %4239 }
0x24b2   :  { %v4242_v44 = vpop.eup %4241 }
0x24b3   :  { %v2745_v33 = vadd.f32 1.0, %v4242_v44  ;;  %v4244_v51 = vpop.eup %4243  ;;  %v5793_v44 = vld [vmem:[#allocation11 + $0x68] sm:$0xff] }
0x24b4   :  { %v2744_v13 = vadd.f32 1.0, %v4244_v51  ;;  %v5799_v51 = vld [vmem:[#allocation11 + $0x58] sm:$0xff] }
0x24b5   :  { %2758 = vrot.lane.b32.xlu0 %v4240_v48, %s4444_s4  ;;  %4245 = vrcp.f32 %v2745_v33  ;;  %v5796_v33 = vld [vmem:[#allocation11 + $0x60] sm:$0xff] }
0x24b6   :  { %4247 = vrcp.f32 %v2744_v13  ;;  %v5802_v13 = vld [vmem:[#allocation11 + $0x50] sm:$0xff] }
0x24c2   :  { %v4246_v42 = vpop.eup %4245 }
0x24c3   :  { %v4248_v56 = vpop.eup %4247  ;;  %v2801_v16 = vmul.f32 %v4246_v42, %v2799_v17 }
0x24c4   :  { %v2756_v15 = vmul.f32 %v4248_v56, %v2754_v6 }
0x2523   :  { %v2804_v18 = vpop.permute.xlu0 %2803 }
0x2524   :  { %v2806_v5 = vmul.f32 %v4246_v42, %v2804_v18  ;;  %v5808_v18 = vld [vmem:[#allocation11 + $0x40] sm:$0xff] }
0x2526   :  { %2808 = vrot.lane.b32.xlu0 %v2806_v5, %s4442_s8  ;;  %v5811_v5 = vld [vmem:[#allocation11 + $0x38] sm:$0xff] }
0x2527   :  { %v2759_v9 = vpop.permute.xlu0 %2758 }
0x2528   :  { %v2761_v36 = vmul.f32 %v4248_v56, %v2759_v9  ;;  %v5817_v9 = vld [vmem:[#allocation11 + $0x28] sm:$0xff] }
0x252a   :  { %2763 = vrot.lane.b32.xlu0 %v2761_v36, %s4442_s8  ;;  %v5820_v36 = vld [vmem:[#allocation11 + $0x20] sm:$0xff] }
0x252e   :  { %2818 = vrot.lane.b32.xlu0 %v2656_v19, %s4445_s1 }
0x2532   :  { %2774 = vrot.lane.b32.xlu0 %v2655_v62, %s4445_s1 }
0x2598   :  { %v2809_v30 = vpop.permute.xlu0 %2808 }
0x2599   :  { %v2811_v22 = vadd.f32 %v2809_v30, %v2801_v16  ;;  %v5826_v16 = vld [vmem:[#allocation11 + $0x10] sm:$0xff]  ;;  %v5829_v30 = vld [vmem:[#allocation11 + $0x8] sm:$0xff] }
0x259b   :  { %4249 = vtanh.f32 %v2811_v22  ;;  %v2822_v50 = vsel %vm1072_vm2, %v2811_v22, %v2799_v17  ;;  %v5823_v17 = vld [vmem:[#allocation11 + $0x18] sm:$0xff]  ;;  %v5832_v22 = vld [vmem:[#allocation11] sm:$0xff] }
0x259c   :  { %v2764_v31 = vpop.permute.xlu0 %2763 }
0x259d   :  { %v2766_v10 = vadd.f32 %v2764_v31, %v2756_v15 }
0x259f   :  { %4251 = vtanh.f32 %v2766_v10  ;;  %v2778_v52 = vsel %vm1021_vm3, %v2766_v10, %v2754_v6 }
0x25a0   :  { %v2819_v41 = vpop.permute.xlu0 %2818 }
0x25a4   :  { %v2775_v19 = vpop.permute.xlu0 %2774 }
0x25a8   :  { %v4250_v12 = vpop.eup %4249 }
0x25a9   :  { %2814 = vrot.lane.b32.xlu1 %v4250_v12, %s4444_s4 }
0x25ac   :  { %v4252_v39 = vpop.eup %4251 }
0x25ad   :  { %2769 = vrot.lane.b32.xlu1 %v4252_v39, %s4444_s4 }
0x261b   :  { %v2815_v25 = vpop.permute.xlu1 %2814 }
0x261c   :  { %v5756_v63 = vmul.f32 %v4246_v42, %v2815_v25  ;;  %v5805_v42 = vld [vmem:[#allocation11 + $0x48] sm:$0xff] }
0x261e   :  { %v2821_v57 = vsel %vm1072_vm2, %v5756_v63, %v2819_v41 }
0x261f   :  { %2824 = vrot.lane.b32.xlu1 %v2821_v57, %s4442_s8  ;;  %v2770_v35 = vpop.permute.xlu1 %2769 }
0x2620   :  { %v5762_v21 = vmul.f32 %v4248_v56, %v2770_v35  ;;  %v5814_v56 = vld [vmem:[#allocation11 + $0x30] sm:$0xff] }
0x2622   :  { %v2777_v46 = vsel %vm1021_vm3, %v5762_v21, %v2775_v19 }
0x2623   :  { %2780 = vrot.lane.b32.xlu0 %v2777_v46, %s4442_s8 }
0x2627   :  { %2829 = vrot.lane.b32.xlu0 %v2822_v50, %s4445_s1 }
0x262b   :  { %2785 = vrot.lane.b32.xlu0 %v2778_v52, %s4445_s1 }
0x2691   :  { %v2825_v62 = vpop.permute.xlu1 %2824 }
0x2692   :  { %2827 = vst.msk [vmem:[#allocation7] sm:$0xff] %vm127_vm0, %v2825_v62 }
0x2695   :  { %v2781_v59 = vpop.permute.xlu0 %2780 }
0x2696   :  { %2783 = vst.msk [vmem:[#allocation5] sm:$0xff] %vm127_vm0, %v2781_v59 }
0x2699   :  { %v2830_v11 = vpop.permute.xlu0 %2829  ;;  %v5776_v23 = vld [vmem:[#allocation7] sm:$0xff] }
0x269a   :  { %2832 = vst.msk [vmem:[#allocation8] sm:$0xff] %vm127_vm0, %v2830_v11  ;;  %2844 = vrot.lane.b32.xlu1 %v5776_v23, %s4442_s8 }
0x269d   :  { %v2786_v40 = vpop.permute.xlu0 %2785  ;;  %v5784_v29 = vld [vmem:[#allocation5] sm:$0xff] }
0x269e   :  { %2788 = vst.msk [vmem:[#allocation6] sm:$0xff] %vm127_vm0, %v2786_v40 }
0x26a1   :  { %v2982_v27 = vld [vmem:[#allocation8] sm:$0xff] }
0x26a2   :  { %2984 = vrot.lane.b32.xlu0 %v2982_v27, %s4442_s8 }
0x26a5   :  { %v2937_v47 = vld [vmem:[#allocation6] sm:$0xff] }
0x26a6   :  { %2939 = vrot.lane.b32.xlu0 %v2937_v47, %s4442_s8 }
0x270c   :  { %v2845_v48 = vpop.permute.xlu1 %2844 }
0x270d   :  { %v2847_v58 = vsel %vm127_vm0, %v5784_v29, %v2845_v48 }
0x270e   :  { %3950 = vmatmul.mubr.msk.f32.vlgmr.msra.gmra.mxu0 %vm310_vm1, %v2847_v58 }
0x270f   :  { %3240 = vmatpush1.msra.mxu0 %v5789_v2  ;;  %3287 = vmatprep.mubr.f32.mxu0 %v4441_v0 }
0x2710   :  { %3241 = vmatprep.subr.mxu0 %v5793_v44 }
0x2711   :  { %3242 = vmatpush1.msra.mxu0 %v5796_v33 }
0x2712   :  { %3243 = vmatprep.subr.mxu0 %v5799_v51 }
0x2713   :  { %3244 = vmatpush1.msra.mxu0 %v5802_v13 }
0x2714   :  { %3245 = vmatprep.subr.mxu0 %v5805_v42  ;;  %v2985_v11 = vpop.permute.xlu0 %2984 }
0x2715   :  { %3246 = vmatpush1.msra.mxu0 %v5808_v18 }
0x2716   :  { %3247 = vmatprep.subr.mxu0 %v5811_v5 }
0x2717   :  { %3248 = vmatpush1.msra.mxu0 %v5814_v56 }
0x2718   :  { %3249 = vmatprep.subr.mxu0 %v5817_v9  ;;  %v2940_v48 = vpop.permute.xlu0 %2939 }
0x2719   :  { %3250 = vmatpush1.msra.mxu0 %v5820_v36 }
0x271a   :  { %3251 = vmatprep.subr.mxu0 %v5823_v17 }
0x271b   :  { %3252 = vmatpush1.msra.mxu0 %v5826_v16 }
0x271c   :  { %3253 = vmatprep.subr.mxu0 %v5829_v30 }
0x271d   :  { %3254 = vmatpush1.msra.mxu0 %v5832_v22 }
0x27ce   :  { %v2917_v6 = vpop.f32.mrf.mxu0 }
0x27cf   :  { %v2922_v10 = vadd.f32 %v2917_v6, %v5570_v55 }
0x27d0   :  { %v2919_v15 = vpop.f32.mrf.mxu0 }
0x27d1   :  { %v2923_v31 = vadd.f32 %v2919_v15, %v5568_v38  ;;  %v3951_v25 = vmul.f32 -1.442695, %v2922_v10 }
0x27d3   :  { %4253 = vtanh.f32 %v2923_v31  ;;  %v3952_v41 = vmul.f32 -1.442695, %v2923_v31 }
0x27d4   :  { %4255 = vtanh.f32 %v2922_v10 }
0x27d5   :  { %4257 = vpow2.f32 %v3952_v41 }
0x27d6   :  { %4259 = vpow2.f32 %v3951_v25 }
0x27e0   :  { %v4254_v12 = vpop.eup %4253 }
0x27e1   :  { %2989 = vrot.lane.b32.xlu1 %v4254_v12, %s4444_s4  ;;  %v4256_v39 = vpop.eup %4255 }
0x27e2   :  { %v4258_v57 = vpop.eup %4257 }
0x27e3   :  { %v2931_v35 = vadd.f32 1.0, %v4258_v57  ;;  %v4260_v19 = vpop.eup %4259 }
0x27e4   :  { %v2930_v46 = vadd.f32 1.0, %v4260_v19 }
0x27e5   :  { %2944 = vrot.lane.b32.xlu1 %v4256_v39, %s4444_s4  ;;  %4261 = vrcp.f32 %v2931_v35 }
0x27e6   :  { %4263 = vrcp.f32 %v2930_v46 }
0x27f2   :  { %v4262_v38 = vpop.eup %4261 }
0x27f3   :  { %v4264_v52 = vpop.eup %4263  ;;  %v2987_v40 = vmul.f32 %v4262_v38, %v2985_v11 }
0x27f4   :  { %v2942_v58 = vmul.f32 %v4264_v52, %v2940_v48 }
0x2853   :  { %v2990_v55 = vpop.permute.xlu1 %2989 }
0x2854   :  { %v2992_v50 = vmul.f32 %v4262_v38, %v2990_v55 }
0x2856   :  { %2994 = vrot.lane.b32.xlu1 %v2992_v50, %s4442_s8 }
0x2857   :  { %v2945_v62 = vpop.permute.xlu1 %2944 }
0x2858   :  { %v2947_v59 = vmul.f32 %v4264_v52, %v2945_v62 }
0x285a   :  { %2949 = vrot.lane.b32.xlu1 %v2947_v59, %s4442_s8 }
0x285e   :  { %3004 = vrot.lane.b32.xlu1 %v5776_v23, %s4445_s1 }
0x2862   :  { %2960 = vrot.lane.b32.xlu1 %v5784_v29, %s4445_s1 }
0x28c8   :  { %v2995_v27 = vpop.permute.xlu1 %2994 }
0x28c9   :  { %v2997_v47 = vadd.f32 %v2995_v27, %v2987_v40 }
0x28cb   :  { %4265 = vtanh.f32 %v2997_v47  ;;  %v3008_v19 = vsel %vm1021_vm3, %v2997_v47, %v2985_v11 }
0x28cc   :  { %v2950_v6 = vpop.permute.xlu1 %2949 }
0x28cd   :  { %v2952_v15 = vadd.f32 %v2950_v6, %v2942_v58 }
0x28cf   :  { %4267 = vtanh.f32 %v2952_v15  ;;  %v2964_v46 = vsel %vm1072_vm2, %v2952_v15, %v2940_v48 }
0x28d0   :  { %v3005_v23 = vpop.permute.xlu1 %3004 }
0x28d4   :  { %v2961_v57 = vpop.permute.xlu1 %2960 }
0x28d8   :  { %v4266_v31 = vpop.eup %4265 }
0x28d9   :  { %3000 = vrot.lane.b32.xlu0 %v4266_v31, %s4444_s4 }
0x28dc   :  { %v4268_v10 = vpop.eup %4267 }
0x28dd   :  { %2955 = vrot.lane.b32.xlu0 %v4268_v10, %s4444_s4 }
0x294b   :  { %v3001_v12 = vpop.permute.xlu0 %3000 }
0x294c   :  { %v5847_v39 = vmul.f32 %v4262_v38, %v3001_v12 }
0x294e   :  { %v3007_v29 = vsel %vm1021_vm3, %v5847_v39, %v3005_v23 }
0x294f   :  { %3010 = vrot.lane.b32.xlu0 %v3007_v29, %s4442_s8  ;;  %v2956_v41 = vpop.permute.xlu0 %2955 }
0x2950   :  { %v5853_v25 = vmul.f32 %v4264_v52, %v2956_v41 }
0x2952   :  { %v2963_v35 = vsel %vm1072_vm2, %v5853_v25, %v2961_v57 }
0x2953   :  { %2966 = vrot.lane.b32.xlu1 %v2963_v35, %s4442_s8 }
0x2957   :  { %3015 = vrot.lane.b32.xlu1 %v3008_v19, %s4445_s1 }
0x295b   :  { %2971 = vrot.lane.b32.xlu1 %v2964_v46, %s4445_s1 }
0x29c1   :  { %v3011_v38 = vpop.permute.xlu0 %3010 }
0x29c2   :  { %3013 = vst.msk [vmem:[#allocation7] sm:$0xff] %vm127_vm0, %v3011_v38 }
0x29c5   :  { %v2967_v55 = vpop.permute.xlu1 %2966 }
0x29c6   :  { %2969 = vst.msk [vmem:[#allocation5] sm:$0xff] %vm127_vm0, %v2967_v55 }
0x29c9   :  { %v3016_v50 = vpop.permute.xlu1 %3015  ;;  %v3028_v52 = vld [vmem:[#allocation7] sm:$0xff] }
0x29ca   :  { %3018 = vst.msk [vmem:[#allocation8] sm:$0xff] %vm127_vm0, %v3016_v50  ;;  %3030 = vrot.lane.b32.xlu0 %v3028_v52, %s4442_s8 }
0x29cd   :  { %v2972_v62 = vpop.permute.xlu1 %2971  ;;  %v3027_v40 = vld [vmem:[#allocation5] sm:$0xff] }
0x29ce   :  { %2974 = vst.msk [vmem:[#allocation6] sm:$0xff] %vm127_vm0, %v2972_v62 }
0x29d1   :  { %v3168_v59 = vld [vmem:[#allocation8] sm:$0xff] }
0x29d2   :  { %3170 = vrot.lane.b32.xlu1 %v3168_v59, %s4442_s8 }
0x29d5   :  { %v3123_v11 = vld [vmem:[#allocation6] sm:$0xff] }
0x29d6   :  { %3125 = vrot.lane.b32.xlu1 %v3123_v11, %s4442_s8 }
0x2a3c   :  { %v3031_v27 = vpop.permute.xlu0 %3030 }
0x2a3d   :  { %v3033_v47 = vsel %vm127_vm0, %v3027_v40, %v3031_v27 }
0x2a3e   :  { %3953 = vmatmul.mubr.msk.f32.vlgmr.msra.gmra.mxu1 %vm310_vm1, %v3033_v47 }
0x2a3f   :  { %3426 = vmatpush1.msra.mxu1 %v5789_v2  ;;  %3473 = vmatprep.mubr.f32.mxu1 %v4441_v0 }
0x2a40   :  { %3427 = vmatprep.subr.mxu1 %v5793_v44 }
0x2a41   :  { %3428 = vmatpush1.msra.mxu1 %v5796_v33 }
0x2a42   :  { %3429 = vmatprep.subr.mxu1 %v5799_v51 }
0x2a43   :  { %3430 = vmatpush1.msra.mxu1 %v5802_v13 }
0x2a44   :  { %3431 = vmatprep.subr.mxu1 %v5805_v42  ;;  %v3171_v58 = vpop.permute.xlu1 %3170 }
0x2a45   :  { %3432 = vmatpush1.msra.mxu1 %v5808_v18 }
0x2a46   :  { %3433 = vmatprep.subr.mxu1 %v5811_v5 }
0x2a47   :  { %3434 = vmatpush1.msra.mxu1 %v5814_v56 }
0x2a48   :  { %3435 = vmatprep.subr.mxu1 %v5817_v9  ;;  %v3126_v10 = vpop.permute.xlu1 %3125 }
0x2a49   :  { %3436 = vmatpush1.msra.mxu1 %v5820_v36 }
0x2a4a   :  { %3437 = vmatprep.subr.mxu1 %v5823_v17 }
0x2a4b   :  { %3438 = vmatpush1.msra.mxu1 %v5826_v16 }
0x2a4c   :  { %3439 = vmatprep.subr.mxu1 %v5829_v30 }
0x2a4d   :  { %3440 = vmatpush1.msra.mxu1 %v5832_v22 }
0x2a4e   :  { %4026 = vmatprep.subr.mxu1 %v4441_v0 }
0x2afe   :  { %v3103_v2 = vpop.f32.mrf.mxu1 }
0x2aff   :  { %v3108_v51 = vadd.f32 %v3103_v2, %v5574_v8 }
0x2b00   :  { %v3105_v44 = vpop.f32.mrf.mxu1 }
0x2b01   :  { %v3109_v33 = vadd.f32 %v3105_v44, %v5564_v28  ;;  %v3954_v5 = vmul.f32 -1.442695, %v3108_v51 }
0x2b03   :  { %4269 = vtanh.f32 %v3109_v33  ;;  %v3955_v18 = vmul.f32 -1.442695, %v3109_v33 }
0x2b04   :  { %4271 = vtanh.f32 %v3108_v51 }
0x2b05   :  { %4273 = vpow2.f32 %v3955_v18 }
0x2b06   :  { %4275 = vpow2.f32 %v3954_v5 }
0x2b10   :  { %v4270_v13 = vpop.eup %4269 }
0x2b11   :  { %3175 = vrot.lane.b32.xlu0 %v4270_v13, %s4444_s4  ;;  %v4272_v42 = vpop.eup %4271 }
0x2b12   :  { %v4274_v56 = vpop.eup %4273 }
0x2b13   :  { %v3117_v9 = vadd.f32 1.0, %v4274_v56  ;;  %v4276_v36 = vpop.eup %4275 }
0x2b14   :  { %v3116_v17 = vadd.f32 1.0, %v4276_v36 }
0x2b15   :  { %3130 = vrot.lane.b32.xlu0 %v4272_v42, %s4444_s4  ;;  %4277 = vrcp.f32 %v3117_v9 }
0x2b16   :  { %4279 = vrcp.f32 %v3116_v17 }
0x2b22   :  { %v4278_v28 = vpop.eup %4277 }
0x2b23   :  { %v4280_v30 = vpop.eup %4279  ;;  %v3173_v6 = vmul.f32 %v4278_v28, %v3171_v58 }
0x2b24   :  { %v3128_v23 = vmul.f32 %v4280_v30, %v3126_v10 }
0x2b83   :  { %v3176_v8 = vpop.permute.xlu0 %3175 }
0x2b84   :  { %v3178_v16 = vmul.f32 %v4278_v28, %v3176_v8 }
0x2b86   :  { %3180 = vrot.lane.b32.xlu0 %v3178_v16, %s4442_s8 }
0x2b87   :  { %v3131_v22 = vpop.permute.xlu0 %3130 }
0x2b88   :  { %v3133_v48 = vmul.f32 %v4280_v30, %v3131_v22 }
0x2b8a   :  { %3135 = vrot.lane.b32.xlu0 %v3133_v48, %s4442_s8 }
0x2b8e   :  { %3190 = vrot.lane.b32.xlu0 %v3028_v52, %s4445_s1 }
0x2b92   :  { %3146 = vrot.lane.b32.xlu0 %v3027_v40, %s4445_s1 }
0x2bf8   :  { %v3181_v15 = vpop.permute.xlu0 %3180 }
0x2bf9   :  { %v3183_v31 = vadd.f32 %v3181_v15, %v3173_v6 }
0x2bfb   :  { %4281 = vtanh.f32 %v3183_v31  ;;  %v3194_v59 = vsel %vm823_vm13, %v3183_v31, %v3171_v58 }
0x2bfc   :  { %v3136_v12 = vpop.permute.xlu0 %3135 }
0x2bfd   :  { %v3138_v29 = vadd.f32 %v3136_v12, %v3128_v23 }
0x2bff   :  { %4283 = vtanh.f32 %v3138_v29  ;;  %v3150_v11 = vsel %vm874_vm12, %v3138_v29, %v3126_v10 }
0x2c00   :  { %v3191_v35 = vpop.permute.xlu0 %3190 }
0x2c04   :  { %v3147_v52 = vpop.permute.xlu0 %3146 }
0x2c08   :  { %v4282_v41 = vpop.eup %4281 }
0x2c09   :  { %3186 = vrot.lane.b32.xlu1 %v4282_v41, %s4444_s4 }
0x2c0c   :  { %v4284_v57 = vpop.eup %4283 }
0x2c0d   :  { %3141 = vrot.lane.b32.xlu1 %v4284_v57, %s4444_s4 }
0x2c7b   :  { %v3187_v19 = vpop.permute.xlu1 %3186 }
0x2c7c   :  { %v5901_v46 = vmul.f32 %v4278_v28, %v3187_v19 }
0x2c7e   :  { %v3193_v38 = vsel %vm823_vm13, %v5901_v46, %v3191_v35 }
0x2c7f   :  { %3196 = vrot.lane.b32.xlu1 %v3193_v38, %s4442_s8  ;;  %v3142_v55 = vpop.permute.xlu1 %3141 }
0x2c80   :  { %v5907_v50 = vmul.f32 %v4280_v30, %v3142_v55 }
0x2c82   :  { %v3149_v62 = vsel %vm874_vm12, %v5907_v50, %v3147_v52  ;;  %v3161_v60 = vsel %vm874_vm12, %v5907_v50, 0.0 }
0x2c83   :  { %3152 = vrot.lane.b32.xlu0 %v3149_v62, %s4442_s8 }
0x2c87   :  { %3201 = vrot.lane.b32.xlu0 %v3194_v59, %s4445_s1 }
0x2c8b   :  { %3157 = vrot.lane.b32.xlu0 %v3150_v11, %s4445_s1 }
0x2cf1   :  { %v3197_v40 = vpop.permute.xlu1 %3196 }
0x2cf2   :  { %3199 = vst.msk [vmem:[#allocation7] sm:$0xff] %vm127_vm0, %v3197_v40 }
0x2cf5   :  { %v3153_v27 = vpop.permute.xlu0 %3152 }
0x2cf6   :  { %3155 = vst.msk [vmem:[#allocation5] sm:$0xff] %vm127_vm0, %v3153_v27 }
0x2cf9   :  { %v3202_v47 = vpop.permute.xlu0 %3201  ;;  %v3214_v2 = vld [vmem:[#allocation7] sm:$0xff] }
0x2cfa   :  { %3204 = vst.msk [vmem:[#allocation8] sm:$0xff] %vm127_vm0, %v3202_v47  ;;  %3216 = vrot.lane.b32.xlu1 %v3214_v2, %s4442_s8 }
0x2cfd   :  { %v3158_v44 = vpop.permute.xlu0 %3157  ;;  %v3213_v13 = vld [vmem:[#allocation5] sm:$0xff] }
0x2cfe   :  { %3160 = vst.msk [vmem:[#allocation6] sm:$0xff] %vm127_vm0, %v3158_v44 }
0x2d01   :  { %v3354_v33 = vld [vmem:[#allocation8] sm:$0xff] }
0x2d02   :  { %3356 = vrot.lane.b32.xlu0 %v3354_v33, %s4442_s8 }
0x2d05   :  { %v3309_v51 = vld [vmem:[#allocation6] sm:$0xff] }
0x2d06   :  { %3311 = vrot.lane.b32.xlu0 %v3309_v51, %s4442_s8 }
0x2d6c   :  { %v3217_v42 = vpop.permute.xlu1 %3216 }
0x2d6d   :  { %v3219_v18 = vsel %vm127_vm0, %v3213_v13, %v3217_v42 }
0x2d6e   :  { %3956 = vmatmul.mubr.msk.f32.vlgmr.msra.gmra.mxu0 %vm310_vm1, %v3219_v18 }
0x2d74   :  { %v3357_v23 = vpop.permute.xlu0 %3356 }
0x2d78   :  { %v3312_v57 = vpop.permute.xlu0 %3311 }
0x2e2e   :  { %v3289_v5 = vpop.f32.mrf.mxu0 }
0x2e2f   :  { %v3294_v36 = vadd.f32 %v3289_v5, %v5578_v7 }
0x2e30   :  { %v3291_v56 = vpop.f32.mrf.mxu0 }
0x2e31   :  { %v3295_v9 = vadd.f32 %v3291_v56, %v5560_v3  ;;  %v3957_v16 = vmul.f32 -1.442695, %v3294_v36 }
0x2e33   :  { %4285 = vtanh.f32 %v3295_v9  ;;  %v3958_v8 = vmul.f32 -1.442695, %v3295_v9 }
0x2e34   :  { %4287 = vtanh.f32 %v3294_v36 }
0x2e35   :  { %4289 = vpow2.f32 %v3958_v8 }
0x2e36   :  { %4291 = vpow2.f32 %v3957_v16 }
0x2e40   :  { %v4286_v17 = vpop.eup %4285 }
0x2e41   :  { %3361 = vrot.lane.b32.xlu1 %v4286_v17, %s4444_s4  ;;  %v4288_v28 = vpop.eup %4287 }
0x2e42   :  { %v4290_v30 = vpop.eup %4289 }
0x2e43   :  { %v3303_v22 = vadd.f32 1.0, %v4290_v30  ;;  %v4292_v48 = vpop.eup %4291 }
0x2e44   :  { %v3302_v58 = vadd.f32 1.0, %v4292_v48 }
0x2e45   :  { %3316 = vrot.lane.b32.xlu1 %v4288_v28, %s4444_s4  ;;  %4293 = vrcp.f32 %v3303_v22 }
0x2e46   :  { %4295 = vrcp.f32 %v3302_v58 }
0x2e52   :  { %v4294_v3 = vpop.eup %4293 }
0x2e53   :  { %v4296_v15 = vpop.eup %4295  ;;  %v3359_v12 = vmul.f32 %v4294_v3, %v3357_v23 }
0x2e54   :  { %v3314_v35 = vmul.f32 %v4296_v15, %v3312_v57 }
0x2eb3   :  { %v3362_v7 = vpop.permute.xlu1 %3361 }
0x2eb4   :  { %v3364_v6 = vmul.f32 %v4294_v3, %v3362_v7 }
0x2eb6   :  { %3366 = vrot.lane.b32.xlu1 %v3364_v6, %s4442_s8 }
0x2eb7   :  { %v3317_v31 = vpop.permute.xlu1 %3316 }
0x2eb8   :  { %v3319_v10 = vmul.f32 %v4296_v15, %v3317_v31 }
0x2eba   :  { %3321 = vrot.lane.b32.xlu1 %v3319_v10, %s4442_s8 }
0x2ebe   :  { %3376 = vrot.lane.b32.xlu1 %v3214_v2, %s4445_s1 }
0x2ec2   :  { %3332 = vrot.lane.b32.xlu1 %v3213_v13, %s4445_s1 }
0x2f28   :  { %v3367_v29 = vpop.permute.xlu1 %3366 }
0x2f29   :  { %v3369_v41 = vadd.f32 %v3367_v29, %v3359_v12 }
0x2f2b   :  { %4297 = vtanh.f32 %v3369_v41  ;;  %v3380_v33 = vsel %vm625_vm9, %v3369_v41, %v3357_v23 }
0x2f2c   :  { %v3322_v19 = vpop.permute.xlu1 %3321 }
0x2f2d   :  { %v3324_v38 = vadd.f32 %v3322_v19, %v3314_v35 }
0x2f2f   :  { %4299 = vtanh.f32 %v3324_v38  ;;  %v3336_v51 = vsel %vm676_vm8, %v3324_v38, %v3312_v57 }
0x2f30   :  { %v3377_v62 = vpop.permute.xlu1 %3376 }
0x2f34   :  { %v3333_v2 = vpop.permute.xlu1 %3332 }
0x2f38   :  { %v4298_v55 = vpop.eup %4297 }
0x2f39   :  { %3372 = vrot.lane.b32.xlu0 %v4298_v55, %s4444_s4 }
0x2f3c   :  { %v4300_v52 = vpop.eup %4299 }
0x2f3d   :  { %3327 = vrot.lane.b32.xlu0 %v4300_v52, %s4444_s4 }
0x2fab   :  { %v3373_v59 = vpop.permute.xlu0 %3372 }
0x2fac   :  { %v5938_v11 = vmul.f32 %v4294_v3, %v3373_v59 }
0x2fae   :  { %v3379_v40 = vsel %vm625_vm9, %v5938_v11, %v3377_v62 }
0x2faf   :  { %3382 = vrot.lane.b32.xlu0 %v3379_v40, %s4442_s8  ;;  %v3328_v27 = vpop.permute.xlu0 %3327 }
0x2fb0   :  { %v5944_v47 = vmul.f32 %v4296_v15, %v3328_v27 }
0x2fb2   :  { %v3335_v44 = vsel %vm676_vm8, %v5944_v47, %v3333_v2 }
0x2fb3   :  { %3338 = vrot.lane.b32.xlu1 %v3335_v44, %s4442_s8  ;;  %v3391_v44 = vsel %vm625_vm9, %v5938_v11, 0.0 }
0x2fb7   :  { %3387 = vrot.lane.b32.xlu1 %v3380_v33, %s4445_s1  ;;  %v3019_v33 = vsel %vm1021_vm3, %v5847_v39, 0.0 }
0x2fbb   :  { %3343 = vrot.lane.b32.xlu1 %v3336_v51, %s4445_s1  ;;  %v2647_v51 = vsel %vm874_vm12, %v5702_v43, 0.0 }
0x3021   :  { %v3383_v13 = vpop.permute.xlu0 %3382 }
0x3022   :  { %3385 = vst.msk [vmem:[#allocation7] sm:$0xff] %vm127_vm0, %v3383_v13  ;;  %v2275_v13 = vsel %vm478_vm4, %v5594_v1, 0.0 }
0x3025   :  { %v3339_v42 = vpop.permute.xlu1 %3338 }
0x3026   :  { %3341 = vst.msk [vmem:[#allocation5] sm:$0xff] %vm127_vm0, %v3339_v42 }
0x3029   :  { %v3388_v18 = vpop.permute.xlu1 %3387  ;;  %v5958_v5 = vld [vmem:[#allocation7] sm:$0xff] }
0x302a   :  { %3390 = vst.msk [vmem:[#allocation8] sm:$0xff] %vm127_vm0, %v3388_v18  ;;  %3402 = vrot.lane.b32.xlu0 %v5958_v5, %s4442_s8 }
0x302d   :  { %v3344_v56 = vpop.permute.xlu1 %3343  ;;  %v3399_v17 = vld [vmem:[#allocation5] sm:$0xff] }
0x302e   :  { %3346 = vst.msk [vmem:[#allocation6] sm:$0xff] %vm127_vm0, %v3344_v56 }
0x3031   :  { %v3540_v9 = vld [vmem:[#allocation8] sm:$0xff] }
0x3032   :  { %3542 = vrot.lane.b32.xlu1 %v3540_v9, %s4442_s8  ;;  %v3205_v9 = vsel %vm823_vm13, %v5901_v46, 0.0 }
0x3035   :  { %v3495_v36 = vld [vmem:[#allocation6] sm:$0xff] }
0x3036   :  { %3497 = vrot.lane.b32.xlu1 %v3495_v36, %s4442_s8 }
0x309c   :  { %v3403_v28 = vpop.permute.xlu0 %3402 }
0x309d   :  { %v3405_v8 = vsel %vm127_vm0, %v3399_v17, %v3403_v28  ;;  %v2417_v28 = vsel %vm625_vm9, %v5654_v14, 0.0 }
0x309e   :  { %3959 = vmatmul.mubr.msk.f32.vlgmr.msra.gmra.mxu1 %vm310_vm1, %v3405_v8  ;;  %v2789_v8 = vsel %vm1021_vm3, %v5762_v21, 0.0  ;;  %v2975_v21 = vsel %vm1072_vm2, %v5853_v25, 0.0  ;;  %v3641_v25 = vld [vmem:[#allocation13 + $0x10] sm:$0xff] }
0x309f   :  { %4042 = vmatprep.mubr.msk.f32.mxu1 %vm4446_vm6, %v4441_v0 }
0x30a4   :  { %v5974_v35 = vpop.permute.xlu1 %3542 }
0x30a8   :  { %v5979_v52 = vpop.permute.xlu1 %3497 }
0x315e   :  { %v3475_v16 = vpop.f32.mrf.mxu1 }
0x315f   :  { %v3480_v48 = vadd.f32 %v3475_v16, %v5582_v61  ;;  %v2461_v16 = vsel %vm676_vm8, %v5648_v20, 0.0  ;;  %v2603_v20 = vsel %vm823_vm13, %v5708_v45, 0.0  ;;  %v3347_v45 = vsel %vm676_vm8, %v5944_v47, 0.0 }
0x3160   :  { %v3477_v30 = vpop.f32.mrf.mxu1 }
0x3161   :  { %v3481_v22 = vadd.f32 %v3477_v30, %v5556_v26  ;;  %v3960_v6 = vmul.f32 -1.442695, %v3480_v48  ;;  %v3645_v30 = vld [vmem:[#allocation13 + $0x30] sm:$0xff] }
0x3163   :  { %4301 = vtanh.f32 %v3481_v22  ;;  %v3961_v7 = vmul.f32 -1.442695, %v3481_v22  ;;  %v3644_v22 = vld [vmem:[#allocation13 + $0x28] sm:$0xff] }
0x3164   :  { %4303 = vtanh.f32 %v3480_v48  ;;  %v3640_v48 = vld [vmem:[#allocation13 + $0x8] sm:$0xff] }
0x3165   :  { %4305 = vpow2.f32 %v3961_v7  ;;  %v3804_v7 = vld [vmem:[#allocation14 + $0x30] sm:$0xff] }
0x3166   :  { %4307 = vpow2.f32 %v3960_v6 }
0x3170   :  { %v4302_v58 = vpop.eup %4301 }
0x3171   :  { %3547 = vrot.lane.b32.xlu0 %v4302_v58, %s4444_s4  ;;  %v4304_v3 = vpop.eup %4303 }
0x3172   :  { %v4306_v15 = vpop.eup %4305 }
0x3173   :  { %v3489_v31 = vadd.f32 1.0, %v4306_v15  ;;  %v4308_v10 = vpop.eup %4307 }
0x3174   :  { %v3488_v23 = vadd.f32 1.0, %v4308_v10  ;;  %v3802_v10 = vld [vmem:[#allocation14 + $0x20] sm:$0xff] }
0x3175   :  { %3502 = vrot.lane.b32.xlu0 %v4304_v3, %s4444_s4  ;;  %4309 = vrcp.f32 %v3489_v31  ;;  %v3805_v3 = vld [vmem:[#allocation14 + $0x38] sm:$0xff]  ;;  %v3803_v31 = vld [vmem:[#allocation14 + $0x28] sm:$0xff] }
0x3176   :  { %4311 = vrcp.f32 %v3488_v23  ;;  %4027 = vmatpush3.msra.mxu1 %v3805_v3 }
0x3177   :  { %4028 = vmatprep.subr.mxu1 %v4441_v0 }
0x3178   :  { %4029 = vmatpush3.msra.mxu1 %v3804_v7 }
0x3179   :  { %4030 = vmatprep.subr.mxu1 %v4441_v0 }
0x317a   :  { %4031 = vmatpush3.msra.mxu1 %v3803_v31 }
0x317b   :  { %4032 = vmatprep.subr.mxu1 %v4441_v0 }
0x317c   :  { %4033 = vmatpush3.msra.mxu1 %v3802_v10 }
0x317d   :  { %4034 = vmatprep.subr.mxu1 %v4441_v0 }
0x3182   :  { %v4310_v26 = vpop.eup %4309 }
0x3183   :  { %v4312_v29 = vpop.eup %4311  ;;  %v3545_v19 = vmul.f32 %v4310_v26, %v5974_v35 }
0x3184   :  { %v3500_v62 = vmul.f32 %v4312_v29, %v5979_v52 }
0x31e3   :  { %v3548_v61 = vpop.permute.xlu0 %3547 }
0x31e4   :  { %v3550_v12 = vmul.f32 %v4310_v26, %v3548_v61 }
0x31e6   :  { %3552 = vrot.lane.b32.xlu0 %v3550_v12, %s4442_s8  ;;  %v3801_v12 = vld [vmem:[#allocation14 + $0x18] sm:$0xff] }
0x31e7   :  { %v3503_v41 = vpop.permute.xlu0 %3502  ;;  %4035 = vmatpush3.msra.mxu1 %v3801_v12 }
0x31e8   :  { %v3505_v57 = vmul.f32 %v4312_v29, %v3503_v41  ;;  %4036 = vmatprep.subr.mxu1 %v4441_v0 }
0x31ea   :  { %3507 = vrot.lane.b32.xlu0 %v3505_v57, %s4442_s8 }
0x3258   :  { %v3553_v38 = vpop.permute.xlu0 %3552 }
0x3259   :  { %v5977_v55 = vadd.f32 %v3553_v38, %v3545_v19  ;;  %v3799_v38 = vld [vmem:[#allocation14 + $0x8] sm:$0xff] }
0x325b   :  { %4313 = vtanh.f32 %v5977_v55 }
0x325c   :  { %v3508_v59 = vpop.permute.xlu0 %3507 }
0x325d   :  { %v5983_v40 = vadd.f32 %v3508_v59, %v3500_v62  ;;  %v3798_v62 = vld [vmem:[#allocation14] sm:$0xff] }
0x325f   :  { %4315 = vtanh.f32 %v5983_v40 }
0x3268   :  { %v4314_v27 = vpop.eup %4313 }
0x3269   :  { %3558 = vrot.lane.b32.xlu1 %v4314_v27, %s4444_s4 }
0x326c   :  { %v4316_v2 = vpop.eup %4315 }
0x326d   :  { %3513 = vrot.lane.b32.xlu0 %v4316_v2, %s4444_s4  ;;  %3518 = vrot.lane.b32.xlu1 %v3399_v17, %s4445_s1  ;;  %v2833_v17 = vsel %vm1072_vm2, %v5756_v63, 0.0 }
0x3271   :  { %3393 = vrot.lane.b32.xlu1 %v3391_v44, %s4442_s8 }
0x3275   :  { %3021 = vrot.lane.b32.xlu1 %v3019_v33, %s4442_s8 }
0x3279   :  { %2649 = vrot.lane.b32.xlu1 %v2647_v51, %s4442_s8 }
0x327d   :  { %2277 = vrot.lane.b32.xlu1 %v2275_v13, %s4442_s8 }
0x32db   :  { %v3559_v11 = vpop.permute.xlu1 %3558 }
0x32dc   :  { %v6005_v42 = vmul.f32 %v4310_v26, %v3559_v11 }
0x32de   :  { %v3577_v39 = vsel %vm427_vm5, %v6005_v42, 0.0 }
0x32df   :  { %v3514_v18 = vpop.permute.xlu0 %3513  ;;  %3579 = vrot.lane.b32.xlu0 %v3577_v39, %s4442_s8  ;;  %v3519_v56 = vpop.permute.xlu1 %3518 }
0x32e0   :  { %v3516_v43 = vmul.f32 %v4312_v29, %v3514_v18  ;;  %v3800_v29 = vld [vmem:[#allocation14 + $0x10] sm:$0xff] }
0x32e1   :  { %4037 = vmatpush3.msra.mxu1 %v3800_v29 }
0x32e2   :  { %v3521_v1 = vsel %vm478_vm4, %v3516_v43, %v3519_v56  ;;  %v3533_v49 = vsel %vm478_vm4, %v3516_v43, 0.0  ;;  %4038 = vmatprep.subr.mxu1 %v4441_v0  ;;  %v3566_v56 = vsel %vm427_vm5, %v5977_v55, %v5974_v35 }
0x32e3   :  { %3207 = vrot.lane.b32.xlu0 %v3205_v9, %s4442_s8  ;;  %3524 = vrot.lane.b32.xlu1 %v3521_v1, %s4442_s8  ;;  %v3394_v36 = vpop.permute.xlu1 %3393 }
0x32e4   :  { %3396 = vst.msk [vmem:[#allocation4 + $0x8] sm:$0xff] %vm127_vm0, %v3394_v36  ;;  %4039 = vmatpush3.msra.mxu1 %v3799_v38 }
0x32e5   :  { %4040 = vmatprep.subr.mxu1 %v4441_v0  ;;  %v3522_v0 = vsel %vm478_vm4, %v5983_v40, %v5979_v52 }
0x32e6   :  { %4041 = vmatpush3.msra.mxu1 %v3798_v62 }
0x32e7   :  { %2835 = vrot.lane.b32.xlu0 %v2833_v17, %s4442_s8  ;;  %2419 = vrot.lane.b32.xlu1 %v2417_v28, %s4442_s8  ;;  %v3022_v46 = vpop.permute.xlu1 %3021 }
0x32e8   :  { %3024 = vst.msk [vmem:[#allocation4 + $0x18] sm:$0xff] %vm127_vm0, %v3022_v46 }
0x32eb   :  { %2463 = vrot.lane.b32.xlu0 %v2461_v16, %s4442_s8  ;;  %2791 = vrot.lane.b32.xlu1 %v2789_v8, %s4442_s8  ;;  %v2650_v34 = vpop.permute.xlu1 %2649  ;;  %v3592_v14 = vld [vmem:[#allocation4 + $0x8] sm:$0xff] }
0x32ec   :  { %2652 = vst.msk [vmem:[#allocation4 + $0x28] sm:$0xff] %vm127_vm0, %v2650_v34 }
0x32ef   :  { %3562 = vrot.lane.b32.xlu0 %v5958_v5, %s4445_s1  ;;  %3609 = vrot.lane.b32.xlu1 %v3592_v14, %s4442_s8  ;;  %v2278_v63 = vpop.permute.xlu1 %2277  ;;  %v3646_v5 = vld [vmem:[#allocation13 + $0x38] sm:$0xff] }
0x32f0   :  { %2280 = vst.msk [vmem:[#allocation4 + $0x38] sm:$0xff] %vm127_vm0, %v2278_v63  ;;  %3998 = vmatprep.subr.mxu0 %v3646_v5  ;;  %v3594_v27 = vld [vmem:[#allocation4 + $0x18] sm:$0xff] }
0x32f1   :  { %3999 = vmatpush3.msra.mxu0 %v3646_v5 }
0x32f2   :  { %4000 = vmatprep.subr.mxu0 %v3645_v30 }
0x32f3   :  { %2233 = vrot.lane.b32.xlu0 %v2231_v32, %s4442_s8  ;;  %4001 = vmatpush3.msra.mxu0 %v3645_v30  ;;  %v3596_v2 = vld [vmem:[#allocation4 + $0x28] sm:$0xff] }
0x32f4   :  { %4002 = vmatprep.subr.mxu0 %v3644_v22 }
0x32f5   :  { %4003 = vmatpush3.msra.mxu0 %v3644_v22 }
0x32f6   :  { %4004 = vmatprep.subr.mxu0 %v3643_v53 }
0x32f7   :  { %2605 = vrot.lane.b32.xlu0 %v2603_v20, %s4442_s8  ;;  %4005 = vmatpush3.msra.mxu0 %v3643_v53  ;;  %v3598_v51 = vld [vmem:[#allocation4 + $0x38] sm:$0xff] }
0x32f8   :  { %4006 = vmatprep.subr.mxu0 %v3642_v24 }
0x32f9   :  { %4007 = vmatpush3.msra.mxu0 %v3642_v24 }
0x32fa   :  { %4008 = vmatprep.subr.mxu0 %v3641_v25 }
0x32fb   :  { %2977 = vrot.lane.b32.xlu0 %v2975_v21, %s4442_s8  ;;  %4009 = vmatpush3.msra.mxu0 %v3641_v25 }
0x32fc   :  { %4010 = vmatprep.subr.mxu0 %v3640_v48 }
0x32fd   :  { %4011 = vmatpush3.msra.mxu0 %v3640_v48  ;;  %v3962_v48 = vld [vmem:[%s6170_s9] ss:$0 sm:$0xff] }
0x32fe   :  { %4012 = vmatprep.subr.mxu0 %v3639_v4 }
0x32ff   :  { %3163 = vrot.lane.b32.xlu0 %v3161_v60, %s4442_s8  ;;  %4013 = vmatpush3.msra.mxu0 %v3639_v4 }
0x3303   :  { %3349 = vrot.lane.b32.xlu0 %v3347_v45, %s4442_s8 }
0x3307   :  { %3535 = vrot.lane.b32.xlu0 %v3533_v49, %s4442_s8 }
0x3351   :  { %v3580_v50 = vpop.permute.xlu0 %3579 }
0x3352   :  { %3582 = vst.msk [vmem:[#allocation4] sm:$0xff] %vm127_vm0, %v3580_v50 }
0x3355   :  { %v3208_v47 = vpop.permute.xlu0 %3207  ;;  %v3525_v58 = vpop.permute.xlu1 %3524 }
0x3356   :  { %3210 = vst.msk [vmem:[#allocation4 + $0x10] sm:$0xff] %vm127_vm0, %v3208_v47  ;;  %3527 = vst.msk [vmem:[#allocation5] sm:$0xff] %vm127_vm0, %v3525_v58 }
0x3359   :  { %v2836_v6 = vpop.permute.xlu0 %2835  ;;  %v2420_v15 = vpop.permute.xlu1 %2419  ;;  %v3591_v57 = vld [vmem:[#allocation4] sm:$0xff] }
0x335a   :  { %2838 = vst.msk [vmem:[#allocation4 + $0x20] sm:$0xff] %vm127_vm0, %v2836_v6  ;;  %2422 = vst.msk [vmem:[#allocation3 + $0x8] sm:$0xff] %vm127_vm0, %v2420_v15 }
0x335d   :  { %v2464_v23 = vpop.permute.xlu0 %2463  ;;  %v2792_v26 = vpop.permute.xlu1 %2791  ;;  %v3593_v61 = vld [vmem:[#allocation4 + $0x10] sm:$0xff]  ;;  %v3792_v39 = vld [vmem:[#allocation5] sm:$0xff] }
0x335e   :  { %2466 = vst.msk [vmem:[#allocation4 + $0x30] sm:$0xff] %vm127_vm0, %v2464_v23  ;;  %2794 = vst.msk [vmem:[#allocation3 + $0x18] sm:$0xff] %vm127_vm0, %v2792_v26  ;;  %3611 = vrot.lane.b32.xlu1 %v3593_v61, %s4442_s8 }
0x3361   :  { %v3563_v41 = vpop.permute.xlu0 %3562  ;;  %v3595_v33 = vld [vmem:[#allocation4 + $0x20] sm:$0xff]  ;;  %v3610_v52 = vpop.permute.xlu1 %3609  ;;  %v3584_v43 = vld [vmem:[#allocation3 + $0x8] sm:$0xff] }
0x3362   :  { %v3565_v19 = vsel %vm427_vm5, %v6005_v42, %v3563_v41  ;;  %3607 = vrot.lane.b32.xlu1 %v3591_v57, %s4442_s8  ;;  %v3632_v28 = vsel %vm127_vm0, %v3584_v43, %v3610_v52  ;;  %v3971_v41 = vld [vmem:[%s6172_s11] ss:$0 sm:$0xff] }
0x3363   :  { %3568 = vrot.lane.b32.xlu0 %v3565_v19, %s4442_s8 }
0x3365   :  { %v2234_v59 = vpop.permute.xlu0 %2233  ;;  %v3597_v11 = vld [vmem:[#allocation4 + $0x30] sm:$0xff]  ;;  %v3586_v35 = vld [vmem:[#allocation3 + $0x18] sm:$0xff] }
0x3366   :  { %2236 = vst.msk [vmem:[#allocation3] sm:$0xff] %vm127_vm0, %v2234_v59  ;;  %3613 = vrot.lane.b32.xlu1 %v3594_v27, %s4442_s8 }
0x3367   :  { %3617 = vrot.lane.b32.xlu0 %v3596_v2, %s4442_s8 }
0x3369   :  { %v2606_v44 = vpop.permute.xlu0 %2605 }
0x336a   :  { %2608 = vst.msk [vmem:[#allocation3 + $0x10] sm:$0xff] %vm127_vm0, %v2606_v44  ;;  %3615 = vrot.lane.b32.xlu1 %v3595_v33, %s4442_s8 }
0x336b   :  { %3621 = vrot.lane.b32.xlu0 %v3598_v51, %s4442_s8 }
0x336d   :  { %v2978_v13 = vpop.permute.xlu0 %2977  ;;  %v3583_v9 = vld [vmem:[#allocation3] sm:$0xff] }
0x336e   :  { %2980 = vst.msk [vmem:[#allocation3 + $0x20] sm:$0xff] %vm127_vm0, %v2978_v13  ;;  %3619 = vrot.lane.b32.xlu1 %v3597_v11, %s4442_s8 }
0x336f   :  { %3529 = vrot.lane.b32.xlu0 %v3522_v0, %s4445_s1 }
0x3371   :  { %v3164_v42 = vpop.permute.xlu0 %3163  ;;  %v3585_v46 = vld [vmem:[#allocation3 + $0x10] sm:$0xff] }
0x3372   :  { %3166 = vst.msk [vmem:[#allocation3 + $0x28] sm:$0xff] %vm127_vm0, %v3164_v42  ;;  %3794 = vrot.lane.b32.xlu1 %v3792_v39, %s4442_s8 }
0x3375   :  { %v3350_v18 = vpop.permute.xlu0 %3349  ;;  %v3587_v34 = vld [vmem:[#allocation3 + $0x20] sm:$0xff] }
0x3376   :  { %3352 = vst.msk [vmem:[#allocation3 + $0x30] sm:$0xff] %vm127_vm0, %v3350_v18  ;;  %3573 = vrot.lane.b32.xlu1 %v3566_v56, %s4445_s1 }
0x3379   :  { %v3536_v37 = vpop.permute.xlu0 %3535  ;;  %v3588_v63 = vld [vmem:[#allocation3 + $0x28] sm:$0xff] }
0x337a   :  { %3538 = vst.msk [vmem:[#allocation3 + $0x38] sm:$0xff] %vm127_vm0, %v3536_v37 }
0x337d   :  { %v3589_v5 = vld [vmem:[#allocation3 + $0x30] sm:$0xff] }
0x3381   :  { %v3590_v22 = vld [vmem:[#allocation3 + $0x38] sm:$0xff] }
0x33d0   :  { %v3612_v40 = vpop.permute.xlu1 %3611 }
0x33d1   :  { %v3633_v54 = vsel %vm127_vm0, %v3585_v46, %v3612_v40 }
0x33d4   :  { %v3608_v1 = vpop.permute.xlu1 %3607 }
0x33d5   :  { %v3631_v36 = vsel %vm127_vm0, %v3583_v9, %v3608_v1  ;;  %v3569_v17 = vpop.permute.xlu0 %3568 }
0x33d6   :  { %3571 = vst.msk [vmem:[#allocation7] sm:$0xff] %vm127_vm0, %v3569_v17  ;;  %4014 = vmatprep.mubr.msk.f32.mxu0 %vm310_vm1, %v3631_v36 }
0x33d7   :  { %4015 = vmatmul.mubr.msk.f32.vlgmr.msra.gmra.mxu0 %vm310_vm1, %v3632_v28 }
0x33d8   :  { %4017 = vmatprep.mubr.msk.f32.mxu0 %vm310_vm1, %v3633_v54  ;;  %v3614_v55 = vpop.permute.xlu1 %3613 }
0x33d9   :  { %v3634_v8 = vsel %vm127_vm0, %v3586_v35, %v3614_v55  ;;  %v3618_v16 = vpop.permute.xlu0 %3617 }
0x33da   :  { %v3636_v21 = vsel %vm127_vm0, %v3588_v63, %v3618_v16 }
0x33db   :  { %4018 = vmatmul.mubr.msk.f32.gmra.mxu0 %vm310_vm1, %v3634_v8 }
0x33dc   :  { %v3616_v14 = vpop.permute.xlu1 %3615 }
0x33dd   :  { %v3635_v32 = vsel %vm127_vm0, %v3587_v34, %v3616_v14  ;;  %v3622_v20 = vpop.permute.xlu0 %3621  ;;  %v3791_v45 = vld [vmem:[#allocation7] sm:$0xff] }
0x33de   :  { %4020 = vmatprep.mubr.msk.f32.mxu0 %vm310_vm1, %v3635_v32  ;;  %v3638_v24 = vsel %vm127_vm0, %v3590_v22, %v3622_v20 }
0x33df   :  { %4021 = vmatmul.mubr.msk.f32.gmra.mxu0 %vm310_vm1, %v3636_v21 }
0x33e0   :  { %v3620_v30 = vpop.permute.xlu1 %3619 }
0x33e1   :  { %v3637_v60 = vsel %vm127_vm0, %v3589_v5, %v3620_v30  ;;  %v3530_v53 = vpop.permute.xlu0 %3529 }
0x33e2   :  { %3532 = vst.msk [vmem:[#allocation6] sm:$0xff] %vm127_vm0, %v3530_v53  ;;  %4023 = vmatprep.mubr.msk.f32.mxu0 %vm310_vm1, %v3637_v60 }
0x33e3   :  { %4024 = vmatmul.mubr.msk.f32.gmra.mxu0 %vm310_vm1, %v3638_v24 }
0x33e4   :  { %v3795_v49 = vpop.permute.xlu1 %3794 }
0x33e5   :  { %v3797_v25 = vsel %vm127_vm0, %v3791_v45, %v3795_v49 }
0x33e6   :  { %4043 = vmatmul.mubr.msk.f32.vlgmr.msra.gmra.mxu1 %vm310_vm1, %v3797_v25 }
0x33e8   :  { %v3574_v50 = vpop.permute.xlu1 %3573 }
0x33e9   :  { %3576 = vst.msk [vmem:[#allocation8] sm:$0xff] %vm127_vm0, %v3574_v50 }
0x3497   :  { %v4016_v4 = vpop.f32.mrf.mxu0 }
0x3498   :  { %v3750_v47 = vadd.f32 %v4016_v4, %v3962_v48 }
0x3499   :  { %v3744_v58 = vpop.f32.mrf.mxu0 }
0x349a   :  { %3784 = vst [vmem:[%s6173_s12 + $0x8] sm:$0xff] %v3750_v47  ;;  %v3745_v3 = vadd.f32 %v3962_v48, %v3744_v58 }
0x349b   :  { %v4019_v7 = vpop.f32.mrf.mxu0 }
0x349c   :  { %3783 = vst [vmem:[%s6173_s12] sm:$0xff] %v3745_v3  ;;  %v3760_v6 = vadd.f32 %v4019_v7, %v3962_v48 }
0x349d   :  { %v3754_v15 = vpop.f32.mrf.mxu0 }
0x349e   :  { %3786 = vst [vmem:[%s6173_s12 + $0x18] sm:$0xff] %v3760_v6  ;;  %v3755_v31 = vadd.f32 %v3962_v48, %v3754_v15 }
0x349f   :  { %v4022_v10 = vpop.f32.mrf.mxu0 }
0x34a0   :  { %3785 = vst [vmem:[%s6173_s12 + $0x10] sm:$0xff] %v3755_v31  ;;  %v3770_v23 = vadd.f32 %v4022_v10, %v3962_v48 }
0x34a1   :  { %v3764_v26 = vpop.f32.mrf.mxu0 }
0x34a2   :  { %3788 = vst [vmem:[%s6173_s12 + $0x28] sm:$0xff] %v3770_v23  ;;  %v3765_v61 = vadd.f32 %v3962_v48, %v3764_v26 }
0x34a3   :  { %v4025_v12 = vpop.f32.mrf.mxu0 }
0x34a4   :  { %3787 = vst [vmem:[%s6173_s12 + $0x20] sm:$0xff] %v3765_v61  ;;  %v3780_v29 = vadd.f32 %v4025_v12, %v3962_v48 }
0x34a5   :  { %v3774_v57 = vpop.f32.mrf.mxu0 }
0x34a6   :  { %3790 = vst [vmem:[%s6173_s12 + $0x38] sm:$0xff] %v3780_v29  ;;  %v3775_v19 = vadd.f32 %v3962_v48, %v3774_v57  ;;  %v3882_v38 = vpop.f32.mrf.mxu1 }
0x34a7   :  { %v3883_v62 = vadd.f32 %v3971_v41, %v3882_v38 }
0x34a8   :  { %3789 = vst [vmem:[%s6173_s12 + $0x30] sm:$0xff] %v3775_v19  ;;  %v4044_v59 = vpop.f32.mrf.mxu1 }
0x34a9   :  { %3886 = vst [vmem:[%s6174_s13] sm:$0xff] %v3883_v62 }
0x34aa   :  { %3895 = vsyncpa [#allocation10], 1 }
0x34ab   :  { %3896 = vsyncpa [#allocation12], 1 }
0x34ac   :  { %3897 = vsyncpa [#allocation15], 1 }

</bundles_post_ra>
